<compile_context>
chip_gen: v7x
topology: tpu7x:2x2x1
jax: 0.10.0
libtpu: 0.0.40
codegen_flags: <defaults>
</compile_context>

<pallas_src>
import functools

import jax
import jax.numpy as jnp
import numpy as np
from jax.experimental import pallas as pl
from jax.experimental.pallas import tpu as pltpu

_LANE = 128


def _rup(a, b):
    return ((a + b - 1) // b) * b


def _pick_vmem_limit(need_bytes):
    """Derive vmem_limit_bytes from actual buffer sizes, capped below physical."""
    cap = 128 * 1024 * 1024
    try:
        cap = int(pltpu.get_tpu_info().vmem_capacity_bytes)   # 64 MiB on v7x
    except Exception:
        pass
    hi = min(100 * 1024 * 1024, int(0.9 * cap))
    return int(min(max(2 * need_bytes, 32 * 1024 * 1024), hi))


# ----------------------------------------------------------------------------
# The single fused Bottleneck kernel
# ----------------------------------------------------------------------------
def _bottleneck_kernel(*refs, s, n, hq, wq, d, ph, pw, eps, m, mo, has_sc):
    it = iter(refs)
    x_ref = next(it)                                        # (m, CIP), s2d rows
    w0_ref, g0_ref, b0_ref = next(it), next(it), next(it)   # (CIP,KIP),(1,KIP)
    w1_ref, g1_ref, b1_ref = next(it), next(it), next(it)   # (9,KIP,KIP),(1,KIP)
    w2_ref, g2_ref, b2_ref = next(it), next(it), next(it)   # (KIP,COP),(1,COP)
    if has_sc:
        ws_ref, gs_ref, bs_ref = next(it), next(it), next(it)
    out_ref = next(it)                                      # (mo, COP)
    y0pad_ref = next(it)                                    # (s*s*n, Hq+2ph, Wq_tot, KIP)

    op_dt = y0pad_ref.dtype              # matmul-operand dtype (f32 or bf16)
    kip = w0_ref.shape[1]
    ssn, hq_tot, wq_tot, _ = y0pad_ref.shape

    def mm(a, b):
        # MXU matmul; operands optionally bf16, accumulation always f32.
        return jnp.dot(a.astype(op_dt), b.astype(op_dt),
                       preferred_element_type=jnp.float32)

    def bn(acc, g_ref, b_ref, count, relu):
        # Training-mode BatchNorm (biased var), one-pass stats in f32,
        # applied as per-channel scale/shift (2 VPU ops / element).
        s1 = jnp.sum(acc, axis=0, keepdims=True)
        s2 = jnp.sum(acc * acc, axis=0, keepdims=True)
        inv = 1.0 / count
        mean = s1 * inv
        var = jnp.maximum(s2 * inv - mean * mean, 0.0)       # cancellation guard
        scale = g_ref[...] * jax.lax.rsqrt(var + eps)        # (1, C), EUP rsqrt
        shift = b_ref[...] - mean * scale
        y = acc * scale + shift
        return jnp.maximum(y, 0.0) if relu else y

    x = x_ref[...]                                           # (m, CIP) f32

    # ---- stage 0: 1x1 conv + bn0 + relu (full resolution, stats over m) -----
    y0 = bn(mm(x, w0_ref[...]), g0_ref, b0_ref, m, True)     # (m, KIP) f32

    # ---- stash y0 (space-to-depth row order) into the padded scratch --------
    # Only the halo strips are zeroed; the interior is overwritten anyway.
    zdt = y0pad_ref.dtype
    y0pad_ref[:, 0:ph, :, :] = jnp.zeros((ssn, ph, wq_tot, kip), zdt)
    y0pad_ref[:, ph + hq:hq_tot, :, :] = jnp.zeros(
        (ssn, hq_tot - ph - hq, wq_tot, kip), zdt)
    y0pad_ref[:, :, 0:pw, :] = jnp.zeros((ssn, hq_tot, pw, kip), zdt)
    y0pad_ref[:, :, pw + wq:wq_tot, :] = jnp.zeros(
        (ssn, hq_tot, wq_tot - pw - wq, kip), zdt)
    y0pad_ref[:, ph:ph + hq, pw:pw + wq, :] = (
        y0.reshape(ssn, hq, wq, kip).astype(zdt))

    # ---- stage 1: 3x3 dilated, stride-s conv at strided outputs only --------
    # Each tap is a contiguous slice of the phase grid (rh, rw): no masking,
    # no stride^2 extra matmul work.
    acc1 = jnp.zeros((mo, kip), jnp.float32)
    for ky in range(3):
        ah = ky * d - d
        rh = ah % s
        hq0 = ph + (ah - rh) // s
        for kx in range(3):
            aw = kx * d - d
            rw = aw % s
            wq0 = pw + (aw - rw) // s
            base = (rh * s + rw) * n
            tap = y0pad_ref[base:base + n, hq0:hq0 + hq, wq0:wq0 + wq, :]
            acc1 = acc1 + mm(tap.reshape(mo, kip), w1_ref[ky * 3 + kx])
    # TODO(synk): pack the 3 kx taps along K (K=3*KIP, bf16) for the 256-deep
    #             v6e/v7x MXU.
    y1 = bn(acc1, g1_ref, b1_ref, mo, True)

    # ---- shortcut: strided rows of x are exactly the first mo rows ----------
    xs = x[0:mo, :]
    if has_sc:
        sc = bn(mm(xs, ws_ref[...]), gs_ref, bs_ref, mo, False)
    else:
        sc = xs                                              # identity (s == 1)

    # ---- stage 2: 1x1 conv + bn2 + residual add + relu ----------------------
    y2 = bn(mm(y1, w2_ref[...]), g2_ref, b2_ref, mo, False)
    out_ref[...] = jnp.maximum(y2 + sc, 0.0).astype(out_ref.dtype)


# ----------------------------------------------------------------------------
# Wrapper: NCHW -> s2d NHWC rows, lane padding, pallas_call
# ----------------------------------------------------------------------------
def bottleneck_forward(x_nchw, p, *, stride, dilation, eps=1e-5, use_bf16=False):
    s, d = int(stride), int(dilation)
    x = jnp.transpose(x_nchw, (0, 2, 3, 1)).astype(jnp.float32)    # NHWC
    N, H, W, cin = x.shape
    inter = p['w0'].shape[1]
    cout = 4 * inter
    has_sc = p['ws'] is not None
    if not has_sc:
        assert cin == cout and s == 1, "identity shortcut needs cin==4*inter, s==1"
    if s > 1:
        assert H % s == 0 and W % s == 0, "stride>1 requires H, W divisible by stride"

    cip, kip, cop = _rup(cin, _LANE), _rup(inter, _LANE), _rup(cout, _LANE)
    hq, wq = H // s, W // s                 # strided output resolution
    m, mo = N * H * W, N * hq * wq

    ph = -(-d // s)                         # ceil(d/s) halo rows (q units)
    pw = _rup(-(-d // s), 8)                # sublane-aligned left halo
    hq_tot = hq + 2 * ph
    wq_tot = _rup(pw + wq + -(-d // s), 8)

    # Space-to-depth row order (rh, rw, n, qh, qw): fused into the NCHW->NHWC
    # transpose the wrapper needs anyway (single XLA copy).
    x_r = x.reshape(N, hq, s, wq, s, cin).transpose(2, 4, 0, 1, 3, 5)
    x_flat = jnp.pad(x_r.reshape(m, cin), ((0, 0), (0, cip - cin)))

    wdt = jnp.bfloat16 if use_bf16 else jnp.float32
    pad2 = lambda a, r, c: jnp.pad(
        a, ((0, r - a.shape[0]), (0, c - a.shape[1]))).astype(wdt)
    padv = lambda v, c: jnp.pad(v, (0, c - v.shape[0])).reshape(1, c).astype(jnp.float32)

    w1p = jnp.pad(p['w1'], ((0, 0), (0, 0), (0, kip - inter), (0, kip - inter)))
    inputs = [x_flat,
              pad2(p['w0'], cip, kip), padv(p['g0'], kip), padv(p['b0'], kip),
              w1p.reshape(9, kip, kip).astype(wdt),
              padv(p['g1'], kip), padv(p['b1'], kip),
              pad2(p['w2'], kip, cop), padv(p['g2'], cop), padv(p['b2'], cop)]
    if has_sc:
        inputs += [pad2(p['ws'], cip, cop), padv(p['gs'], cop), padv(p['bs'], cop)]

    kernel = functools.partial(
        _bottleneck_kernel, s=s, n=N, hq=hq, wq=wq, d=d, ph=ph, pw=pw,
        eps=eps, m=m, mo=mo, has_sc=has_sc)

    op_bytes = 2 if use_bf16 else 4
    scratch_bytes = (s * s * N) * hq_tot * wq_tot * kip * op_bytes
    in_bytes = sum(int(np.prod(a.shape)) * a.dtype.itemsize for a in inputs)
    out_bytes = mo * cop * 4
    live_bytes = 4 * (m * cip + 2 * m * kip) + 4 * mo * (2 * kip + 3 * cop)
    vmem_limit = _pick_vmem_limit(in_bytes + out_bytes + scratch_bytes + live_bytes)

    flops = 2 * (m * cip * kip + mo * 9 * kip * kip + mo * kip * cop
                 + (mo * cip * cop if has_sc else 0))

    out = pl.pallas_call(
        kernel,
        out_shape=jax.ShapeDtypeStruct((mo, cop), jnp.float32),
        in_specs=[pl.BlockSpec(memory_space=pltpu.MemorySpace.VMEM)
                  for _ in inputs],
        out_specs=pl.BlockSpec(memory_space=pltpu.MemorySpace.VMEM),
        scratch_shapes=[pltpu.VMEM((s * s * N, hq_tot, wq_tot, kip),
                                   jnp.bfloat16 if use_bf16 else jnp.float32)],
        compiler_params=pltpu.CompilerParams(vmem_limit_bytes=vmem_limit),
        cost_estimate=pl.CostEstimate(flops=flops,
                                      transcendentals=2 * (kip + cop),
                                      bytes_accessed=in_bytes + out_bytes),
    )(*inputs)

    out = out[:, :cout].reshape(N, hq, wq, cout)       # drop lane padding
    return jnp.transpose(out, (0, 3, 1, 2))            # back to NCHW


# ----------------------------------------------------------------------------
# Pure-JAX reference (PyTorch training-mode semantics).  bf16_ops=True models
# bf16 MXU operand rounding (f32 accumulation / f32 BN math) for the bf16 run.
# ----------------------------------------------------------------------------
def bottleneck_ref(x_nchw, p, *, stride, dilation, eps=1e-5, bf16_ops=False):
    f = (lambda a: a.astype(jnp.bfloat16)) if bf16_ops else (lambda a: a)
    x = jnp.transpose(x_nchw, (0, 2, 3, 1)).astype(jnp.float32)

    def bn(y, g, b, relu):
        mean = jnp.mean(y, axis=(0, 1, 2), keepdims=True)
        var = jnp.mean((y - mean) ** 2, axis=(0, 1, 2), keepdims=True)
        out = (y - mean) * jax.lax.rsqrt(var + eps) * g + b
        return jnp.maximum(out, 0.0) if relu else out

    y0 = bn(jnp.einsum('nhwc,cd->nhwd', f(x), f(p['w0']),
                       preferred_element_type=jnp.float32),
            p['g0'], p['b0'], True)
    y1c = jax.lax.conv_general_dilated(
        f(y0), f(p['w1']), window_strides=(stride, stride),
        padding=[(dilation, dilation), (dilation, dilation)],
        rhs_dilation=(dilation, dilation),
        dimension_numbers=('NHWC', 'HWIO', 'NHWC'),
        preferred_element_type=jnp.float32)
    y1 = bn(y1c, p['g1'], p['b1'], True)
    xs = x[:, ::stride, ::stride, :]
    if p['ws'] is not None:
        sc = bn(jnp.einsum('nhwc,cd->nhwd', f(xs), f(p['ws']),
                           preferred_element_type=jnp.float32),
                p['gs'], p['bs'], False)
    else:
        sc = xs
    y2 = bn(jnp.einsum('nhwc,cd->nhwd', f(y1), f(p['w2']),
                       preferred_element_type=jnp.float32),
            p['g2'], p['b2'], False)
    out = jnp.maximum(y2 + sc, 0.0)
    return jnp.transpose(out, (0, 3, 1, 2))


# ----------------------------------------------------------------------------
# Deterministic parameter init (shapes follow the nn.Module)
# ----------------------------------------------------------------------------
def init_params(key, in_channel, inter_channel, stride):
    expansion = 4
    ks = jax.random.split(key, 12)
    scale = lambda fan_in: 1.0 / np.sqrt(fan_in)
    p = {
        'w0': jax.random.normal(ks[0], (in_channel, inter_channel),
                                jnp.float32) * scale(in_channel),
        'g0': 0.5 + jax.random.uniform(ks[1], (inter_channel,), jnp.float32),
        'b0': 0.1 * jax.random.normal(ks[2], (inter_channel,), jnp.float32),
        'w1': jax.random.normal(ks[3], (3, 3, inter_channel, inter_channel),
                                jnp.float32) * scale(9 * inter_channel),
        'g1': 0.5 + jax.random.uniform(ks[4], (inter_channel,), jnp.float32),
        'b1': 0.1 * jax.random.normal(ks[5], (inter_channel,), jnp.float32),
        'w2': jax.random.normal(ks[6], (inter_channel, inter_channel * expansion),
                                jnp.float32) * scale(inter_channel),
        'g2': 0.5 + jax.random.uniform(ks[7], (inter_channel * expansion,),
                                       jnp.float32),
        'b2': 0.1 * jax.random.normal(ks[8], (inter_channel * expansion,),
                                      jnp.float32),
    }
    if in_channel != inter_channel * expansion or stride != 1:
        p['ws'] = jax.random.normal(ks[9], (in_channel, inter_channel * expansion),
                                    jnp.float32) * scale(in_channel)
        p['gs'] = 0.5 + jax.random.uniform(ks[10], (inter_channel * expansion,),
                                           jnp.float32)
        p['bs'] = 0.1 * jax.random.normal(ks[11], (inter_channel * expansion,),
                                          jnp.float32)
    else:
        p['ws'] = p['gs'] = p['bs'] = None
    return p


if __name__ == "__main__":
    N, H, W = 2, 16, 16
    # (in_channel, inter_channel, stride, dilation)
    configs = [
        (16, 8, 2, 2),    # conv shortcut, strided + dilated (single s2d phase)
        (32, 8, 1, 1),    # identity shortcut, stride 1
        (16, 8, 2, 1),    # conv shortcut, strided, mixed s2d phases
    ]

    key = jax.random.PRNGKey(0)
    # f32-operand path: strict functional check vs. the pure-JAX reference.
    for (cin, inter, s, d) in configs:
        key, k_x, k_p = jax.random.split(key, 3)
        x = jax.random.normal(k_x, (N, cin, H, W), jnp.float32)    # NCHW input
        params = init_params(k_p, cin, inter, s)
        out = jax.block_until_ready(
            bottleneck_forward(x, params, stride=s, dilation=d))
        ref = jax.block_until_ready(
            bottleneck_ref(x, params, stride=s, dilation=d))
        assert out.shape == (N, 4 * inter, H // s, W // s), out.shape
        np.testing.assert_allclose(np.asarray(out), np.asarray(ref),
                                   rtol=1e-3, atol=2e-3)

    # bf16 MXU-operand path (v5e/v6e/v7x deployment mode): BN/stats stay f32.
    # Checked against a reference applying the same bf16 operand rounding; the
    # tolerance is coarse because one bf16 ulp (~2^-8) re-rounding difference on
    # an intermediate activation is amplified ~(gamma/std) per BatchNorm stage.
    cin, inter, s, d = configs[0]
    key, k_x, k_p = jax.random.split(key, 3)
    x = jax.random.normal(k_x, (N, cin, H, W), jnp.float32)
    params = init_params(k_p, cin, inter, s)
    out_bf = jax.block_until_ready(
        bottleneck_forward(x, params, stride=s, dilation=d, use_bf16=True))
    ref_bf = jax.block_until_ready(
        bottleneck_ref(x, params, stride=s, dilation=d, bf16_ops=True))
    assert out_bf.shape == (N, 4 * inter, H // s, W // s), out_bf.shape
    np.testing.assert_allclose(np.asarray(out_bf), np.asarray(ref_bf),
                               rtol=1e-1, atol=1e-1)

    print("KERNEL_OK")
</pallas_src>

<mosaic_0001>
module attributes {stable_mosaic.version = 11 : i64} {
  func.func @_bottleneck_kernel(%arg0: memref<512x128xf32, #tpu.memory_space<vmem>>, %arg1: memref<128x128xf32, #tpu.memory_space<vmem>>, %arg2: memref<1x128xf32, #tpu.memory_space<vmem>>, %arg3: memref<1x128xf32, #tpu.memory_space<vmem>>, %arg4: memref<9x128x128xf32, #tpu.memory_space<vmem>>, %arg5: memref<1x128xf32, #tpu.memory_space<vmem>>, %arg6: memref<1x128xf32, #tpu.memory_space<vmem>>, %arg7: memref<128x128xf32, #tpu.memory_space<vmem>>, %arg8: memref<1x128xf32, #tpu.memory_space<vmem>>, %arg9: memref<1x128xf32, #tpu.memory_space<vmem>>, %arg10: memref<128x128xf32, #tpu.memory_space<vmem>>, %arg11: memref<1x128xf32, #tpu.memory_space<vmem>>, %arg12: memref<1x128xf32, #tpu.memory_space<vmem>>, %arg13: memref<128x128xf32, #tpu.memory_space<vmem>>, %arg14: memref<8x10x24x128xf32, #tpu.memory_space<vmem>>) attributes {dimension_semantics = [], scalar_prefetch = 0 : i64, scratch_operands = 1 : i64, tpu.core_type = #tpu.core_type<tc>} {
    %c0 = arith.constant 0 : index
    %c0_0 = arith.constant 0 : index
    %0 = vector.load %arg0[%c0, %c0_0] : memref<512x128xf32, #tpu.memory_space<vmem>>, vector<512x128xf32>
    %c0_1 = arith.constant 0 : index
    %c0_2 = arith.constant 0 : index
    %1 = vector.load %arg1[%c0_1, %c0_2] : memref<128x128xf32, #tpu.memory_space<vmem>>, vector<128x128xf32>
    %cst = arith.constant dense<0.000000e+00> : vector<512x128xf32>
    %2 = tpu.matmul %0, %1, %cst {dimension_numbers = #tpu.dot_dimension_numbers<[1], [0], [0], [1], [0, 0, 1, 1], [], []>} : vector<512x128xf32>, vector<128x128xf32>, vector<512x128xf32> -> vector<512x128xf32>
    %cst_3 = arith.constant dense<0.000000e+00> : vector<128xf32>
    %3 = vector.multi_reduction <add>, %2, %cst_3 [0] : vector<512x128xf32> to vector<128xf32>
    %4 = vector.shape_cast %3 : vector<128xf32> to vector<1x128xf32>
    %5 = arith.mulf %2, %2 : vector<512x128xf32>
    %cst_4 = arith.constant dense<0.000000e+00> : vector<128xf32>
    %6 = vector.multi_reduction <add>, %5, %cst_4 [0] : vector<512x128xf32> to vector<128xf32>
    %7 = vector.shape_cast %6 : vector<128xf32> to vector<1x128xf32>
    %cst_5 = arith.constant 0.001953125 : f32
    %8 = vector.broadcast %cst_5 : f32 to vector<1x128xf32>
    %9 = arith.mulf %4, %8 : vector<1x128xf32>
    %cst_6 = arith.constant 0.001953125 : f32
    %10 = vector.broadcast %cst_6 : f32 to vector<1x128xf32>
    %11 = arith.mulf %7, %10 : vector<1x128xf32>
    %12 = arith.mulf %9, %9 : vector<1x128xf32>
    %13 = arith.subf %11, %12 : vector<1x128xf32>
    %cst_7 = arith.constant 0.000000e+00 : f32
    %14 = vector.broadcast %cst_7 : f32 to vector<1x128xf32>
    %15 = arith.maximumf %13, %14 : vector<1x128xf32>
    %c0_8 = arith.constant 0 : index
    %c0_9 = arith.constant 0 : index
    %16 = vector.load %arg2[%c0_8, %c0_9] : memref<1x128xf32, #tpu.memory_space<vmem>>, vector<1x128xf32>
    %cst_10 = arith.constant 9.99999974E-6 : f32
    %17 = vector.broadcast %cst_10 : f32 to vector<1x128xf32>
    %18 = arith.addf %15, %17 : vector<1x128xf32>
    %19 = math.rsqrt %18 : vector<1x128xf32>
    %20 = arith.mulf %16, %19 : vector<1x128xf32>
    %c0_11 = arith.constant 0 : index
    %c0_12 = arith.constant 0 : index
    %21 = vector.load %arg3[%c0_11, %c0_12] : memref<1x128xf32, #tpu.memory_space<vmem>>, vector<1x128xf32>
    %22 = arith.mulf %9, %20 : vector<1x128xf32>
    %23 = arith.subf %21, %22 : vector<1x128xf32>
    %24 = vector.broadcast %20 : vector<1x128xf32> to vector<512x128xf32>
    %25 = arith.mulf %2, %24 : vector<512x128xf32>
    %26 = vector.broadcast %23 : vector<1x128xf32> to vector<512x128xf32>
    %27 = arith.addf %25, %26 : vector<512x128xf32>
    %cst_13 = arith.constant 0.000000e+00 : f32
    %28 = vector.broadcast %cst_13 : f32 to vector<512x128xf32>
    %29 = arith.maximumf %27, %28 : vector<512x128xf32>
    %cst_14 = arith.constant 0.000000e+00 : f32
    %30 = vector.broadcast %cst_14 : f32 to vector<8x1x24x128xf32>
    %c0_15 = arith.constant 0 : index
    %c0_16 = arith.constant 0 : index
    %c0_17 = arith.constant 0 : index
    %c0_18 = arith.constant 0 : index
    %31 = vector.load %arg14[%c0_15, %c0_16, %c0_17, %c0_18] : memref<8x10x24x128xf32, #tpu.memory_space<vmem>>, vector<8x1x24x128xf32>
    tpu.vector_store %arg14[%c0_15, %c0_16, %c0_17, %c0_18], %30 {strides = array<i32>} : memref<8x10x24x128xf32, #tpu.memory_space<vmem>>, vector<8x1x24x128xf32>,
    %cst_19 = arith.constant 0.000000e+00 : f32
    %32 = vector.broadcast %cst_19 : f32 to vector<8x1x24x128xf32>
    %c0_20 = arith.constant 0 : index
    %c9 = arith.constant 9 : index
    %c0_21 = arith.constant 0 : index
    %c0_22 = arith.constant 0 : index
    %33 = vector.load %arg14[%c0_20, %c9, %c0_21, %c0_22] : memref<8x10x24x128xf32, #tpu.memory_space<vmem>>, vector<8x1x24x128xf32>
    tpu.vector_store %arg14[%c0_20, %c9, %c0_21, %c0_22], %32 {strides = array<i32>} : memref<8x10x24x128xf32, #tpu.memory_space<vmem>>, vector<8x1x24x128xf32>,
    %cst_23 = arith.constant 0.000000e+00 : f32
    %34 = vector.broadcast %cst_23 : f32 to vector<8x10x8x128xf32>
    %c0_24 = arith.constant 0 : index
    %c0_25 = arith.constant 0 : index
    %c0_26 = arith.constant 0 : index
    %c0_27 = arith.constant 0 : index
    %35 = vector.load %arg14[%c0_24, %c0_25, %c0_26, %c0_27] : memref<8x10x24x128xf32, #tpu.memory_space<vmem>>, vector<8x10x8x128xf32>
    tpu.vector_store %arg14[%c0_24, %c0_25, %c0_26, %c0_27], %34 {strides = array<i32>} : memref<8x10x24x128xf32, #tpu.memory_space<vmem>>, vector<8x10x8x128xf32>,
    %cst_28 = arith.constant 0.000000e+00 : f32
    %36 = vector.broadcast %cst_28 : f32 to vector<8x10x8x128xf32>
    %c0_29 = arith.constant 0 : index
    %c0_30 = arith.constant 0 : index
    %c16 = arith.constant 16 : index
    %c0_31 = arith.constant 0 : index
    %37 = vector.load %arg14[%c0_29, %c0_30, %c16, %c0_31] : memref<8x10x24x128xf32, #tpu.memory_space<vmem>>, vector<8x10x8x128xf32>
    tpu.vector_store %arg14[%c0_29, %c0_30, %c16, %c0_31], %36 {strides = array<i32>} : memref<8x10x24x128xf32, #tpu.memory_space<vmem>>, vector<8x10x8x128xf32>,
    %38 = vector.shape_cast %29 : vector<512x128xf32> to vector<8x8x8x128xf32>
    %c0_32 = arith.constant 0 : index
    %c1 = arith.constant 1 : index
    %c8 = arith.constant 8 : index
    %c0_33 = arith.constant 0 : index
    %39 = vector.load %arg14[%c0_32, %c1, %c8, %c0_33] : memref<8x10x24x128xf32, #tpu.memory_space<vmem>>, vector<8x8x8x128xf32>
    tpu.vector_store %arg14[%c0_32, %c1, %c8, %c0_33], %38 {strides = array<i32>} : memref<8x10x24x128xf32, #tpu.memory_space<vmem>>, vector<8x8x8x128xf32>,
    %cst_34 = arith.constant 0.000000e+00 : f32
    %40 = vector.broadcast %cst_34 : f32 to vector<128x128xf32>
    %c0_35 = arith.constant 0 : index
    %c0_36 = arith.constant 0 : index
    %c7 = arith.constant 7 : index
    %c0_37 = arith.constant 0 : index
    %41 = vector.load %arg14[%c0_35, %c0_36, %c7, %c0_37] : memref<8x10x24x128xf32, #tpu.memory_space<vmem>>, vector<2x8x8x128xf32>
    %42 = vector.shape_cast %41 : vector<2x8x8x128xf32> to vector<128x128xf32>
    %c0_38 = arith.constant 0 : index
    %c0_39 = arith.constant 0 : index
    %c0_40 = arith.constant 0 : index
    %43 = vector.load %arg4[%c0_38, %c0_39, %c0_40] : memref<9x128x128xf32, #tpu.memory_space<vmem>>, vector<1x128x128xf32>
    %44 = vector.shape_cast %43 : vector<1x128x128xf32> to vector<128x128xf32>
    %cst_41 = arith.constant dense<0.000000e+00> : vector<128x128xf32>
    %45 = tpu.matmul %42, %44, %cst_41 {dimension_numbers = #tpu.dot_dimension_numbers<[1], [0], [0], [1], [0, 0, 1, 1], [], []>} : vector<128x128xf32>, vector<128x128xf32>, vector<128x128xf32> -> vector<128x128xf32>
    %46 = arith.addf %40, %45 : vector<128x128xf32>
    %c0_42 = arith.constant 0 : index
    %c0_43 = arith.constant 0 : index
    %c8_44 = arith.constant 8 : index
    %c0_45 = arith.constant 0 : index
    %47 = vector.load %arg14[%c0_42, %c0_43, %c8_44, %c0_45] : memref<8x10x24x128xf32, #tpu.memory_space<vmem>>, vector<2x8x8x128xf32>
    %48 = vector.shape_cast %47 : vector<2x8x8x128xf32> to vector<128x128xf32>
    %c1_46 = arith.constant 1 : index
    %c0_47 = arith.constant 0 : index
    %c0_48 = arith.constant 0 : index
    %49 = vector.load %arg4[%c1_46, %c0_47, %c0_48] : memref<9x128x128xf32, #tpu.memory_space<vmem>>, vector<1x128x128xf32>
    %50 = vector.shape_cast %49 : vector<1x128x128xf32> to vector<128x128xf32>
    %cst_49 = arith.constant dense<0.000000e+00> : vector<128x128xf32>
    %51 = tpu.matmul %48, %50, %cst_49 {dimension_numbers = #tpu.dot_dimension_numbers<[1], [0], [0], [1], [0, 0, 1, 1], [], []>} : vector<128x128xf32>, vector<128x128xf32>, vector<128x128xf32> -> vector<128x128xf32>
    %52 = arith.addf %46, %51 : vector<128x128xf32>
    %c0_50 = arith.constant 0 : index
    %c0_51 = arith.constant 0 : index
    %c9_52 = arith.constant 9 : index
    %c0_53 = arith.constant 0 : index
    %53 = vector.load %arg14[%c0_50, %c0_51, %c9_52, %c0_53] : memref<8x10x24x128xf32, #tpu.memory_space<vmem>>, vector<2x8x8x128xf32>
    %54 = vector.shape_cast %53 : vector<2x8x8x128xf32> to vector<128x128xf32>
    %c2 = arith.constant 2 : index
    %c0_54 = arith.constant 0 : index
    %c0_55 = arith.constant 0 : index
    %55 = vector.load %arg4[%c2, %c0_54, %c0_55] : memref<9x128x128xf32, #tpu.memory_space<vmem>>, vector<1x128x128xf32>
    %56 = vector.shape_cast %55 : vector<1x128x128xf32> to vector<128x128xf32>
    %cst_56 = arith.constant dense<0.000000e+00> : vector<128x128xf32>
    %57 = tpu.matmul %54, %56, %cst_56 {dimension_numbers = #tpu.dot_dimension_numbers<[1], [0], [0], [1], [0, 0, 1, 1], [], []>} : vector<128x128xf32>, vector<128x128xf32>, vector<128x128xf32> -> vector<128x128xf32>
    %58 = arith.addf %52, %57 : vector<128x128xf32>
    %c0_57 = arith.constant 0 : index
    %c1_58 = arith.constant 1 : index
    %c7_59 = arith.constant 7 : index
    %c0_60 = arith.constant 0 : index
    %59 = vector.load %arg14[%c0_57, %c1_58, %c7_59, %c0_60] : memref<8x10x24x128xf32, #tpu.memory_space<vmem>>, vector<2x8x8x128xf32>
    %60 = vector.shape_cast %59 : vector<2x8x8x128xf32> to vector<128x128xf32>
    %c3 = arith.constant 3 : index
    %c0_61 = arith.constant 0 : index
    %c0_62 = arith.constant 0 : index
    %61 = vector.load %arg4[%c3, %c0_61, %c0_62] : memref<9x128x128xf32, #tpu.memory_space<vmem>>, vector<1x128x128xf32>
    %62 = vector.shape_cast %61 : vector<1x128x128xf32> to vector<128x128xf32>
    %cst_63 = arith.constant dense<0.000000e+00> : vector<128x128xf32>
    %63 = tpu.matmul %60, %62, %cst_63 {dimension_numbers = #tpu.dot_dimension_numbers<[1], [0], [0], [1], [0, 0, 1, 1], [], []>} : vector<128x128xf32>, vector<128x128xf32>, vector<128x128xf32> -> vector<128x128xf32>
    %64 = arith.addf %58, %63 : vector<128x128xf32>
    %c0_64 = arith.constant 0 : index
    %c1_65 = arith.constant 1 : index
    %c8_66 = arith.constant 8 : index
    %c0_67 = arith.constant 0 : index
    %65 = vector.load %arg14[%c0_64, %c1_65, %c8_66, %c0_67] : memref<8x10x24x128xf32, #tpu.memory_space<vmem>>, vector<2x8x8x128xf32>
    %66 = vector.shape_cast %65 : vector<2x8x8x128xf32> to vector<128x128xf32>
    %c4 = arith.constant 4 : index
    %c0_68 = arith.constant 0 : index
    %c0_69 = arith.constant 0 : index
    %67 = vector.load %arg4[%c4, %c0_68, %c0_69] : memref<9x128x128xf32, #tpu.memory_space<vmem>>, vector<1x128x128xf32>
    %68 = vector.shape_cast %67 : vector<1x128x128xf32> to vector<128x128xf32>
    %cst_70 = arith.constant dense<0.000000e+00> : vector<128x128xf32>
    %69 = tpu.matmul %66, %68, %cst_70 {dimension_numbers = #tpu.dot_dimension_numbers<[1], [0], [0], [1], [0, 0, 1, 1], [], []>} : vector<128x128xf32>, vector<128x128xf32>, vector<128x128xf32> -> vector<128x128xf32>
    %70 = arith.addf %64, %69 : vector<128x128xf32>
    %c0_71 = arith.constant 0 : index
    %c1_72 = arith.constant 1 : index
    %c9_73 = arith.constant 9 : index
    %c0_74 = arith.constant 0 : index
    %71 = vector.load %arg14[%c0_71, %c1_72, %c9_73, %c0_74] : memref<8x10x24x128xf32, #tpu.memory_space<vmem>>, vector<2x8x8x128xf32>
    %72 = vector.shape_cast %71 : vector<2x8x8x128xf32> to vector<128x128xf32>
    %c5 = arith.constant 5 : index
    %c0_75 = arith.constant 0 : index
    %c0_76 = arith.constant 0 : index
    %73 = vector.load %arg4[%c5, %c0_75, %c0_76] : memref<9x128x128xf32, #tpu.memory_space<vmem>>, vector<1x128x128xf32>
    %74 = vector.shape_cast %73 : vector<1x128x128xf32> to vector<128x128xf32>
    %cst_77 = arith.constant dense<0.000000e+00> : vector<128x128xf32>
    %75 = tpu.matmul %72, %74, %cst_77 {dimension_numbers = #tpu.dot_dimension_numbers<[1], [0], [0], [1], [0, 0, 1, 1], [], []>} : vector<128x128xf32>, vector<128x128xf32>, vector<128x128xf32> -> vector<128x128xf32>
    %76 = arith.addf %70, %75 : vector<128x128xf32>
    %c0_78 = arith.constant 0 : index
    %c2_79 = arith.constant 2 : index
    %c7_80 = arith.constant 7 : index
    %c0_81 = arith.constant 0 : index
    %77 = vector.load %arg14[%c0_78, %c2_79, %c7_80, %c0_81] : memref<8x10x24x128xf32, #tpu.memory_space<vmem>>, vector<2x8x8x128xf32>
    %78 = vector.shape_cast %77 : vector<2x8x8x128xf32> to vector<128x128xf32>
    %c6 = arith.constant 6 : index
    %c0_82 = arith.constant 0 : index
    %c0_83 = arith.constant 0 : index
    %79 = vector.load %arg4[%c6, %c0_82, %c0_83] : memref<9x128x128xf32, #tpu.memory_space<vmem>>, vector<1x128x128xf32>
    %80 = vector.shape_cast %79 : vector<1x128x128xf32> to vector<128x128xf32>
    %cst_84 = arith.constant dense<0.000000e+00> : vector<128x128xf32>
    %81 = tpu.matmul %78, %80, %cst_84 {dimension_numbers = #tpu.dot_dimension_numbers<[1], [0], [0], [1], [0, 0, 1, 1], [], []>} : vector<128x128xf32>, vector<128x128xf32>, vector<128x128xf32> -> vector<128x128xf32>
    %82 = arith.addf %76, %81 : vector<128x128xf32>
    %c0_85 = arith.constant 0 : index
    %c2_86 = arith.constant 2 : index
    %c8_87 = arith.constant 8 : index
    %c0_88 = arith.constant 0 : index
    %83 = vector.load %arg14[%c0_85, %c2_86, %c8_87, %c0_88] : memref<8x10x24x128xf32, #tpu.memory_space<vmem>>, vector<2x8x8x128xf32>
    %84 = vector.shape_cast %83 : vector<2x8x8x128xf32> to vector<128x128xf32>
    %c7_89 = arith.constant 7 : index
    %c0_90 = arith.constant 0 : index
    %c0_91 = arith.constant 0 : index
    %85 = vector.load %arg4[%c7_89, %c0_90, %c0_91] : memref<9x128x128xf32, #tpu.memory_space<vmem>>, vector<1x128x128xf32>
    %86 = vector.shape_cast %85 : vector<1x128x128xf32> to vector<128x128xf32>
    %cst_92 = arith.constant dense<0.000000e+00> : vector<128x128xf32>
    %87 = tpu.matmul %84, %86, %cst_92 {dimension_numbers = #tpu.dot_dimension_numbers<[1], [0], [0], [1], [0, 0, 1, 1], [], []>} : vector<128x128xf32>, vector<128x128xf32>, vector<128x128xf32> -> vector<128x128xf32>
    %88 = arith.addf %82, %87 : vector<128x128xf32>
    %c0_93 = arith.constant 0 : index
    %c2_94 = arith.constant 2 : index
    %c9_95 = arith.constant 9 : index
    %c0_96 = arith.constant 0 : index
    %89 = vector.load %arg14[%c0_93, %c2_94, %c9_95, %c0_96] : memref<8x10x24x128xf32, #tpu.memory_space<vmem>>, vector<2x8x8x128xf32>
    %90 = vector.shape_cast %89 : vector<2x8x8x128xf32> to vector<128x128xf32>
    %c8_97 = arith.constant 8 : index
    %c0_98 = arith.constant 0 : index
    %c0_99 = arith.constant 0 : index
    %91 = vector.load %arg4[%c8_97, %c0_98, %c0_99] : memref<9x128x128xf32, #tpu.memory_space<vmem>>, vector<1x128x128xf32>
    %92 = vector.shape_cast %91 : vector<1x128x128xf32> to vector<128x128xf32>
    %cst_100 = arith.constant dense<0.000000e+00> : vector<128x128xf32>
    %93 = tpu.matmul %90, %92, %cst_100 {dimension_numbers = #tpu.dot_dimension_numbers<[1], [0], [0], [1], [0, 0, 1, 1], [], []>} : vector<128x128xf32>, vector<128x128xf32>, vector<128x128xf32> -> vector<128x128xf32>
    %94 = arith.addf %88, %93 : vector<128x128xf32>
    %cst_101 = arith.constant dense<0.000000e+00> : vector<128xf32>
    %95 = vector.multi_reduction <add>, %94, %cst_101 [0] : vector<128x128xf32> to vector<128xf32>
    %96 = vector.shape_cast %95 : vector<128xf32> to vector<1x128xf32>
    %97 = arith.mulf %94, %94 : vector<128x128xf32>
    %cst_102 = arith.constant dense<0.000000e+00> : vector<128xf32>
    %98 = vector.multi_reduction <add>, %97, %cst_102 [0] : vector<128x128xf32> to vector<128xf32>
    %99 = vector.shape_cast %98 : vector<128xf32> to vector<1x128xf32>
    %cst_103 = arith.constant 7.812500e-03 : f32
    %100 = vector.broadcast %cst_103 : f32 to vector<1x128xf32>
    %101 = arith.mulf %96, %100 : vector<1x128xf32>
    %cst_104 = arith.constant 7.812500e-03 : f32
    %102 = vector.broadcast %cst_104 : f32 to vector<1x128xf32>
    %103 = arith.mulf %99, %102 : vector<1x128xf32>
    %104 = arith.mulf %101, %101 : vector<1x128xf32>
    %105 = arith.subf %103, %104 : vector<1x128xf32>
    %cst_105 = arith.constant 0.000000e+00 : f32
    %106 = vector.broadcast %cst_105 : f32 to vector<1x128xf32>
    %107 = arith.maximumf %105, %106 : vector<1x128xf32>
    %c0_106 = arith.constant 0 : index
    %c0_107 = arith.constant 0 : index
    %108 = vector.load %arg5[%c0_106, %c0_107] : memref<1x128xf32, #tpu.memory_space<vmem>>, vector<1x128xf32>
    %cst_108 = arith.constant 9.99999974E-6 : f32
    %109 = vector.broadcast %cst_108 : f32 to vector<1x128xf32>
    %110 = arith.addf %107, %109 : vector<1x128xf32>
    %111 = math.rsqrt %110 : vector<1x128xf32>
    %112 = arith.mulf %108, %111 : vector<1x128xf32>
    %c0_109 = arith.constant 0 : index
    %c0_110 = arith.constant 0 : index
    %113 = vector.load %arg6[%c0_109, %c0_110] : memref<1x128xf32, #tpu.memory_space<vmem>>, vector<1x128xf32>
    %114 = arith.mulf %101, %112 : vector<1x128xf32>
    %115 = arith.subf %113, %114 : vector<1x128xf32>
    %116 = vector.broadcast %112 : vector<1x128xf32> to vector<128x128xf32>
    %117 = arith.mulf %94, %116 : vector<128x128xf32>
    %118 = vector.broadcast %115 : vector<1x128xf32> to vector<128x128xf32>
    %119 = arith.addf %117, %118 : vector<128x128xf32>
    %cst_111 = arith.constant 0.000000e+00 : f32
    %120 = vector.broadcast %cst_111 : f32 to vector<128x128xf32>
    %121 = arith.maximumf %119, %120 : vector<128x128xf32>
    %122 = vector.extract_strided_slice %0 {offsets = [0, 0], sizes = [128, 128], strides = [1, 1]} : vector<512x128xf32> to vector<128x128xf32>
    %c0_112 = arith.constant 0 : index
    %c0_113 = arith.constant 0 : index
    %123 = vector.load %arg10[%c0_112, %c0_113] : memref<128x128xf32, #tpu.memory_space<vmem>>, vector<128x128xf32>
    %cst_114 = arith.constant dense<0.000000e+00> : vector<128x128xf32>
    %124 = tpu.matmul %122, %123, %cst_114 {dimension_numbers = #tpu.dot_dimension_numbers<[1], [0], [0], [1], [0, 0, 1, 1], [], []>} : vector<128x128xf32>, vector<128x128xf32>, vector<128x128xf32> -> vector<128x128xf32>
    %cst_115 = arith.constant dense<0.000000e+00> : vector<128xf32>
    %125 = vector.multi_reduction <add>, %124, %cst_115 [0] : vector<128x128xf32> to vector<128xf32>
    %126 = vector.shape_cast %125 : vector<128xf32> to vector<1x128xf32>
    %127 = arith.mulf %124, %124 : vector<128x128xf32>
    %cst_116 = arith.constant dense<0.000000e+00> : vector<128xf32>
    %128 = vector.multi_reduction <add>, %127, %cst_116 [0] : vector<128x128xf32> to vector<128xf32>
    %129 = vector.shape_cast %128 : vector<128xf32> to vector<1x128xf32>
    %cst_117 = arith.constant 7.812500e-03 : f32
    %130 = vector.broadcast %cst_117 : f32 to vector<1x128xf32>
    %131 = arith.mulf %126, %130 : vector<1x128xf32>
    %cst_118 = arith.constant 7.812500e-03 : f32
    %132 = vector.broadcast %cst_118 : f32 to vector<1x128xf32>
    %133 = arith.mulf %129, %132 : vector<1x128xf32>
    %134 = arith.mulf %131, %131 : vector<1x128xf32>
    %135 = arith.subf %133, %134 : vector<1x128xf32>
    %cst_119 = arith.constant 0.000000e+00 : f32
    %136 = vector.broadcast %cst_119 : f32 to vector<1x128xf32>
    %137 = arith.maximumf %135, %136 : vector<1x128xf32>
    %c0_120 = arith.constant 0 : index
    %c0_121 = arith.constant 0 : index
    %138 = vector.load %arg11[%c0_120, %c0_121] : memref<1x128xf32, #tpu.memory_space<vmem>>, vector<1x128xf32>
    %cst_122 = arith.constant 9.99999974E-6 : f32
    %139 = vector.broadcast %cst_122 : f32 to vector<1x128xf32>
    %140 = arith.addf %137, %139 : vector<1x128xf32>
    %141 = math.rsqrt %140 : vector<1x128xf32>
    %142 = arith.mulf %138, %141 : vector<1x128xf32>
    %c0_123 = arith.constant 0 : index
    %c0_124 = arith.constant 0 : index
    %143 = vector.load %arg12[%c0_123, %c0_124] : memref<1x128xf32, #tpu.memory_space<vmem>>, vector<1x128xf32>
    %144 = arith.mulf %131, %142 : vector<1x128xf32>
    %145 = arith.subf %143, %144 : vector<1x128xf32>
    %146 = vector.broadcast %142 : vector<1x128xf32> to vector<128x128xf32>
    %147 = arith.mulf %124, %146 : vector<128x128xf32>
    %148 = vector.broadcast %145 : vector<1x128xf32> to vector<128x128xf32>
    %149 = arith.addf %147, %148 : vector<128x128xf32>
    %c0_125 = arith.constant 0 : index
    %c0_126 = arith.constant 0 : index
    %150 = vector.load %arg7[%c0_125, %c0_126] : memref<128x128xf32, #tpu.memory_space<vmem>>, vector<128x128xf32>
    %cst_127 = arith.constant dense<0.000000e+00> : vector<128x128xf32>
    %151 = tpu.matmul %121, %150, %cst_127 {dimension_numbers = #tpu.dot_dimension_numbers<[1], [0], [0], [1], [0, 0, 1, 1], [], []>} : vector<128x128xf32>, vector<128x128xf32>, vector<128x128xf32> -> vector<128x128xf32>
    %cst_128 = arith.constant dense<0.000000e+00> : vector<128xf32>
    %152 = vector.multi_reduction <add>, %151, %cst_128 [0] : vector<128x128xf32> to vector<128xf32>
    %153 = vector.shape_cast %152 : vector<128xf32> to vector<1x128xf32>
    %154 = arith.mulf %151, %151 : vector<128x128xf32>
    %cst_129 = arith.constant dense<0.000000e+00> : vector<128xf32>
    %155 = vector.multi_reduction <add>, %154, %cst_129 [0] : vector<128x128xf32> to vector<128xf32>
    %156 = vector.shape_cast %155 : vector<128xf32> to vector<1x128xf32>
    %cst_130 = arith.constant 7.812500e-03 : f32
    %157 = vector.broadcast %cst_130 : f32 to vector<1x128xf32>
    %158 = arith.mulf %153, %157 : vector<1x128xf32>
    %cst_131 = arith.constant 7.812500e-03 : f32
    %159 = vector.broadcast %cst_131 : f32 to vector<1x128xf32>
    %160 = arith.mulf %156, %159 : vector<1x128xf32>
    %161 = arith.mulf %158, %158 : vector<1x128xf32>
    %162 = arith.subf %160, %161 : vector<1x128xf32>
    %cst_132 = arith.constant 0.000000e+00 : f32
    %163 = vector.broadcast %cst_132 : f32 to vector<1x128xf32>
    %164 = arith.maximumf %162, %163 : vector<1x128xf32>
    %c0_133 = arith.constant 0 : index
    %c0_134 = arith.constant 0 : index
    %165 = vector.load %arg8[%c0_133, %c0_134] : memref<1x128xf32, #tpu.memory_space<vmem>>, vector<1x128xf32>
    %cst_135 = arith.constant 9.99999974E-6 : f32
    %166 = vector.broadcast %cst_135 : f32 to vector<1x128xf32>
    %167 = arith.addf %164, %166 : vector<1x128xf32>
    %168 = math.rsqrt %167 : vector<1x128xf32>
    %169 = arith.mulf %165, %168 : vector<1x128xf32>
    %c0_136 = arith.constant 0 : index
    %c0_137 = arith.constant 0 : index
    %170 = vector.load %arg9[%c0_136, %c0_137] : memref<1x128xf32, #tpu.memory_space<vmem>>, vector<1x128xf32>
    %171 = arith.mulf %158, %169 : vector<1x128xf32>
    %172 = arith.subf %170, %171 : vector<1x128xf32>
    %173 = vector.broadcast %169 : vector<1x128xf32> to vector<128x128xf32>
    %174 = arith.mulf %151, %173 : vector<128x128xf32>
    %175 = vector.broadcast %172 : vector<1x128xf32> to vector<128x128xf32>
    %176 = arith.addf %174, %175 : vector<128x128xf32>
    %177 = arith.addf %176, %149 : vector<128x128xf32>
    %cst_138 = arith.constant 0.000000e+00 : f32
    %178 = vector.broadcast %cst_138 : f32 to vector<128x128xf32>
    %179 = arith.maximumf %177, %178 : vector<128x128xf32>
    %c0_139 = arith.constant 0 : index
    %c0_140 = arith.constant 0 : index
    %180 = vector.load %arg13[%c0_139, %c0_140] : memref<128x128xf32, #tpu.memory_space<vmem>>, vector<128x128xf32>
    tpu.vector_store %arg13[%c0_139, %c0_140], %179 {strides = array<i32>} : memref<128x128xf32, #tpu.memory_space<vmem>>, vector<128x128xf32>,
    return
  }
}

</mosaic_0001>

<bundles_post_ra>
// kernel: tpu_custom_call.1
= control target key start
LH: loop header
LB: loop body
LE: loop exit
PB: predicated region body
PF: predicated region fallthrough
CT: control target
= control target key end

     0   :  { %18 = vsyncpa [#allocation4], 0  ;;  %s6625_s0 = inlined_call_operand.hbm [shape: f32[512,128], index: 0, kind: input, shape index: {}]   ;;  %s6626_s1 = inlined_call_operand.hbm [shape: f32[128,128], index: 1, kind: input, shape index: {}]   ;;  %s6627_s2 = inlined_call_operand.vmem [shape: f32[1,128], index: 2, kind: input, shape index: {}]   ;;  %s6628_s3 = inlined_call_operand.vmem [shape: f32[1,128], index: 3, kind: input, shape index: {}]   ;;  %s6629_s4 = inlined_call_operand.hbm [shape: f32[9,128,128], index: 4, kind: input, shape index: {}]   ;;  %s6630_s5 = inlined_call_operand.vmem [shape: f32[1,128], index: 5, kind: input, shape index: {}]   ;;  %s6631_s6 = inlined_call_operand.vmem [shape: f32[1,128], index: 6, kind: input, shape index: {}]   ;;  %s6632_s7 = inlined_call_operand.hbm [shape: f32[128,128], index: 7, kind: input, shape index: {}]   ;;  %s6633_s8 = inlined_call_operand.vmem [shape: f32[1,128], index: 8, kind: input, shape index: {}]   ;;  %s6634_s9 = inlined_call_operand.vmem [shape: f32[1,128], index: 9, kind: input, shape index: {}]   ;;  %s6635_s10 = inlined_call_operand.hbm [shape: f32[128,128], index: 10, kind: input, shape index: {}]   ;;  %s6636_s11 = inlined_call_operand.vmem [shape: f32[1,128], index: 11, kind: input, shape index: {}]   ;;  %s6637_s12 = inlined_call_operand.vmem [shape: f32[1,128], index: 12, kind: input, shape index: {}]   ;;  %s6638_s13 = inlined_call_operand.hbm [shape: f32[128,128], index: 13, kind: output, shape index: {}]  }
   0x1   :  { %19 = vsyncpa [#allocation7], 0 }
   0x2   :  { %20 = vsyncpa [#allocation10], 0 }
   0x3   :  { %21 = vsyncpa [#allocation5], 0  ;;  %s5593_s25 = smov [#allocation6]   ;;  %s5594_s27 = smov [#allocation9]  }
   0x4   :  { %s39_s26 = sshll.u32 %s5593_s25, 4  ;;  %s71_s28 = sshll.u32 %s5594_s27, 4  ;;  %s40_s26 = int_to_ptr.vmem [resolvable:$true] %s39_s26  ;;  %s5672_s28 = int_to_ptr.vmem [resolvable:$true] %s71_s28 }
   0x5   :  { %s5453_s14 = scalar_lea.hbm %s6626_s1, 2048 }
   0x6   :  { %p5454_p0 = scmp.ne.s32.totalorder %s6626_s1, %s5453_s14  ;;  %p5457_p1 = scmp.lt.u32.totalorder %s5453_s14, %s6626_s1 }
   0x8   :  { %p5459_p2 = pnand %p5457_p1, %p5454_p0 }
   0xa   :  { %5462 = shalt.err (!%p5459_p2)
}
   0xb   :  { %s5463_s19 = scalar_lea.vmem %s40_s26, 2048  ;;  %p5468_p4 = scmp.lt.s32.totalorder %s40_s26, %s40_s26 }
   0xc   :  { %p5464_p3 = scmp.ne.s32.totalorder %s40_s26, %s5463_s19  ;;  %p5469_p5 = scmp.lt.s32.totalorder %s5463_s19, %s5463_s19 }
   0xe   :  { %p5470_p6 = por %p5469_p5, %p5468_p4 }
  0x10   :  { %p5471_p7 = pnand %p5470_p6, %p5464_p3 }
  0x12   :  { %5474 = shalt.err (!%p5471_p7)
}
  0x13   :  { %s5595_s20 = smov 128   ;;  %s5596_s21 = smov 8  }
  0x14   :  { %45 = dma.hbm_to_vmem [thread:$0]  %s6626_s1, 2048, %s40_s26, [#allocation7], %s5595_s20, %s5595_s20, %s5596_s21  }
  0x15   :  { %s5475_s27 = scalar_lea.hbm %s6632_s7, 2048 }
  0x16   :  { %p5476_p8 = scmp.ne.s32.totalorder %s6632_s7, %s5475_s27  ;;  %p5479_p9 = scmp.lt.u32.totalorder %s5475_s27, %s6632_s7 }
  0x18   :  { %p5481_p10 = pnand %p5479_p9, %p5476_p8 }
  0x1a   :  { %5484 = shalt.err (!%p5481_p10)
}
  0x1b   :  { %s5485_s16 = scalar_lea.vmem %s5672_s28, 2048  ;;  %p5490_p12 = scmp.lt.s32.totalorder %s5672_s28, %s5672_s28 }
  0x1c   :  { %p5486_p11 = scmp.ne.s32.totalorder %s5672_s28, %s5485_s16  ;;  %p5491_p13 = scmp.lt.s32.totalorder %s5485_s16, %s5485_s16 }
  0x1e   :  { %p5492_p0 = por %p5491_p13, %p5490_p12 }
  0x20   :  { %p5493_p1 = pnand %p5492_p0, %p5486_p11 }
  0x22   :  { %5496 = shalt.err (!%p5493_p1)
}
  0x23   :  { %77 = dma.hbm_to_vmem [thread:$0]  %s6632_s7, 2048, %s5672_s28, [#allocation10], %s5595_s20, %s5595_s20, %s5596_s21  }
  0x24   :  { %s5597_s17 = smov [#allocation3]   ;;  %s5598_s19 = smov [#allocation8]  }
  0x25   :  { %s27_s18 = sshll.u32 %s5597_s17, 4  ;;  %s55_s22 = sshll.u32 %s5598_s19, 4  ;;  %s28_s18 = int_to_ptr.vmem [resolvable:$true] %s27_s18  ;;  %s5709_s22 = int_to_ptr.vmem [resolvable:$true] %s55_s22 }
  0x26   :  { %s5497_s25 = scalar_lea.hbm %s6625_s0, 8192 }
  0x27   :  { %p5498_p2 = scmp.ne.s32.totalorder %s6625_s0, %s5497_s25  ;;  %p5501_p3 = scmp.lt.u32.totalorder %s5497_s25, %s6625_s0 }
  0x29   :  { %p5503_p4 = pnand %p5501_p3, %p5498_p2 }
  0x2b   :  { %5506 = shalt.err (!%p5503_p4)
}
  0x2c   :  { %s5507_s7 = scalar_lea.vmem %s28_s18, 8192  ;;  %p5512_p6 = scmp.lt.s32.totalorder %s28_s18, %s28_s18 }
  0x2d   :  { %p5508_p5 = scmp.ne.s32.totalorder %s28_s18, %s5507_s7  ;;  %p5513_p7 = scmp.lt.s32.totalorder %s5507_s7, %s5507_s7 }
  0x2f   :  { %p5514_p8 = por %p5513_p7, %p5512_p6 }
  0x31   :  { %p5515_p9 = pnand %p5514_p8, %p5508_p5 }
  0x33   :  { %5518 = shalt.err (!%p5515_p9)
}
  0x34   :  { %33 = dma.hbm_to_vmem [thread:$0]  %s6625_s0, 8192, %s28_s18, [#allocation4], %s5595_s20, %s5595_s20, %s5596_s21  }
  0x35   :  { %s5519_s26 = scalar_lea.hbm %s6629_s4, 18432 }
  0x36   :  { %p5520_p10 = scmp.ne.s32.totalorder %s6629_s4, %s5519_s26  ;;  %p5523_p11 = scmp.lt.u32.totalorder %s5519_s26, %s6629_s4 }
  0x38   :  { %p5525_p12 = pnand %p5523_p11, %p5520_p10 }
  0x3a   :  { %5528 = shalt.err (!%p5525_p12)
}
  0x3b   :  { %s5529_s25 = scalar_lea.vmem %s5709_s22, 18432  ;;  %p5534_p0 = scmp.lt.s32.totalorder %s5709_s22, %s5709_s22 }
  0x3c   :  { %p5530_p13 = scmp.ne.s32.totalorder %s5709_s22, %s5529_s25  ;;  %p5535_p1 = scmp.lt.s32.totalorder %s5529_s25, %s5529_s25 }
  0x3e   :  { %p5536_p2 = por %p5535_p1, %p5534_p0 }
  0x40   :  { %p5537_p3 = pnand %p5536_p2, %p5530_p13 }
  0x42   :  { %5540 = shalt.err (!%p5537_p3)
}
  0x43   :  { %61 = dma.hbm_to_vmem [thread:$0]  %s6629_s4, 18432, %s5709_s22, [#allocation7], %s5595_s20, %s5595_s20, %s5596_s21  }
  0x44   :  { %s5599_s27 = smov [#allocation11]   ;;  %s5541_s7 = scalar_lea.hbm %s6635_s10, 2048 }
  0x45   :  { %s87_s29 = sshll.u32 %s5599_s27, 4  ;;  %p5542_p4 = scmp.ne.s32.totalorder %s6635_s10, %s5541_s7  ;;  %s88_s29 = int_to_ptr.vmem [resolvable:$true] %s87_s29 }
  0x46   :  { %p5545_p5 = scmp.lt.u32.totalorder %s5541_s7, %s6635_s10 }
  0x48   :  { %p5547_p6 = pnand %p5545_p5, %p5542_p4 }
  0x4a   :  { %5550 = shalt.err (!%p5547_p6)
}
  0x4b   :  { %s5551_s26 = scalar_lea.vmem %s88_s29, 2048  ;;  %p5556_p8 = scmp.lt.s32.totalorder %s88_s29, %s88_s29 }
  0x4c   :  { %p5552_p7 = scmp.ne.s32.totalorder %s88_s29, %s5551_s26  ;;  %p5557_p9 = scmp.lt.s32.totalorder %s5551_s26, %s5551_s26 }
  0x4e   :  { %p5558_p10 = por %p5557_p9, %p5556_p8 }
  0x50   :  { %p5559_p11 = pnand %p5558_p10, %p5552_p7 }
  0x52   :  { %5562 = shalt.err (!%p5559_p11)
}
  0x53   :  { %93 = dma.hbm_to_vmem [thread:$0]  %s6635_s10, 2048, %s88_s29, [#allocation10], %s5595_s20, %s5595_s20, %s5596_s21  }
  0x54   :  { %5585 = dma.done.wait [#allocation4], 8192  }
  0x55   :  { %5586 = vsyncadd [#allocation4], 4294959104 }
  0x56   :  { %5587 = dma.done.wait [#allocation7], 20480  }
  0x57   :  { %5588 = vsyncadd [#allocation7], 4294946816 }
  0x58   :  { %5589 = dma.done.wait [#allocation10], 4096  }
  0x59   :  { %5590 = vsyncadd [#allocation10], 4294963200  ;;  %v5600_v0 = vmov 0.0   ;;  %v177_v1 = vld [vmem:[#allocation6] sm:$0xff]  ;;  %v178_v2 = vld [vmem:[#allocation6 + $0x8] sm:$0xff] }
  0x5a   :  { %1003 = vst [vmem:[#allocation2 + $0x1e8] sm:$0xff] %v5600_v0  ;;  %997 = vst [vmem:[#allocation2 + $0x8] sm:$0xff] %v5600_v0  ;;  %v179_v3 = vld [vmem:[#allocation6 + $0x10] sm:$0xff]  ;;  %v4907_v4 = vpack.c.bf16 %v178_v2, %v177_v1  ;;  %v180_v5 = vld [vmem:[#allocation6 + $0x18] sm:$0xff] }
  0x5b   :  { %1000 = vst [vmem:[#allocation2 + $0xf8] sm:$0xff] %v5600_v0  ;;  %1022 = vst [vmem:[#allocation2 + $0xe0] sm:$0xff] %v5600_v0  ;;  %v4911_v6 = vpack.c.bf16 %v180_v5, %v179_v3  ;;  %v181_v7 = vld [vmem:[#allocation6 + $0x20] sm:$0xff]  ;;  %v182_v8 = vld [vmem:[#allocation6 + $0x28] sm:$0xff] }
  0x5c   :  { %1025 = vst [vmem:[#allocation2 + $0x1d0] sm:$0xff] %v5600_v0  ;;  %1046 = vst [vmem:[#allocation2 + $0x18] sm:$0xff] %v5600_v0  ;;  %4908 = vmatprep.subr.bf16.mxu0 %v4907_v4  ;;  %v4915_v9 = vpack.c.bf16 %v182_v8, %v181_v7  ;;  %v113_v10 = vld [vmem:[#allocation3] sm:$0xff]  ;;  %v183_v11 = vld [vmem:[#allocation6 + $0x30] sm:$0xff] }
  0x5d   :  { %1047 = vst [vmem:[#allocation2 + $0x30] sm:$0xff] %v5600_v0  ;;  %1048 = vst [vmem:[#allocation2 + $0x48] sm:$0xff] %v5600_v0  ;;  %4910 = vmatpush3.bf16.msra.mxu0 %v4907_v4  ;;  %v184_v12 = vld [vmem:[#allocation6 + $0x38] sm:$0xff]  ;;  %4195 = vmatprep.mubr.f32.mxu0 %v113_v10  ;;  %v185_v14 = vld [vmem:[#allocation6 + $0x40] sm:$0xff] }
  0x5e   :  { %1049 = vst [vmem:[#allocation2 + $0x60] sm:$0xff] %v5600_v0  ;;  %1050 = vst [vmem:[#allocation2 + $0x78] sm:$0xff] %v5600_v0  ;;  %4912 = vmatprep.subr.bf16.mxu0 %v4911_v6  ;;  %v4919_v13 = vpack.c.bf16 %v184_v12, %v183_v11  ;;  %v186_v15 = vld [vmem:[#allocation6 + $0x48] sm:$0xff]  ;;  %v187_v17 = vld [vmem:[#allocation6 + $0x50] sm:$0xff] }
  0x5f   :  { %1051 = vst [vmem:[#allocation2 + $0x90] sm:$0xff] %v5600_v0  ;;  %1052 = vst [vmem:[#allocation2 + $0xa8] sm:$0xff] %v5600_v0  ;;  %v4923_v16 = vpack.c.bf16 %v186_v15, %v185_v14  ;;  %v188_v18 = vld [vmem:[#allocation6 + $0x58] sm:$0xff]  ;;  %v189_v20 = vld [vmem:[#allocation6 + $0x60] sm:$0xff] }
  0x60   :  { %1053 = vst [vmem:[#allocation2 + $0xc0] sm:$0xff] %v5600_v0  ;;  %1056 = vst [vmem:[#allocation2 + $0x108] sm:$0xff] %v5600_v0  ;;  %v4927_v19 = vpack.c.bf16 %v188_v18, %v187_v17  ;;  %v190_v21 = vld [vmem:[#allocation6 + $0x68] sm:$0xff]  ;;  %v191_v23 = vld [vmem:[#allocation6 + $0x70] sm:$0xff] }
  0x61   :  { %1057 = vst [vmem:[#allocation2 + $0x120] sm:$0xff] %v5600_v0  ;;  %1058 = vst [vmem:[#allocation2 + $0x138] sm:$0xff] %v5600_v0  ;;  %4914 = vmatpush3.bf16.msra.mxu0 %v4911_v6  ;;  %v4931_v22 = vpack.c.bf16 %v190_v21, %v189_v20  ;;  %v192_v24 = vld [vmem:[#allocation6 + $0x78] sm:$0xff]  ;;  %v114_v26 = vld [vmem:[#allocation3 + $0x8] sm:$0xff] }
  0x62   :  { %1059 = vst [vmem:[#allocation2 + $0x150] sm:$0xff] %v5600_v0  ;;  %1060 = vst [vmem:[#allocation2 + $0x168] sm:$0xff] %v5600_v0  ;;  %4916 = vmatprep.subr.bf16.mxu0 %v4915_v9  ;;  %v4935_v25 = vpack.c.bf16 %v192_v24, %v191_v23  ;;  %v115_v27 = vld [vmem:[#allocation3 + $0x10] sm:$0xff]  ;;  %v116_v28 = vld [vmem:[#allocation3 + $0x18] sm:$0xff] }
  0x63   :  { %1061 = vst [vmem:[#allocation2 + $0x180] sm:$0xff] %v5600_v0  ;;  %1062 = vst [vmem:[#allocation2 + $0x198] sm:$0xff] %v5600_v0  ;;  %v117_v29 = vld [vmem:[#allocation3 + $0x20] sm:$0xff]  ;;  %v118_v30 = vld [vmem:[#allocation3 + $0x28] sm:$0xff] }
  0x64   :  { %1063 = vst [vmem:[#allocation2 + $0x1b0] sm:$0xff] %v5600_v0  ;;  %1126 = vst [vmem:[#allocation2 + $0x28] sm:$0xff] %v5600_v0  ;;  %v119_v31 = vld [vmem:[#allocation3 + $0x30] sm:$0xff]  ;;  %v120_v32 = vld [vmem:[#allocation3 + $0x38] sm:$0xff] }
  0x65   :  { %1127 = vst [vmem:[#allocation2 + $0x40] sm:$0xff] %v5600_v0  ;;  %1128 = vst [vmem:[#allocation2 + $0x58] sm:$0xff] %v5600_v0  ;;  %4918 = vmatpush3.bf16.msra.mxu0 %v4915_v9  ;;  %v121_v33 = vld [vmem:[#allocation3 + $0x40] sm:$0xff]  ;;  %v122_v34 = vld [vmem:[#allocation3 + $0x48] sm:$0xff] }
  0x66   :  { %1129 = vst [vmem:[#allocation2 + $0x70] sm:$0xff] %v5600_v0  ;;  %1130 = vst [vmem:[#allocation2 + $0x88] sm:$0xff] %v5600_v0  ;;  %4920 = vmatprep.subr.bf16.mxu0 %v4919_v13  ;;  %v123_v35 = vld [vmem:[#allocation3 + $0x50] sm:$0xff]  ;;  %v124_v36 = vld [vmem:[#allocation3 + $0x58] sm:$0xff] }
  0x67   :  { %1131 = vst [vmem:[#allocation2 + $0xa0] sm:$0xff] %v5600_v0  ;;  %1132 = vst [vmem:[#allocation2 + $0xb8] sm:$0xff] %v5600_v0  ;;  %v125_v37 = vld [vmem:[#allocation3 + $0x60] sm:$0xff]  ;;  %v126_v38 = vld [vmem:[#allocation3 + $0x68] sm:$0xff] }
  0x68   :  { %1133 = vst [vmem:[#allocation2 + $0xd0] sm:$0xff] %v5600_v0  ;;  %1136 = vst [vmem:[#allocation2 + $0x118] sm:$0xff] %v5600_v0  ;;  %v127_v39 = vld [vmem:[#allocation3 + $0x70] sm:$0xff]  ;;  %v128_v40 = vld [vmem:[#allocation3 + $0x78] sm:$0xff] }
  0x69   :  { %1137 = vst [vmem:[#allocation2 + $0x130] sm:$0xff] %v5600_v0  ;;  %1138 = vst [vmem:[#allocation2 + $0x148] sm:$0xff] %v5600_v0  ;;  %4922 = vmatpush3.bf16.msra.mxu0 %v4919_v13  ;;  %v129_v41 = vld [vmem:[#allocation3 + $0x80] sm:$0xff]  ;;  %v130_v42 = vld [vmem:[#allocation3 + $0x88] sm:$0xff] }
  0x6a   :  { %1139 = vst [vmem:[#allocation2 + $0x160] sm:$0xff] %v5600_v0  ;;  %1140 = vst [vmem:[#allocation2 + $0x178] sm:$0xff] %v5600_v0  ;;  %4924 = vmatprep.subr.bf16.mxu0 %v4923_v16  ;;  %v131_v43 = vld [vmem:[#allocation3 + $0x90] sm:$0xff]  ;;  %v132_v44 = vld [vmem:[#allocation3 + $0x98] sm:$0xff] }
  0x6b   :  { %1141 = vst [vmem:[#allocation2 + $0x190] sm:$0xff] %v5600_v0  ;;  %1142 = vst [vmem:[#allocation2 + $0x1a8] sm:$0xff] %v5600_v0  ;;  %v133_v45 = vld [vmem:[#allocation3 + $0xa0] sm:$0xff]  ;;  %v134_v46 = vld [vmem:[#allocation3 + $0xa8] sm:$0xff] }
  0x6c   :  { %1143 = vst [vmem:[#allocation2 + $0x1c0] sm:$0xff] %v5600_v0  ;;  %1045 = vst [vmem:[#allocation2] sm:$0xff] %v5600_v0  ;;  %v135_v47 = vld [vmem:[#allocation3 + $0xb0] sm:$0xff]  ;;  %v136_v48 = vld [vmem:[#allocation3 + $0xb8] sm:$0xff] }
  0x6d   :  { %1054 = vst [vmem:[#allocation2 + $0xd8] sm:$0xff] %v5600_v0  ;;  %1055 = vst [vmem:[#allocation2 + $0xf0] sm:$0xff] %v5600_v0  ;;  %4926 = vmatpush3.bf16.msra.mxu0 %v4923_v16  ;;  %v137_v49 = vld [vmem:[#allocation3 + $0xc0] sm:$0xff]  ;;  %v138_v50 = vld [vmem:[#allocation3 + $0xc8] sm:$0xff] }
  0x6e   :  { %1064 = vst [vmem:[#allocation2 + $0x1c8] sm:$0xff] %v5600_v0  ;;  %1125 = vst [vmem:[#allocation2 + $0x10] sm:$0xff] %v5600_v0  ;;  %4928 = vmatprep.subr.bf16.mxu0 %v4927_v19  ;;  %v139_v51 = vld [vmem:[#allocation3 + $0xd0] sm:$0xff]  ;;  %v140_v52 = vld [vmem:[#allocation3 + $0xd8] sm:$0xff] }
  0x6f   :  { %1134 = vst [vmem:[#allocation2 + $0xe8] sm:$0xff] %v5600_v0  ;;  %1135 = vst [vmem:[#allocation2 + $0x100] sm:$0xff] %v5600_v0  ;;  %v141_v53 = vld [vmem:[#allocation3 + $0xe0] sm:$0xff]  ;;  %v142_v54 = vld [vmem:[#allocation3 + $0xe8] sm:$0xff] }
  0x70   :  { %1144 = vst [vmem:[#allocation2 + $0x1d8] sm:$0xff] %v5600_v0  ;;  %v143_v55 = vld [vmem:[#allocation3 + $0xf0] sm:$0xff]  ;;  %v144_v56 = vld [vmem:[#allocation3 + $0xf8] sm:$0xff]  ;;  %v145_v57 = vld [vmem:[#allocation3 + $0x100] sm:$0xff] }
  0x71   :  { %4930 = vmatpush3.bf16.msra.mxu0 %v4927_v19  ;;  %v146_v58 = vld [vmem:[#allocation3 + $0x108] sm:$0xff]  ;;  %v147_v59 = vld [vmem:[#allocation3 + $0x110] sm:$0xff]  ;;  %v148_v60 = vld [vmem:[#allocation3 + $0x118] sm:$0xff] }
  0x72   :  { %4932 = vmatprep.subr.bf16.mxu0 %v4931_v22  ;;  %v149_v61 = vld [vmem:[#allocation3 + $0x120] sm:$0xff]  ;;  %v150_v62 = vld [vmem:[#allocation3 + $0x128] sm:$0xff]  ;;  %v151_v63 = vld [vmem:[#allocation3 + $0x130] sm:$0xff] }
  0x73   :  { %v152_v1 = vld [vmem:[#allocation3 + $0x138] sm:$0xff]  ;;  %v153_v2 = vld [vmem:[#allocation3 + $0x140] sm:$0xff]  ;;  %v154_v3 = vld [vmem:[#allocation3 + $0x148] sm:$0xff] }
  0x74   :  { %v155_v4 = vld [vmem:[#allocation3 + $0x150] sm:$0xff]  ;;  %v156_v5 = vld [vmem:[#allocation3 + $0x158] sm:$0xff]  ;;  %v157_v6 = vld [vmem:[#allocation3 + $0x160] sm:$0xff] }
  0x75   :  { %4934 = vmatpush3.bf16.msra.mxu0 %v4931_v22  ;;  %v158_v7 = vld [vmem:[#allocation3 + $0x168] sm:$0xff]  ;;  %v159_v8 = vld [vmem:[#allocation3 + $0x170] sm:$0xff]  ;;  %v160_v9 = vld [vmem:[#allocation3 + $0x178] sm:$0xff] }
  0x76   :  { %4936 = vmatprep.subr.bf16.mxu0 %v4935_v25  ;;  %v161_v10 = vld [vmem:[#allocation3 + $0x180] sm:$0xff]  ;;  %v162_v11 = vld [vmem:[#allocation3 + $0x188] sm:$0xff]  ;;  %v163_v12 = vld [vmem:[#allocation3 + $0x190] sm:$0xff] }
  0x77   :  { %v164_v13 = vld [vmem:[#allocation3 + $0x198] sm:$0xff]  ;;  %v165_v14 = vld [vmem:[#allocation3 + $0x1a0] sm:$0xff]  ;;  %v166_v15 = vld [vmem:[#allocation3 + $0x1a8] sm:$0xff] }
  0x78   :  { %v167_v16 = vld [vmem:[#allocation3 + $0x1b0] sm:$0xff]  ;;  %v168_v17 = vld [vmem:[#allocation3 + $0x1b8] sm:$0xff]  ;;  %v169_v18 = vld [vmem:[#allocation3 + $0x1c0] sm:$0xff] }
  0x79   :  { %4938 = vmatpush3.bf16.msra.mxu0 %v4935_v25  ;;  %v170_v19 = vld [vmem:[#allocation3 + $0x1c8] sm:$0xff]  ;;  %v171_v20 = vld [vmem:[#allocation3 + $0x1d0] sm:$0xff]  ;;  %v172_v21 = vld [vmem:[#allocation3 + $0x1d8] sm:$0xff] }
  0x7a   :  { %v173_v22 = vld [vmem:[#allocation3 + $0x1e0] sm:$0xff]  ;;  %v174_v23 = vld [vmem:[#allocation3 + $0x1e8] sm:$0xff]  ;;  %v175_v24 = vld [vmem:[#allocation3 + $0x1f0] sm:$0xff] }
  0x7b   :  { %v176_v25 = vld [vmem:[#allocation3 + $0x1f8] sm:$0xff] }
  0x7c   :  { %4196 = vmatmul.mubr.f32.vlgmr.msra.gmra.mrb[0].mxu0 %v114_v26 }
  0x7d   :  { %4198 = vmatprep.mubr.f32.mxu0 %v115_v27 }
  0x80   :  { %4199 = vmatmul.mubr.f32.gmra.mrb[2].mxu0 %v116_v28 }
  0x81   :  { %4201 = vmatprep.mubr.f32.mxu0 %v117_v29 }
  0x84   :  { %4202 = vmatmul.mubr.f32.gmra.mrb[4].mxu0 %v118_v30 }
  0x85   :  { %4204 = vmatprep.mubr.f32.mxu0 %v119_v31 }
  0x88   :  { %4205 = vmatmul.mubr.f32.gmra.mrb[6].mxu0 %v120_v32 }
  0x89   :  { %4207 = vmatprep.mubr.f32.mxu0 %v121_v33 }
  0x8c   :  { %4208 = vmatmul.mubr.f32.gmra.mrb[8].mxu0 %v122_v34 }
  0x8d   :  { %4210 = vmatprep.mubr.f32.mxu0 %v123_v35 }
  0x90   :  { %4211 = vmatmul.mubr.f32.gmra.mrb[10].mxu0 %v124_v36 }
  0x91   :  { %4213 = vmatprep.mubr.f32.mxu0 %v125_v37 }
  0x94   :  { %4214 = vmatmul.mubr.f32.gmra.mrb[12].mxu0 %v126_v38 }
  0x95   :  { %4216 = vmatprep.mubr.f32.mxu0 %v127_v39 }
  0x98   :  { %4217 = vmatmul.mubr.f32.gmra.mrb[14].mxu0 %v128_v40 }
  0x99   :  { %4219 = vmatprep.mubr.f32.mxu0 %v129_v41 }
  0x9c   :  { %4220 = vmatmul.mubr.f32.gmra.mrb[16].mxu0 %v130_v42 }
  0x9d   :  { %4222 = vmatprep.mubr.f32.mxu0 %v131_v43 }
  0xa0   :  { %4223 = vmatmul.mubr.f32.gmra.mrb[18].mxu0 %v132_v44 }
  0xa1   :  { %4225 = vmatprep.mubr.f32.mxu0 %v133_v45 }
  0xa4   :  { %4226 = vmatmul.mubr.f32.gmra.mrb[20].mxu0 %v134_v46 }
  0xa5   :  { %4228 = vmatprep.mubr.f32.mxu0 %v135_v47 }
  0xa8   :  { %4229 = vmatmul.mubr.f32.gmra.mrb[22].mxu0 %v136_v48 }
  0xa9   :  { %4231 = vmatprep.mubr.f32.mxu0 %v137_v49 }
  0xac   :  { %4232 = vmatmul.mubr.f32.gmra.mrb[24].mxu0 %v138_v50 }
  0xad   :  { %4234 = vmatprep.mubr.f32.mxu0 %v139_v51 }
  0xb0   :  { %4235 = vmatmul.mubr.f32.gmra.mrb[26].mxu0 %v140_v52 }
  0xb1   :  { %4237 = vmatprep.mubr.f32.mxu0 %v141_v53 }
  0xb4   :  { %4238 = vmatmul.mubr.f32.gmra.mrb[28].mxu0 %v142_v54 }
  0xb5   :  { %4240 = vmatprep.mubr.f32.mxu0 %v143_v55 }
  0xb8   :  { %4241 = vmatmul.mubr.f32.gmra.mrb[30].mxu0 %v144_v56 }
  0xb9   :  { %4243 = vmatprep.mubr.f32.mxu0 %v145_v57 }
  0xbc   :  { %4244 = vmatmul.mubr.f32.gmra.mrb[32].mxu0 %v146_v58 }
  0xbd   :  { %4246 = vmatprep.mubr.f32.mxu0 %v147_v59 }
  0xc0   :  { %4247 = vmatmul.mubr.f32.gmra.mrb[34].mxu0 %v148_v60 }
  0xc1   :  { %4249 = vmatprep.mubr.f32.mxu0 %v149_v61 }
  0xc4   :  { %4250 = vmatmul.mubr.f32.gmra.mrb[36].mxu0 %v150_v62 }
  0xc5   :  { %4252 = vmatprep.mubr.f32.mxu0 %v151_v63 }
  0xc8   :  { %4253 = vmatmul.mubr.f32.gmra.mrb[38].mxu0 %v152_v1 }
  0xc9   :  { %4255 = vmatprep.mubr.f32.mxu0 %v153_v2 }
  0xcc   :  { %4256 = vmatmul.mubr.f32.gmra.mrb[40].mxu0 %v154_v3 }
  0xcd   :  { %4258 = vmatprep.mubr.f32.mxu0 %v155_v4 }
  0xd0   :  { %4259 = vmatmul.mubr.f32.gmra.mrb[42].mxu0 %v156_v5 }
  0xd1   :  { %4261 = vmatprep.mubr.f32.mxu0 %v157_v6 }
  0xd4   :  { %4262 = vmatmul.mubr.f32.gmra.mrb[44].mxu0 %v158_v7 }
  0xd5   :  { %4264 = vmatprep.mubr.f32.mxu0 %v159_v8 }
  0xd8   :  { %4265 = vmatmul.mubr.f32.gmra.mrb[46].mxu0 %v160_v9 }
  0xd9   :  { %4267 = vmatprep.mubr.f32.mxu0 %v161_v10 }
  0xdc   :  { %4268 = vmatmul.mubr.f32.gmra.mrb[48].mxu0 %v162_v11 }
  0xdd   :  { %4270 = vmatprep.mubr.f32.mxu0 %v163_v12 }
  0xe0   :  { %4271 = vmatmul.mubr.f32.gmra.mrb[50].mxu0 %v164_v13 }
  0xe1   :  { %4273 = vmatprep.mubr.f32.mxu0 %v165_v14 }
  0xe4   :  { %4274 = vmatmul.mubr.f32.gmra.mrb[52].mxu0 %v166_v15 }
  0xe5   :  { %4276 = vmatprep.mubr.f32.mxu0 %v167_v16 }
  0xe8   :  { %4277 = vmatmul.mubr.f32.gmra.mrb[54].mxu0 %v168_v17 }
  0xe9   :  { %4279 = vmatprep.mubr.f32.mxu0 %v169_v18 }
  0xec   :  { %4280 = vmatmul.mubr.f32.gmra.mrb[56].mxu0 %v170_v19 }
  0xed   :  { %4282 = vmatprep.mubr.f32.mxu0 %v171_v20 }
  0xf0   :  { %4283 = vmatmul.mubr.f32.gmra.mrb[58].mxu0 %v172_v21 }
  0xf1   :  { %4285 = vmatprep.mubr.f32.mxu0 %v173_v22 }
  0xf4   :  { %4286 = vmatmul.mubr.f32.gmra.mrb[60].mxu0 %v174_v23 }
  0xf5   :  { %4288 = vmatprep.mubr.f32.mxu0 %v175_v24 }
  0xf8   :  { %4289 = vmatmul.mubr.f32.gmra.mrb[62].mxu0 %v176_v25 }
  0xf9   :  { %4323 = vmatprep.mubr.f32.mxu0 %v5600_v0 }
 0x14f   :  { %v5807_v26 = vpop.f32.mrb[0].mxu0 }
 0x150   :  { %v648_v27 = vmul.f32 %v5807_v26, %v5807_v26  ;;  %v5811_v28 = vpop.f32.mrb[1].mxu0 }
 0x151   :  { %v578_v29 = vadd.f32 %v5807_v26, %v5811_v28  ;;  %v647_v30 = vmul.f32 %v5811_v28, %v5811_v28 }
 0x153   :  { %v711_v31 = vadd.f32 %v648_v27, %v647_v30  ;;  %v5817_v32 = vpop.f32.mrb[2].mxu0 }
 0x154   :  { %v5819_v33 = vpop.f32.mrb[3].mxu0  ;;  %v650_v35 = vmul.f32 %v5817_v32, %v5817_v32 }
 0x155   :  { %v579_v0 = vadd.f32 %v578_v29, %v5819_v33  ;;  %v649_v34 = vmul.f32 %v5819_v33, %v5819_v33 }
 0x157   :  { %v580_v36 = vadd.f32 %v5817_v32, %v579_v0  ;;  %v712_v37 = vadd.f32 %v711_v31, %v649_v34  ;;  %v5827_v38 = vpop.f32.mrb[4].mxu0 }
 0x158   :  { %v5829_v39 = vpop.f32.mrb[5].mxu0  ;;  %v652_v43 = vmul.f32 %v5827_v38, %v5827_v38 }
 0x159   :  { %v713_v40 = vadd.f32 %v712_v37, %v650_v35  ;;  %v581_v41 = vadd.f32 %v580_v36, %v5829_v39  ;;  %v651_v42 = vmul.f32 %v5829_v39, %v5829_v39 }
 0x15b   :  { %v582_v44 = vadd.f32 %v5827_v38, %v581_v41  ;;  %v714_v45 = vadd.f32 %v713_v40, %v651_v42  ;;  %v5837_v46 = vpop.f32.mrb[6].mxu0 }
 0x15c   :  { %v5839_v47 = vpop.f32.mrb[7].mxu0  ;;  %v654_v51 = vmul.f32 %v5837_v46, %v5837_v46 }
 0x15d   :  { %v715_v48 = vadd.f32 %v714_v45, %v652_v43  ;;  %v583_v49 = vadd.f32 %v582_v44, %v5839_v47  ;;  %v653_v50 = vmul.f32 %v5839_v47, %v5839_v47 }
 0x15f   :  { %v716_v52 = vadd.f32 %v715_v48, %v653_v50  ;;  %v5846_v53 = vpop.f32.mrb[8].mxu0  ;;  %v584_v54 = vadd.f32 %v5837_v46, %v583_v49 }
 0x160   :  { %v5849_v55 = vpop.f32.mrb[9].mxu0  ;;  %v656_v59 = vmul.f32 %v5846_v53, %v5846_v53 }
 0x161   :  { %v585_v56 = vadd.f32 %v584_v54, %v5849_v55  ;;  %v655_v57 = vmul.f32 %v5849_v55, %v5849_v55  ;;  %v717_v58 = vadd.f32 %v716_v52, %v654_v51  ;;  %v1319_v51 = vld [vmem:[#allocation8 + $0x80] sm:$0xff]  ;;  %v1320_v52 = vld [vmem:[#allocation8 + $0x88] sm:$0xff] }
 0x163   :  { %v718_v60 = vadd.f32 %v717_v58, %v655_v57  ;;  %v5856_v61 = vpop.f32.mrb[10].mxu0  ;;  %v586_v62 = vadd.f32 %v5846_v53, %v585_v56 }
 0x164   :  { %v5859_v63 = vpop.f32.mrb[11].mxu0  ;;  %v658_v4 = vmul.f32 %v5856_v61, %v5856_v61 }
 0x165   :  { %v587_v1 = vadd.f32 %v586_v62, %v5859_v63  ;;  %v657_v2 = vmul.f32 %v5859_v63, %v5859_v63  ;;  %v719_v3 = vadd.f32 %v718_v60, %v656_v59  ;;  %v4939_v59 = vpack.c.bf16 %v1320_v52, %v1319_v51 }
 0x167   :  { %v720_v5 = vadd.f32 %v719_v3, %v657_v2  ;;  %v5866_v6 = vpop.f32.mrb[12].mxu0  ;;  %v588_v7 = vadd.f32 %v5856_v61, %v587_v1  ;;  %4940 = vmatprep.subr.bf16.mxu0 %v4939_v59  ;;  %v1321_v3 = vld [vmem:[#allocation8 + $0x90] sm:$0xff] }
 0x168   :  { %v5869_v8 = vpop.f32.mrb[13].mxu0  ;;  %v660_v12 = vmul.f32 %v5866_v6, %v5866_v6  ;;  %4942 = vmatpush3.bf16.msra.mxu0 %v4939_v59 }
 0x169   :  { %v589_v9 = vadd.f32 %v588_v7, %v5869_v8  ;;  %v659_v10 = vmul.f32 %v5869_v8, %v5869_v8  ;;  %v721_v11 = vadd.f32 %v720_v5, %v658_v4  ;;  %v1322_v4 = vld [vmem:[#allocation8 + $0x98] sm:$0xff] }
 0x16b   :  { %v722_v13 = vadd.f32 %v721_v11, %v659_v10  ;;  %v5876_v14 = vpop.f32.mrb[14].mxu0  ;;  %v590_v15 = vadd.f32 %v5866_v6, %v589_v9  ;;  %v4943_v11 = vpack.c.bf16 %v1322_v4, %v1321_v3 }
 0x16c   :  { %v5879_v16 = vpop.f32.mrb[15].mxu0  ;;  %v662_v20 = vmul.f32 %v5876_v14, %v5876_v14 }
 0x16d   :  { %v591_v17 = vadd.f32 %v590_v15, %v5879_v16  ;;  %v661_v18 = vmul.f32 %v5879_v16, %v5879_v16  ;;  %v723_v19 = vadd.f32 %v722_v13, %v660_v12  ;;  %4944 = vmatprep.subr.bf16.mxu0 %v4943_v11 }
 0x16e   :  { %4946 = vmatpush3.bf16.msra.mxu0 %v4943_v11  ;;  %v1293_v11 = vld [vmem:[#allocation8 + $0x38] sm:$0xff] }
 0x16f   :  { %v724_v21 = vadd.f32 %v723_v19, %v661_v18  ;;  %v4221_v22 = vpop.f32.mrb[16].mxu0  ;;  %v592_v23 = vadd.f32 %v5876_v14, %v591_v17  ;;  %v1286_v18 = vld [vmem:[#allocation8] sm:$0xff]  ;;  %v1287_v19 = vld [vmem:[#allocation8 + $0x8] sm:$0xff] }
 0x170   :  { %v339_v24 = vpop.f32.mrb[17].mxu0  ;;  %v664_v30 = vmul.f32 %v4221_v22, %v4221_v22 }
 0x171   :  { %v593_v25 = vadd.f32 %v592_v23, %v339_v24  ;;  %v663_v27 = vmul.f32 %v339_v24, %v339_v24  ;;  %v725_v29 = vadd.f32 %v724_v21, %v662_v20  ;;  %v1323_v20 = vld [vmem:[#allocation8 + $0xa0] sm:$0xff] }
 0x173   :  { %v726_v31 = vadd.f32 %v725_v29, %v663_v27  ;;  %v4224_v0 = vpop.f32.mrb[18].mxu0  ;;  %v594_v34 = vadd.f32 %v4221_v22, %v593_v25  ;;  %v4971_v25 = vpack.c.bf16 %v1287_v19, %v1286_v18  ;;  %v1324_v27 = vld [vmem:[#allocation8 + $0xa8] sm:$0xff] }
 0x174   :  { %v349_v35 = vpop.f32.mrb[19].mxu0  ;;  %v666_v41 = vmul.f32 %v4224_v0, %v4224_v0 }
 0x175   :  { %v595_v36 = vadd.f32 %v594_v34, %v349_v35  ;;  %v665_v37 = vmul.f32 %v349_v35, %v349_v35  ;;  %v727_v40 = vadd.f32 %v726_v31, %v664_v30  ;;  %v4947_v30 = vpack.c.bf16 %v1324_v27, %v1323_v20  ;;  %4972 = vmatprep.subr.bf16.mxu1 %v4971_v25  ;;  %v1288_v35 = vld [vmem:[#allocation8 + $0x10] sm:$0xff]  ;;  %v1330_v20 = vld [vmem:[#allocation8 + $0xd8] sm:$0xff]  ;;  %v1294_v27 = vld [vmem:[#allocation8 + $0x40] sm:$0xff] }
 0x176   :  { %4974 = vmatpush3.bf16.msra.mxu1 %v4971_v25 }
 0x177   :  { %v728_v42 = vadd.f32 %v727_v40, %v665_v37  ;;  %v4227_v43 = vpop.f32.mrb[20].mxu0  ;;  %v596_v44 = vadd.f32 %v4224_v0, %v595_v36  ;;  %v1289_v36 = vld [vmem:[#allocation8 + $0x18] sm:$0xff]  ;;  %4948 = vmatprep.subr.bf16.mxu0 %v4947_v30  ;;  %v1325_v37 = vld [vmem:[#allocation8 + $0xb0] sm:$0xff] }
 0x178   :  { %v359_v45 = vpop.f32.mrb[21].mxu0  ;;  %v668_v54 = vmul.f32 %v4227_v43, %v4227_v43  ;;  %4950 = vmatpush3.bf16.msra.mxu0 %v4947_v30  ;;  %v1331_v30 = vld [vmem:[#allocation8 + $0xe0] sm:$0xff] }
 0x179   :  { %v597_v48 = vadd.f32 %v596_v44, %v359_v45  ;;  %v667_v49 = vmul.f32 %v359_v45, %v359_v45  ;;  %v729_v50 = vadd.f32 %v728_v42, %v666_v41  ;;  %v4975_v44 = vpack.c.bf16 %v1289_v36, %v1288_v35  ;;  %v1326_v45 = vld [vmem:[#allocation8 + $0xb8] sm:$0xff] }
 0x17b   :  { %v730_v56 = vadd.f32 %v729_v50, %v667_v49  ;;  %v4230_v57 = vpop.f32.mrb[22].mxu0  ;;  %v598_v58 = vadd.f32 %v4227_v43, %v597_v48  ;;  %v4951_v49 = vpack.c.bf16 %v1326_v45, %v1325_v37  ;;  %4976 = vmatprep.subr.bf16.mxu1 %v4975_v44  ;;  %v1332_v37 = vld [vmem:[#allocation8 + $0xe8] sm:$0xff]  ;;  %v1296_v45 = vld [vmem:[#allocation8 + $0x50] sm:$0xff] }
 0x17c   :  { %v369_v60 = vpop.f32.mrb[23].mxu0  ;;  %v670_v5 = vmul.f32 %v4230_v57, %v4230_v57  ;;  %4978 = vmatpush3.bf16.msra.mxu1 %v4975_v44 }
 0x17d   :  { %v599_v62 = vadd.f32 %v598_v58, %v369_v60  ;;  %v669_v1 = vmul.f32 %v369_v60, %v369_v60  ;;  %v731_v2 = vadd.f32 %v730_v56, %v668_v54  ;;  %v1290_v54 = vld [vmem:[#allocation8 + $0x20] sm:$0xff]  ;;  %v1291_v56 = vld [vmem:[#allocation8 + $0x28] sm:$0xff]  ;;  %4952 = vmatprep.subr.bf16.mxu0 %v4951_v49 }
 0x17e   :  { %4954 = vmatpush3.bf16.msra.mxu0 %v4951_v49  ;;  %v1333_v49 = vld [vmem:[#allocation8 + $0xf0] sm:$0xff] }
 0x17f   :  { %v732_v7 = vadd.f32 %v731_v2, %v669_v1  ;;  %v4233_v9 = vpop.f32.mrb[24].mxu0  ;;  %v600_v10 = vadd.f32 %v4230_v57, %v599_v62  ;;  %v1327_v57 = vld [vmem:[#allocation8 + $0xc0] sm:$0xff]  ;;  %v4979_v1 = vpack.c.bf16 %v1291_v56, %v1290_v54  ;;  %v1328_v2 = vld [vmem:[#allocation8 + $0xc8] sm:$0xff] }
 0x180   :  { %v379_v12 = vpop.f32.mrb[25].mxu0  ;;  %v672_v21 = vmul.f32 %v4233_v9, %v4233_v9  ;;  %v4955_v4 = vpack.c.bf16 %v1328_v2, %v1327_v57  ;;  %v1334_v57 = vld [vmem:[#allocation8 + $0xf8] sm:$0xff]  ;;  %v1298_v2 = vld [vmem:[#allocation8 + $0x60] sm:$0xff] }
 0x181   :  { %v601_v13 = vadd.f32 %v600_v10, %v379_v12  ;;  %v671_v15 = vmul.f32 %v379_v12, %v379_v12  ;;  %v733_v17 = vadd.f32 %v732_v7, %v670_v5  ;;  %4980 = vmatprep.subr.bf16.mxu1 %v4979_v1  ;;  %v1292_v10 = vld [vmem:[#allocation8 + $0x30] sm:$0xff] }
 0x182   :  { %4982 = vmatpush3.bf16.msra.mxu1 %v4979_v1  ;;  %4956 = vmatprep.subr.bf16.mxu0 %v4955_v4  ;;  %v1329_v12 = vld [vmem:[#allocation8 + $0xd0] sm:$0xff]  ;;  %v4983_v19 = vpack.c.bf16 %v1293_v11, %v1292_v10 }
 0x183   :  { %v734_v22 = vadd.f32 %v733_v17, %v671_v15  ;;  %v4236_v23 = vpop.f32.mrb[26].mxu0  ;;  %v602_v24 = vadd.f32 %v4233_v9, %v601_v13  ;;  %4958 = vmatpush3.bf16.msra.mxu0 %v4955_v4 }
 0x184   :  { %v389_v29 = vpop.f32.mrb[27].mxu0  ;;  %v674_v40 = vmul.f32 %v4236_v23, %v4236_v23  ;;  %4984 = vmatprep.subr.bf16.mxu1 %v4983_v19 }
 0x185   :  { %v603_v31 = vadd.f32 %v602_v24, %v389_v29  ;;  %v673_v0 = vmul.f32 %v389_v29, %v389_v29  ;;  %v735_v34 = vadd.f32 %v734_v22, %v672_v21  ;;  %v4959_v22 = vpack.c.bf16 %v1330_v20, %v1329_v12  ;;  %v1295_v29 = vld [vmem:[#allocation8 + $0x48] sm:$0xff] }
 0x186   :  { %4986 = vmatpush3.bf16.msra.mxu1 %v4983_v19  ;;  %v4987_v36 = vpack.c.bf16 %v1295_v29, %v1294_v27  ;;  %v1270_v19 = vld [vmem:[#allocation2 + $0x7] sm:$0xff] }
 0x187   :  { %v736_v41 = vadd.f32 %v735_v34, %v673_v0  ;;  %v4239_v42 = vpop.f32.mrb[28].mxu0  ;;  %v604_v43 = vadd.f32 %v4236_v23, %v603_v31  ;;  %4960 = vmatprep.subr.bf16.mxu0 %v4959_v22  ;;  %4379 = vmatprep.mubr.f32.mxu1 %v1270_v19 }
 0x188   :  { %v399_v48 = vpop.f32.mrb[29].mxu0  ;;  %v676_v58 = vmul.f32 %v4239_v42, %v4239_v42  ;;  %4962 = vmatpush3.bf16.msra.mxu0 %v4959_v22  ;;  %4988 = vmatprep.subr.bf16.mxu1 %v4987_v36  ;;  %v1643_v22 = vld [vmem:[#allocation8 + $0x108] sm:$0xff] }
 0x189   :  { %v605_v50 = vadd.f32 %v604_v43, %v399_v48  ;;  %v675_v51 = vmul.f32 %v399_v48, %v399_v48  ;;  %v737_v52 = vadd.f32 %v736_v41, %v674_v40  ;;  %v4963_v41 = vpack.c.bf16 %v1332_v37, %v1331_v30  ;;  %v1297_v48 = vld [vmem:[#allocation8 + $0x58] sm:$0xff] }
 0x18a   :  { %4990 = vmatpush3.bf16.msra.mxu1 %v4987_v36  ;;  %v4991_v56 = vpack.c.bf16 %v1297_v48, %v1296_v45 }
 0x18b   :  { %v738_v59 = vadd.f32 %v737_v52, %v675_v51  ;;  %v4242_v60 = vpop.f32.mrb[30].mxu0  ;;  %v606_v62 = vadd.f32 %v4239_v42, %v605_v50  ;;  %4964 = vmatprep.subr.bf16.mxu0 %v4963_v41 }
 0x18c   :  { %v409_v3 = vpop.f32.mrb[31].mxu0  ;;  %v678_v13 = vmul.f32 %v4242_v60, %v4242_v60  ;;  %4966 = vmatpush3.bf16.msra.mxu0 %v4963_v41  ;;  %4992 = vmatprep.subr.bf16.mxu1 %v4991_v56 }
 0x18d   :  { %v607_v5 = vadd.f32 %v606_v62, %v409_v3  ;;  %v677_v7 = vmul.f32 %v409_v3, %v409_v3  ;;  %v739_v9 = vadd.f32 %v738_v59, %v676_v58  ;;  %v4967_v59 = vpack.c.bf16 %v1334_v57, %v1333_v49  ;;  %v1299_v3 = vld [vmem:[#allocation8 + $0x68] sm:$0xff] }
 0x18e   :  { %4994 = vmatpush3.bf16.msra.mxu1 %v4991_v56  ;;  %v4995_v10 = vpack.c.bf16 %v1299_v3, %v1298_v2 }
 0x18f   :  { %v740_v15 = vadd.f32 %v739_v9, %v677_v7  ;;  %v4245_v17 = vpop.f32.mrb[32].mxu0  ;;  %v608_v18 = vadd.f32 %v4242_v60, %v607_v5  ;;  %4968 = vmatprep.subr.bf16.mxu0 %v4967_v59 }
 0x190   :  { %v419_v21 = vpop.f32.mrb[33].mxu0  ;;  %v680_v31 = vmul.f32 %v4245_v17, %v4245_v17  ;;  %4970 = vmatpush3.bf16.msra.mxu0 %v4967_v59  ;;  %4996 = vmatprep.subr.bf16.mxu1 %v4995_v10 }
 0x191   :  { %v609_v23 = vadd.f32 %v608_v18, %v419_v21  ;;  %v679_v24 = vmul.f32 %v419_v21, %v419_v21  ;;  %v741_v25 = vadd.f32 %v740_v15, %v678_v13  ;;  %v1301_v18 = vld [vmem:[#allocation8 + $0x78] sm:$0xff]  ;;  %v1642_v21 = vld [vmem:[#allocation8 + $0x100] sm:$0xff] }
 0x192   :  { %4998 = vmatpush3.bf16.msra.mxu1 %v4995_v10  ;;  %v5887_v29 = vpack.c.bf16 %v1643_v22, %v1642_v21 }
 0x193   :  { %v742_v0 = vadd.f32 %v741_v25, %v679_v24  ;;  %v4248_v34 = vpop.f32.mrb[34].mxu0  ;;  %v610_v35 = vadd.f32 %v4245_v17, %v609_v23  ;;  %v1300_v17 = vld [vmem:[#allocation8 + $0x70] sm:$0xff] }
 0x194   :  { %v429_v40 = vpop.f32.mrb[35].mxu0  ;;  %v682_v50 = vmul.f32 %v4248_v34, %v4248_v34  ;;  %v4999_v20 = vpack.c.bf16 %v1301_v18, %v1300_v17 }
 0x195   :  { %v611_v42 = vadd.f32 %v610_v35, %v429_v40  ;;  %v681_v43 = vmul.f32 %v429_v40, %v429_v40  ;;  %v743_v44 = vadd.f32 %v742_v0, %v680_v31 }
 0x196   :  { %5000 = vmatprep.subr.bf16.mxu1 %v4999_v20 }
 0x197   :  { %v744_v51 = vadd.f32 %v743_v44, %v681_v43  ;;  %v4251_v52 = vpop.f32.mrb[36].mxu0  ;;  %v612_v54 = vadd.f32 %v4248_v34, %v611_v42  ;;  %5002 = vmatpush3.bf16.msra.mxu1 %v4999_v20 }
 0x198   :  { %v439_v58 = vpop.f32.mrb[37].mxu0  ;;  %v684_v4 = vmul.f32 %v4251_v52, %v4251_v52  ;;  %5004 = vmatprep.subr.bf16.mxu1 %v5887_v29 }
 0x199   :  { %v613_v60 = vadd.f32 %v612_v54, %v439_v58  ;;  %v683_v62 = vmul.f32 %v439_v58, %v439_v58  ;;  %v745_v1 = vadd.f32 %v744_v51, %v682_v50 }
 0x19b   :  { %v746_v5 = vadd.f32 %v745_v1, %v683_v62  ;;  %v4254_v7 = vpop.f32.mrb[38].mxu0  ;;  %v614_v9 = vadd.f32 %v4251_v52, %v613_v60 }
 0x19c   :  { %v449_v11 = vpop.f32.mrb[39].mxu0  ;;  %v686_v23 = vmul.f32 %v4254_v7, %v4254_v7 }
 0x19d   :  { %v615_v12 = vadd.f32 %v614_v9, %v449_v11  ;;  %v685_v13 = vmul.f32 %v449_v11, %v449_v11  ;;  %v747_v15 = vadd.f32 %v746_v5, %v684_v4 }
 0x19f   :  { %v748_v24 = vadd.f32 %v747_v15, %v685_v13  ;;  %v4257_v25 = vpop.f32.mrb[40].mxu0  ;;  %v616_v27 = vadd.f32 %v4254_v7, %v615_v12 }
 0x1a0   :  { %v459_v30 = vpop.f32.mrb[41].mxu0  ;;  %v688_v35 = vmul.f32 %v4257_v25, %v4257_v25 }
 0x1a1   :  { %v617_v31 = vadd.f32 %v616_v27, %v459_v30  ;;  %v687_v0 = vmul.f32 %v459_v30, %v459_v30  ;;  %v749_v34 = vadd.f32 %v748_v24, %v686_v23 }
 0x1a3   :  { %v750_v36 = vadd.f32 %v749_v34, %v687_v0  ;;  %v4260_v37 = vpop.f32.mrb[42].mxu0  ;;  %v618_v40 = vadd.f32 %v4257_v25, %v617_v31 }
 0x1a4   :  { %v469_v41 = vpop.f32.mrb[43].mxu0  ;;  %v690_v45 = vmul.f32 %v4260_v37, %v4260_v37 }
 0x1a5   :  { %v619_v42 = vadd.f32 %v618_v40, %v469_v41  ;;  %v689_v43 = vmul.f32 %v469_v41, %v469_v41  ;;  %v751_v44 = vadd.f32 %v750_v36, %v688_v35 }
 0x1a7   :  { %v752_v48 = vadd.f32 %v751_v44, %v689_v43  ;;  %v4263_v49 = vpop.f32.mrb[44].mxu0  ;;  %v620_v50 = vadd.f32 %v4260_v37, %v619_v42 }
 0x1a8   :  { %v479_v51 = vpop.f32.mrb[45].mxu0  ;;  %v692_v57 = vmul.f32 %v4263_v49, %v4263_v49 }
 0x1a9   :  { %v621_v52 = vadd.f32 %v620_v50, %v479_v51  ;;  %v691_v54 = vmul.f32 %v479_v51, %v479_v51  ;;  %v753_v56 = vadd.f32 %v752_v48, %v690_v45 }
 0x1ab   :  { %v754_v58 = vadd.f32 %v753_v56, %v691_v54  ;;  %v4266_v59 = vpop.f32.mrb[46].mxu0  ;;  %v622_v60 = vadd.f32 %v4263_v49, %v621_v52 }
 0x1ac   :  { %v489_v62 = vpop.f32.mrb[47].mxu0  ;;  %v694_v4 = vmul.f32 %v4266_v59, %v4266_v59 }
 0x1ad   :  { %v623_v1 = vadd.f32 %v622_v60, %v489_v62  ;;  %v693_v2 = vmul.f32 %v489_v62, %v489_v62  ;;  %v755_v3 = vadd.f32 %v754_v58, %v692_v57 }
 0x1af   :  { %v756_v5 = vadd.f32 %v755_v3, %v693_v2  ;;  %v4269_v7 = vpop.f32.mrb[48].mxu0  ;;  %v624_v9 = vadd.f32 %v4266_v59, %v623_v1 }
 0x1b0   :  { %v499_v10 = vpop.f32.mrb[49].mxu0  ;;  %v696_v15 = vmul.f32 %v4269_v7, %v4269_v7 }
 0x1b1   :  { %v625_v11 = vadd.f32 %v624_v9, %v499_v10  ;;  %v695_v12 = vmul.f32 %v499_v10, %v499_v10  ;;  %v757_v13 = vadd.f32 %v756_v5, %v694_v4 }
 0x1b3   :  { %v758_v17 = vadd.f32 %v757_v13, %v695_v12  ;;  %v4272_v18 = vpop.f32.mrb[50].mxu0  ;;  %v626_v19 = vadd.f32 %v4269_v7, %v625_v11 }
 0x1b4   :  { %v509_v20 = vpop.f32.mrb[51].mxu0  ;;  %v698_v24 = vmul.f32 %v4272_v18, %v4272_v18 }
 0x1b5   :  { %v627_v21 = vadd.f32 %v626_v19, %v509_v20  ;;  %v697_v22 = vmul.f32 %v509_v20, %v509_v20  ;;  %v759_v23 = vadd.f32 %v758_v17, %v696_v15 }
 0x1b7   :  { %v760_v25 = vadd.f32 %v759_v23, %v697_v22  ;;  %v4275_v27 = vpop.f32.mrb[52].mxu0  ;;  %v628_v30 = vadd.f32 %v4272_v18, %v627_v21 }
 0x1b8   :  { %v519_v31 = vpop.f32.mrb[53].mxu0  ;;  %v700_v36 = vmul.f32 %v4275_v27, %v4275_v27 }
 0x1b9   :  { %v629_v0 = vadd.f32 %v628_v30, %v519_v31  ;;  %v699_v34 = vmul.f32 %v519_v31, %v519_v31  ;;  %v761_v35 = vadd.f32 %v760_v25, %v698_v24 }
 0x1bb   :  { %v762_v37 = vadd.f32 %v761_v35, %v699_v34  ;;  %v4278_v40 = vpop.f32.mrb[54].mxu0  ;;  %v630_v41 = vadd.f32 %v4275_v27, %v629_v0 }
 0x1bc   :  { %v529_v42 = vpop.f32.mrb[55].mxu0  ;;  %v702_v48 = vmul.f32 %v4278_v40, %v4278_v40 }
 0x1bd   :  { %v631_v43 = vadd.f32 %v630_v41, %v529_v42  ;;  %v701_v44 = vmul.f32 %v529_v42, %v529_v42  ;;  %v763_v45 = vadd.f32 %v762_v37, %v700_v36 }
 0x1bf   :  { %v764_v49 = vadd.f32 %v763_v45, %v701_v44  ;;  %v4281_v50 = vpop.f32.mrb[56].mxu0  ;;  %v632_v51 = vadd.f32 %v4278_v40, %v631_v43 }
 0x1c0   :  { %v539_v52 = vpop.f32.mrb[57].mxu0  ;;  %v704_v58 = vmul.f32 %v4281_v50, %v4281_v50 }
 0x1c1   :  { %v633_v54 = vadd.f32 %v632_v51, %v539_v52  ;;  %v703_v56 = vmul.f32 %v539_v52, %v539_v52  ;;  %v765_v57 = vadd.f32 %v764_v49, %v702_v48 }
 0x1c3   :  { %v766_v59 = vadd.f32 %v765_v57, %v703_v56  ;;  %v4284_v60 = vpop.f32.mrb[58].mxu0  ;;  %v634_v62 = vadd.f32 %v4281_v50, %v633_v54  ;;  %v793_v57 = vlaneseq }
 0x1c4   :  { %v549_v1 = vpop.f32.mrb[59].mxu0  ;;  %v706_v5 = vmul.f32 %v4284_v60, %v4284_v60 }
 0x1c5   :  { %v635_v2 = vadd.f32 %v634_v62, %v549_v1  ;;  %v705_v3 = vmul.f32 %v549_v1, %v549_v1  ;;  %v767_v4 = vadd.f32 %v766_v59, %v704_v58  ;;  %v794_v58 = vshrl.u32 %v793_v57, 7  ;;  %v785_v59 = vld [vmem:[%s6627_s2] sm:$0x1]  ;;  %v1647_v57 = vld [vmem:[#allocation8 + $0x128] sm:$0xff] }
 0x1c7   :  { %v768_v7 = vadd.f32 %v767_v4, %v705_v3  ;;  %v4287_v9 = vpop.f32.mrb[60].mxu0  ;;  %v636_v10 = vadd.f32 %v4284_v60, %v635_v2  ;;  %v5893_v60 = vsub.s32 0, %v794_v58  ;;  %v789_v2 = vld [vmem:[%s6628_s3] sm:$0x1] }
 0x1c8   :  { %v559_v11 = vpop.f32.mrb[61].mxu0  ;;  %v708_v17 = vmul.f32 %v4287_v9, %v4287_v9 }
 0x1c9   :  { %v637_v12 = vadd.f32 %v636_v10, %v559_v11  ;;  %v707_v13 = vmul.f32 %v559_v11, %v559_v11  ;;  %v769_v15 = vadd.f32 %v768_v7, %v706_v5 }
 0x1cb   :  { %v770_v18 = vadd.f32 %v769_v15, %v707_v13  ;;  %v4290_v19 = vpop.f32.mrb[62].mxu0  ;;  %v638_v20 = vadd.f32 %v4287_v9, %v637_v12 }
 0x1cc   :  { %v569_v21 = vpop.f32.mrb[63].mxu0  ;;  %v710_v25 = vmul.f32 %v4290_v19, %v4290_v19 }
 0x1cd   :  { %v639_v22 = vadd.f32 %v638_v20, %v569_v21  ;;  %v709_v23 = vmul.f32 %v569_v21, %v569_v21  ;;  %v771_v24 = vadd.f32 %v770_v18, %v708_v17 }
 0x1cf   :  { %v640_v27 = vadd.f32 %v4290_v19, %v639_v22  ;;  %v772_v30 = vadd.f32 %v771_v24, %v709_v23 }
 0x1d1   :  { %v641_v31 = vrot.slane %v640_v27, 4  ;;  %v773_v0 = vadd.f32 %v772_v30, %v710_v25 }
 0x1d3   :  { %v642_v34 = vadd.f32 %v641_v31, %v640_v27  ;;  %v774_v35 = vrot.slane %v773_v0, 4 }
 0x1d5   :  { %v643_v36 = vrot.slane %v642_v34, 2  ;;  %v775_v37 = vadd.f32 %v774_v35, %v773_v0 }
 0x1d7   :  { %v644_v40 = vadd.f32 %v643_v36, %v642_v34  ;;  %v776_v41 = vrot.slane %v775_v37, 2 }
 0x1d9   :  { %v645_v42 = vrot.slane %v644_v40, 1  ;;  %v777_v43 = vadd.f32 %v776_v41, %v775_v37  ;;  %v1644_v37 = vld [vmem:[#allocation8 + $0x110] sm:$0xff] }
 0x1db   :  { %v646_v44 = vadd.f32 %v645_v42, %v644_v40  ;;  %v778_v45 = vrot.slane %v777_v43, 1  ;;  %v1645_v40 = vld [vmem:[#allocation8 + $0x118] sm:$0xff] }
 0x1dd   :  { %v779_v48 = vadd.f32 %v778_v45, %v777_v43  ;;  %v780_v49 = vmul.f32 0.001953125, %v646_v44 }
 0x1df   :  { %v781_v50 = vmul.f32 0.001953125, %v779_v48  ;;  %v782_v51 = vmul.f32 %v780_v49, %v780_v49 }
 0x1e1   :  { %v783_v52 = vsub.f32 %v781_v50, %v782_v51  ;;  %v5007_v51 = vpack.c.bf16 %v1645_v40, %v1644_v37  ;;  %v1838_v40 = vld [vmem:[#allocation8 + $0x190] sm:$0xff] }
 0x1e3   :  { %v784_v54 = vmax.f32 %v783_v52, 0.0 }
 0x1e5   :  { %v786_v56 = vadd.f32 1e-05, %v784_v54 }
 0x1e7   :  { %5428 = vrsqrt.f32 %v786_v56 }
 0x1f1   :  { %v5429_v62 = vpop.eup %5428 }
 0x1f2   :  { %v788_v1 = vmul.f32 %v5429_v62, %v785_v59 }
 0x1f4   :  { %v790_v3 = vmul.f32 %v788_v1, %v780_v49  ;;  %v5899_v4 = vrot.slane %v788_v1, %v5893_v60 }
 0x1f6   :  { %v791_v5 = vsub.f32 %v789_v2, %v790_v3  ;;  %v798_v9 = vmul.f32 %v5899_v4, %v5811_v28  ;;  %v799_v10 = vmul.f32 %v5807_v26, %v5899_v4  ;;  %v800_v11 = vmul.f32 %v5899_v4, %v5819_v33  ;;  %v1648_v2 = vld [vmem:[#allocation8 + $0x130] sm:$0xff]  ;;  %v1649_v3 = vld [vmem:[#allocation8 + $0x138] sm:$0xff] }
 0x1f7   :  { %v801_v12 = vmul.f32 %v5817_v32, %v5899_v4  ;;  %v802_v13 = vmul.f32 %v5899_v4, %v5829_v39  ;;  %v803_v15 = vmul.f32 %v5827_v38, %v5899_v4  ;;  %v804_v32 = vmul.f32 %v5899_v4, %v5839_v47 }
 0x1f8   :  { %v5902_v7 = vrot.slane %v791_v5, %v5893_v60  ;;  %v806_v39 = vmul.f32 %v5899_v4, %v5849_v55  ;;  %v807_v47 = vmul.f32 %v5846_v53, %v5899_v4  ;;  %v808_v55 = vmul.f32 %v5899_v4, %v5859_v63  ;;  %v6020_v5 = vld [vmem:[#allocation2 + $0x1e8] sm:$0xff] }
 0x1f9   :  { %v809_v30 = vmul.f32 %v5856_v61, %v5899_v4  ;;  %v810_v31 = vmul.f32 %v5899_v4, %v5869_v8  ;;  %v811_v53 = vmul.f32 %v5866_v6, %v5899_v4  ;;  %v812_v63 = vmul.f32 %v5899_v4, %v5879_v16 }
 0x1fa   :  { %v868_v17 = vadd.f32 %v5902_v7, %v798_v9  ;;  %v869_v18 = vadd.f32 %v5902_v7, %v799_v10  ;;  %v870_v28 = vadd.f32 %v5902_v7, %v800_v11  ;;  %v871_v26 = vadd.f32 %v5902_v7, %v801_v12  ;;  %v1650_v9 = vld [vmem:[#allocation8 + $0x140] sm:$0xff]  ;;  %v1651_v10 = vld [vmem:[#allocation8 + $0x148] sm:$0xff]  ;;  %v1278_v12 = vld [vmem:[#allocation2 + $0xf7] sm:$0xff] }
 0x1fb   :  { %v872_v19 = vadd.f32 %v5902_v7, %v802_v13  ;;  %v873_v33 = vadd.f32 %v5902_v7, %v803_v15  ;;  %v874_v25 = vadd.f32 %v5902_v7, %v804_v32  ;;  %v876_v27 = vadd.f32 %v5902_v7, %v806_v39 }
 0x1fc   :  { %v5926_v20 = vmax.f32 %v868_v17, 0.0  ;;  %v5928_v38 = vmax.f32 %v869_v18, 0.0  ;;  %v5930_v21 = vmax.f32 %v870_v28, 0.0  ;;  %v5932_v22 = vmax.f32 %v871_v26, 0.0  ;;  %v1652_v17 = vld [vmem:[#allocation8 + $0x150] sm:$0xff]  ;;  %v1653_v18 = vld [vmem:[#allocation8 + $0x158] sm:$0xff] }
 0x1fd   :  { %v5934_v23 = vmax.f32 %v872_v19, 0.0  ;;  %v5936_v24 = vmax.f32 %v873_v33, 0.0  ;;  %v5956_v0 = vmax.f32 %v874_v25, 0.0  ;;  %v5958_v34 = vmax.f32 %v876_v27, 0.0  ;;  %v1654_v19 = vld [vmem:[#allocation8 + $0x160] sm:$0xff]  ;;  %v1655_v33 = vld [vmem:[#allocation8 + $0x168] sm:$0xff] }
 0x1fe   :  { %1206 = vst [vmem:[#allocation2 + $0x20] sm:$0xff] %v5926_v20  ;;  %4324 = vmatmul.mubr.f32.vlgmr.msra.gmra.mrb[64].mxu0 %v5926_v20  ;;  %1207 = vst [vmem:[#allocation2 + $0x38] sm:$0xff] %v5928_v38  ;;  %v877_v61 = vadd.f32 %v5902_v7, %v807_v47  ;;  %v878_v8 = vadd.f32 %v5902_v7, %v808_v55  ;;  %v879_v35 = vadd.f32 %v5902_v7, %v809_v30  ;;  %v1656_v27 = vld [vmem:[#allocation8 + $0x170] sm:$0xff]  ;;  %v1657_v47 = vld [vmem:[#allocation8 + $0x178] sm:$0xff] }
 0x1ff   :  { %1208 = vst [vmem:[#allocation2 + $0x50] sm:$0xff] %v5930_v21  ;;  %1209 = vst [vmem:[#allocation2 + $0x68] sm:$0xff] %v5932_v22  ;;  %4326 = vmatprep.mubr.f32.mxu0 %v5928_v38  ;;  %v880_v36 = vadd.f32 %v5902_v7, %v810_v31  ;;  %v881_v41 = vadd.f32 %v5902_v7, %v811_v53  ;;  %v882_v6 = vadd.f32 %v5902_v7, %v812_v63  ;;  %v5437_v31 = vld [vmem:[#allocation3] sm:$0xff] }
 0x200   :  { %1210 = vst [vmem:[#allocation2 + $0x80] sm:$0xff] %v5934_v23  ;;  %1211 = vst [vmem:[#allocation2 + $0x98] sm:$0xff] %v5936_v24  ;;  %v805_v16 = vmul.f32 %v5837_v46, %v5899_v4  ;;  %v5975_v42 = vmax.f32 %v877_v61, 0.0  ;;  %v5977_v43 = vmax.f32 %v878_v8, 0.0  ;;  %v5979_v44 = vmax.f32 %v879_v35, 0.0  ;;  %v1646_v46 = vld [vmem:[#allocation8 + $0x120] sm:$0xff] }
 0x201   :  { %1212 = vst [vmem:[#allocation2 + $0xb0] sm:$0xff] %v5956_v0  ;;  %1214 = vst [vmem:[#allocation2 + $0x110] sm:$0xff] %v5958_v34  ;;  %v5981_v45 = vmax.f32 %v880_v36, 0.0  ;;  %v5984_v48 = vmax.f32 %v881_v41, 0.0  ;;  %v5986_v49 = vmax.f32 %v882_v6, 0.0  ;;  %v813_v52 = vmul.f32 %v5876_v14, %v5899_v4  ;;  %v1836_v63 = vld [vmem:[#allocation8 + $0x180] sm:$0xff] }
 0x202   :  { %4327 = vmatmul.mubr.f32.gmra.mrb[66].mxu0 %v5930_v21  ;;  %v875_v50 = vadd.f32 %v5902_v7, %v805_v16  ;;  %1215 = vst [vmem:[#allocation2 + $0x128] sm:$0xff] %v5975_v42  ;;  %1216 = vst [vmem:[#allocation2 + $0x140] sm:$0xff] %v5977_v43  ;;  %v5011_v14 = vpack.c.bf16 %v1647_v57, %v1646_v46  ;;  %v5019_v13 = vpack.c.bf16 %v1651_v10, %v1650_v9  ;;  %v1837_v61 = vld [vmem:[#allocation8 + $0x188] sm:$0xff]  ;;  %v1839_v41 = vld [vmem:[#allocation8 + $0x198] sm:$0xff] }
 0x203   :  { %4329 = vmatprep.mubr.f32.mxu0 %v5932_v22  ;;  %1217 = vst [vmem:[#allocation2 + $0x158] sm:$0xff] %v5979_v44  ;;  %1218 = vst [vmem:[#allocation2 + $0x170] sm:$0xff] %v5981_v45  ;;  %v883_v59 = vadd.f32 %v5902_v7, %v813_v52  ;;  %v5023_v28 = vpack.c.bf16 %v1653_v18, %v1652_v17  ;;  %v5027_v39 = vpack.c.bf16 %v1655_v33, %v1654_v19  ;;  %v1625_v35 = vld [vmem:[#allocation2 + $0x9] sm:$0xff]  ;;  %v1844_v9 = vld [vmem:[#allocation8 + $0x1c0] sm:$0xff] }
 0x204   :  { %1219 = vst [vmem:[#allocation2 + $0x188] sm:$0xff] %v5984_v48  ;;  %1220 = vst [vmem:[#allocation2 + $0x1a0] sm:$0xff] %v5986_v49  ;;  %v6001_v58 = vmax.f32 %v875_v50, 0.0  ;;  %v5031_v30 = vpack.c.bf16 %v1657_v47, %v1656_v27  ;;  %v5035_v36 = vpack.c.bf16 %v1837_v61, %v1836_v63  ;;  %v5039_v6 = vpack.c.bf16 %v1839_v41, %v1838_v40  ;;  %v1840_v50 = vld [vmem:[#allocation8 + $0x1a0] sm:$0xff]  ;;  %v1845_v10 = vld [vmem:[#allocation8 + $0x1c8] sm:$0xff] }
 0x205   :  { %v5995_v54 = vld [vmem:[#allocation2 + $0x1f] sm:$0xff]  ;;  %v5997_v56 = vld [vmem:[#allocation2 + $0x37] sm:$0xff]  ;;  %v6010_v62 = vmax.f32 %v883_v59, 0.0  ;;  %v5051_v17 = vpack.c.bf16 %v1845_v10, %v1844_v9  ;;  %v1849_v47 = vld [vmem:[#allocation8 + $0x1e8] sm:$0xff] }
 0x206   :  { %4380 = vmatmul.mubr.f32.vlgmr.msra.gmra.mrb[0].mxu1 %v5995_v54  ;;  %4330 = vmatmul.mubr.f32.gmra.mrb[68].mxu0 %v5934_v23  ;;  %1213 = vst [vmem:[#allocation2 + $0xc8] sm:$0xff] %v6001_v58  ;;  %v6012_v1 = vld [vmem:[#allocation2 + $0x4f] sm:$0xff]  ;;  %v6015_v4 = vld [vmem:[#allocation2 + $0x67] sm:$0xff]  ;;  %v6063_v46 = vld [vmem:[#allocation2 + $0x39] sm:$0xff] }
 0x207   :  { %5006 = vmatpush3.bf16.msra.mxu1 %v5887_v29  ;;  %4382 = vmatprep.mubr.f32.mxu1 %v5997_v56  ;;  %1221 = vst [vmem:[#allocation2 + $0x1b8] sm:$0xff] %v6010_v62  ;;  %v5015_v29 = vpack.c.bf16 %v1649_v3, %v1648_v2  ;;  %v6023_v7 = vld [vmem:[#allocation2 + $0x7f] sm:$0xff]  ;;  %v6026_v11 = vld [vmem:[#allocation2 + $0x97] sm:$0xff]  ;;  %v6069_v2 = vld [vmem:[#allocation2 + $0x69] sm:$0xff] }
 0x208   :  { %5008 = vmatprep.subr.bf16.mxu1 %v5007_v51  ;;  %4332 = vmatprep.mubr.f32.mxu0 %v5936_v24  ;;  %v6031_v15 = vld [vmem:[#allocation2 + $0xaf] sm:$0xff]  ;;  %v6060_v16 = vld [vmem:[#allocation2 + $0x21] sm:$0xff]  ;;  %v1847_v19 = vld [vmem:[#allocation8 + $0x1d8] sm:$0xff] }
 0x209   :  { %v6036_v26 = vld [vmem:[#allocation2 + $0x10f] sm:$0xff]  ;;  %v6039_v32 = vld [vmem:[#allocation2 + $0x127] sm:$0xff]  ;;  %v6044_v25 = vld [vmem:[#allocation2 + $0x13f] sm:$0xff] }
 0x20a   :  { %4383 = vmatmul.mubr.f32.gmra.mrb[2].mxu1 %v6012_v1  ;;  %4333 = vmatmul.mubr.f32.gmra.mrb[70].mxu0 %v5956_v0  ;;  %v6047_v55 = vld [vmem:[#allocation2 + $0x157] sm:$0xff]  ;;  %v6051_v53 = vld [vmem:[#allocation2 + $0x16f] sm:$0xff]  ;;  %v1848_v27 = vld [vmem:[#allocation8 + $0x1e0] sm:$0xff] }
 0x20b   :  { %5010 = vmatpush3.bf16.msra.mxu1 %v5007_v51  ;;  %4385 = vmatprep.mubr.f32.mxu1 %v6015_v4  ;;  %v6054_v8 = vld [vmem:[#allocation2 + $0x187] sm:$0xff]  ;;  %v6057_v37 = vld [vmem:[#allocation2 + $0x19f] sm:$0xff]  ;;  %v6066_v57 = vld [vmem:[#allocation2 + $0x51] sm:$0xff] }
 0x20c   :  { %5012 = vmatprep.subr.bf16.mxu1 %v5011_v14  ;;  %4335 = vmatprep.mubr.f32.mxu0 %v6020_v5  ;;  %v1841_v51 = vld [vmem:[#allocation8 + $0x1a8] sm:$0xff]  ;;  %v1842_v59 = vld [vmem:[#allocation8 + $0x1b0] sm:$0xff]  ;;  %v2034_v10 = vld [vmem:[#allocation8 + $0x220] sm:$0xff] }
 0x20d   :  { %v5043_v52 = vpack.c.bf16 %v1841_v51, %v1840_v50  ;;  %v6078_v18 = vld [vmem:[#allocation2 + $0xb1] sm:$0xff]  ;;  %v6087_v63 = vld [vmem:[#allocation2 + $0x141] sm:$0xff]  ;;  %v6096_v51 = vld [vmem:[#allocation2 + $0x189] sm:$0xff] }
 0x20e   :  { %4386 = vmatmul.mubr.f32.gmra.mrb[4].mxu1 %v6023_v7  ;;  %4336 = vmatmul.mubr.f32.gmra.mrb[72].mxu0 %v5958_v34  ;;  %v1850_v61 = vld [vmem:[#allocation8 + $0x1f0] sm:$0xff]  ;;  %v2031_v50 = vld [vmem:[#allocation8 + $0x208] sm:$0xff] }
 0x20f   :  { %5014 = vmatpush3.bf16.msra.mxu1 %v5011_v14  ;;  %4388 = vmatprep.mubr.f32.mxu1 %v6026_v11  ;;  %v1843_v14 = vld [vmem:[#allocation8 + $0x1b8] sm:$0xff] }
 0x210   :  { %5016 = vmatprep.subr.bf16.mxu1 %v5015_v29  ;;  %4338 = vmatprep.mubr.f32.mxu0 %v5975_v42  ;;  %v5047_v3 = vpack.c.bf16 %v1843_v14, %v1842_v59  ;;  %v6093_v41 = vld [vmem:[#allocation2 + $0x171] sm:$0xff]  ;;  %v6099_v59 = vld [vmem:[#allocation2 + $0x1a1] sm:$0xff] }
 0x211   :  { %v2032_v14 = vld [vmem:[#allocation8 + $0x210] sm:$0xff] }
 0x212   :  { %4389 = vmatmul.mubr.f32.gmra.mrb[6].mxu1 %v6031_v15  ;;  %4339 = vmatmul.mubr.f32.gmra.mrb[74].mxu0 %v5977_v43 }
 0x213   :  { %5018 = vmatpush3.bf16.msra.mxu1 %v5015_v29  ;;  %4391 = vmatprep.mubr.f32.mxu1 %v1278_v12  ;;  %v6072_v29 = vld [vmem:[#allocation2 + $0x81] sm:$0xff]  ;;  %v6075_v12 = vld [vmem:[#allocation2 + $0x99] sm:$0xff] }
 0x214   :  { %5020 = vmatprep.subr.bf16.mxu1 %v5019_v13  ;;  %4341 = vmatprep.mubr.f32.mxu0 %v5979_v44 }
 0x216   :  { %4392 = vmatmul.mubr.f32.gmra.mrb[8].mxu1 %v6036_v26  ;;  %4342 = vmatmul.mubr.f32.gmra.mrb[76].mxu0 %v5981_v45 }
 0x217   :  { %5022 = vmatpush3.bf16.msra.mxu1 %v5019_v13  ;;  %4394 = vmatprep.mubr.f32.mxu1 %v6039_v32  ;;  %v1633_v13 = vld [vmem:[#allocation2 + $0xf9] sm:$0xff] }
 0x218   :  { %5024 = vmatprep.subr.bf16.mxu1 %v5023_v28  ;;  %4344 = vmatprep.mubr.f32.mxu0 %v5984_v48 }
 0x21a   :  { %4395 = vmatmul.mubr.f32.gmra.mrb[10].mxu1 %v6044_v25  ;;  %4345 = vmatmul.mubr.f32.gmra.mrb[78].mxu0 %v5986_v49 }
 0x21b   :  { %5026 = vmatpush3.bf16.msra.mxu1 %v5023_v28  ;;  %4397 = vmatprep.mubr.f32.mxu1 %v6047_v55  ;;  %v1846_v28 = vld [vmem:[#allocation8 + $0x1d0] sm:$0xff] }
 0x21c   :  { %5028 = vmatprep.subr.bf16.mxu1 %v5027_v39  ;;  %4827 = vmatprep.mubr.f32.mxu0 %v5437_v31  ;;  %v5055_v33 = vpack.c.bf16 %v1847_v19, %v1846_v28  ;;  %v5059_v31 = vpack.c.bf16 %v1849_v47, %v1848_v27  ;;  %v2036_v28 = vld [vmem:[#allocation8 + $0x230] sm:$0xff]  ;;  %v2037_v19 = vld [vmem:[#allocation8 + $0x238] sm:$0xff]  ;;  %v2039_v27 = vld [vmem:[#allocation8 + $0x248] sm:$0xff] }
 0x21e   :  { %4398 = vmatmul.mubr.f32.gmra.mrb[12].mxu1 %v6051_v53 }
 0x21f   :  { %5030 = vmatpush3.bf16.msra.mxu1 %v5027_v39  ;;  %4400 = vmatprep.mubr.f32.mxu1 %v6054_v8  ;;  %v6081_v39 = vld [vmem:[#allocation2 + $0x111] sm:$0xff] }
 0x220   :  { %5032 = vmatprep.subr.bf16.mxu1 %v5031_v30 }
 0x222   :  { %4401 = vmatmul.mubr.f32.gmra.mrb[14].mxu1 %v6057_v37 }
 0x223   :  { %5034 = vmatpush3.bf16.msra.mxu1 %v5031_v30  ;;  %4435 = vmatprep.mubr.f32.mxu1 %v1625_v35  ;;  %v6084_v30 = vld [vmem:[#allocation2 + $0x129] sm:$0xff]  ;;  %v1851_v35 = vld [vmem:[#allocation8 + $0x1f8] sm:$0xff] }
 0x224   :  { %5036 = vmatprep.subr.bf16.mxu1 %v5035_v36  ;;  %v5063_v40 = vpack.c.bf16 %v1851_v35, %v1850_v61  ;;  %v2040_v61 = vld [vmem:[#allocation8 + $0x250] sm:$0xff]  ;;  %v2041_v35 = vld [vmem:[#allocation8 + $0x258] sm:$0xff] }
 0x226   :  { %4436 = vmatmul.mubr.f32.vlgmr.msra.gmra.mrb[0].mxu1 %v6060_v16 }
 0x227   :  { %5038 = vmatpush3.bf16.msra.mxu1 %v5035_v36  ;;  %4438 = vmatprep.mubr.f32.mxu1 %v6063_v46  ;;  %v6090_v36 = vld [vmem:[#allocation2 + $0x159] sm:$0xff] }
 0x228   :  { %5040 = vmatprep.subr.bf16.mxu1 %v5039_v6 }
 0x22a   :  { %4439 = vmatmul.mubr.f32.gmra.mrb[2].mxu1 %v6066_v57 }
 0x22b   :  { %5042 = vmatpush3.bf16.msra.mxu1 %v5039_v6  ;;  %4441 = vmatprep.mubr.f32.mxu1 %v6069_v2  ;;  %v2030_v6 = vld [vmem:[#allocation8 + $0x200] sm:$0xff] }
 0x22c   :  { %5044 = vmatprep.subr.bf16.mxu1 %v5043_v52 }
 0x22e   :  { %4442 = vmatmul.mubr.f32.gmra.mrb[4].mxu1 %v6072_v29 }
 0x22f   :  { %5046 = vmatpush3.bf16.msra.mxu1 %v5043_v52  ;;  %4444 = vmatprep.mubr.f32.mxu1 %v6075_v12  ;;  %v5067_v52 = vpack.c.bf16 %v2031_v50, %v2030_v6  ;;  %v2042_v6 = vld [vmem:[#allocation8 + $0x260] sm:$0xff]  ;;  %v2043_v50 = vld [vmem:[#allocation8 + $0x268] sm:$0xff] }
 0x230   :  { %5048 = vmatprep.subr.bf16.mxu1 %v5047_v3 }
 0x232   :  { %4445 = vmatmul.mubr.f32.gmra.mrb[6].mxu1 %v6078_v18 }
 0x233   :  { %5050 = vmatpush3.bf16.msra.mxu1 %v5047_v3  ;;  %4447 = vmatprep.mubr.f32.mxu1 %v1633_v13  ;;  %v2033_v3 = vld [vmem:[#allocation8 + $0x218] sm:$0xff]  ;;  %v2035_v13 = vld [vmem:[#allocation8 + $0x228] sm:$0xff] }
 0x234   :  { %5052 = vmatprep.subr.bf16.mxu1 %v5051_v17  ;;  %v5071_v9 = vpack.c.bf16 %v2033_v3, %v2032_v14  ;;  %v2044_v14 = vld [vmem:[#allocation8 + $0x270] sm:$0xff]  ;;  %v2045_v3 = vld [vmem:[#allocation8 + $0x278] sm:$0xff] }
 0x236   :  { %4448 = vmatmul.mubr.f32.gmra.mrb[8].mxu1 %v6081_v39 }
 0x237   :  { %5054 = vmatpush3.bf16.msra.mxu1 %v5051_v17  ;;  %4450 = vmatprep.mubr.f32.mxu1 %v6084_v30  ;;  %v5075_v17 = vpack.c.bf16 %v2035_v13, %v2034_v10  ;;  %v2225_v10 = vld [vmem:[#allocation8 + $0x288] sm:$0xff] }
 0x238   :  { %5056 = vmatprep.subr.bf16.mxu1 %v5055_v33 }
 0x23a   :  { %4451 = vmatmul.mubr.f32.gmra.mrb[10].mxu1 %v6087_v63 }
 0x23b   :  { %5058 = vmatpush3.bf16.msra.mxu1 %v5055_v33  ;;  %4453 = vmatprep.mubr.f32.mxu1 %v6090_v36  ;;  %v2038_v33 = vld [vmem:[#allocation8 + $0x240] sm:$0xff] }
 0x23c   :  { %5060 = vmatprep.subr.bf16.mxu1 %v5059_v31  ;;  %v5083_v47 = vpack.c.bf16 %v2039_v27, %v2038_v33  ;;  %v2228_v33 = vld [vmem:[#allocation8 + $0x2a0] sm:$0xff]  ;;  %v2229_v27 = vld [vmem:[#allocation8 + $0x2a8] sm:$0xff] }
 0x23e   :  { %4454 = vmatmul.mubr.f32.gmra.mrb[12].mxu1 %v6093_v41 }
 0x23f   :  { %5062 = vmatpush3.bf16.msra.mxu1 %v5059_v31  ;;  %4456 = vmatprep.mubr.f32.mxu1 %v6096_v51  ;;  %v6109_v31 = vld [vmem:[#allocation2 + $0xc7] sm:$0xff] }
 0x240   :  { %5064 = vmatprep.subr.bf16.mxu1 %v5063_v40 }
 0x242   :  { %4457 = vmatmul.mubr.f32.gmra.mrb[14].mxu1 %v6099_v59 }
 0x243   :  { %5066 = vmatpush3.bf16.msra.mxu1 %v5063_v40  ;;  %4491 = vmatprep.mubr.f32.mxu1 %v5995_v54  ;;  %v5079_v54 = vpack.c.bf16 %v2037_v19, %v2036_v28  ;;  %v5087_v40 = vpack.c.bf16 %v2041_v35, %v2040_v61  ;;  %v2226_v28 = vld [vmem:[#allocation8 + $0x290] sm:$0xff]  ;;  %v2227_v19 = vld [vmem:[#allocation8 + $0x298] sm:$0xff] }
 0x244   :  { %5068 = vmatprep.subr.bf16.mxu1 %v5067_v52  ;;  %v2230_v61 = vld [vmem:[#allocation8 + $0x2b0] sm:$0xff]  ;;  %v2231_v35 = vld [vmem:[#allocation8 + $0x2b8] sm:$0xff] }
 0x246   :  { %4492 = vmatmul.mubr.f32.vlgmr.msra.gmra.mrb[0].mxu1 %v5997_v56 }
 0x247   :  { %5070 = vmatpush3.bf16.msra.mxu1 %v5067_v52  ;;  %4494 = vmatprep.mubr.f32.mxu1 %v6012_v1  ;;  %v5091_v52 = vpack.c.bf16 %v2043_v50, %v2042_v6  ;;  %v2233_v6 = vld [vmem:[#allocation8 + $0x2c8] sm:$0xff] }
 0x248   :  { %5072 = vmatprep.subr.bf16.mxu1 %v5071_v9 }
 0x24a   :  { %4495 = vmatmul.mubr.f32.gmra.mrb[2].mxu1 %v6015_v4 }
 0x24b   :  { %5074 = vmatpush3.bf16.msra.mxu1 %v5071_v9  ;;  %4497 = vmatprep.mubr.f32.mxu1 %v6023_v7  ;;  %v2224_v9 = vld [vmem:[#allocation8 + $0x280] sm:$0xff] }
 0x24c   :  { %5076 = vmatprep.subr.bf16.mxu1 %v5075_v17  ;;  %v5099_v13 = vpack.c.bf16 %v2225_v10, %v2224_v9  ;;  %v2237_v9 = vld [vmem:[#allocation8 + $0x2e8] sm:$0xff] }
 0x24e   :  { %4498 = vmatmul.mubr.f32.gmra.mrb[4].mxu1 %v6026_v11 }
 0x24f   :  { %5078 = vmatpush3.bf16.msra.mxu1 %v5075_v17  ;;  %4500 = vmatprep.mubr.f32.mxu1 %v6031_v15  ;;  %v6119_v17 = vld [vmem:[#allocation2 + $0x1b7] sm:$0xff] }
 0x250   :  { %5080 = vmatprep.subr.bf16.mxu1 %v5079_v54 }
 0x252   :  { %4501 = vmatmul.mubr.f32.gmra.mrb[6].mxu1 %v6109_v31 }
 0x253   :  { %5082 = vmatpush3.bf16.msra.mxu1 %v5079_v54  ;;  %4503 = vmatprep.mubr.f32.mxu1 %v6036_v26  ;;  %v5095_v26 = vpack.c.bf16 %v2045_v3, %v2044_v14  ;;  %v5103_v54 = vpack.c.bf16 %v2227_v19, %v2226_v28  ;;  %v2235_v14 = vld [vmem:[#allocation8 + $0x2d8] sm:$0xff]  ;;  %v2419_v19 = vld [vmem:[#allocation8 + $0x300] sm:$0xff] }
 0x254   :  { %5084 = vmatprep.subr.bf16.mxu1 %v5083_v47  ;;  %v2239_v28 = vld [vmem:[#allocation8 + $0x2f8] sm:$0xff] }
 0x256   :  { %4504 = vmatmul.mubr.f32.gmra.mrb[8].mxu1 %v6039_v32 }
 0x257   :  { %5086 = vmatpush3.bf16.msra.mxu1 %v5083_v47  ;;  %4506 = vmatprep.mubr.f32.mxu1 %v6044_v25  ;;  %v5107_v47 = vpack.c.bf16 %v2229_v27, %v2228_v33  ;;  %v2421_v27 = vld [vmem:[#allocation8 + $0x310] sm:$0xff] }
 0x258   :  { %5088 = vmatprep.subr.bf16.mxu1 %v5087_v40 }
 0x25a   :  { %4507 = vmatmul.mubr.f32.gmra.mrb[10].mxu1 %v6047_v55 }
 0x25b   :  { %5090 = vmatpush3.bf16.msra.mxu1 %v5087_v40  ;;  %4509 = vmatprep.mubr.f32.mxu1 %v6051_v53  ;;  %v2232_v40 = vld [vmem:[#allocation8 + $0x2c0] sm:$0xff] }
 0x25c   :  { %5092 = vmatprep.subr.bf16.mxu1 %v5091_v52  ;;  %v5115_v50 = vpack.c.bf16 %v2233_v6, %v2232_v40  ;;  %v3117_v6 = vld [vmem:[#allocation11 + $0x18] sm:$0xff] }
 0x25e   :  { %4510 = vmatmul.mubr.f32.gmra.mrb[12].mxu1 %v6054_v8 }
 0x25f   :  { %5094 = vmatpush3.bf16.msra.mxu1 %v5091_v52  ;;  %4512 = vmatprep.mubr.f32.mxu1 %v6057_v37  ;;  %v2234_v52 = vld [vmem:[#allocation8 + $0x2d0] sm:$0xff] }
 0x260   :  { %5096 = vmatprep.subr.bf16.mxu1 %v5095_v26  ;;  %v5119_v3 = vpack.c.bf16 %v2235_v14, %v2234_v52  ;;  %v2423_v52 = vld [vmem:[#allocation8 + $0x320] sm:$0xff] }
 0x262   :  { %4513 = vmatmul.mubr.f32.gmra.mrb[14].mxu1 %v6119_v17 }
 0x263   :  { %5098 = vmatpush3.bf16.msra.mxu1 %v5095_v26  ;;  %4547 = vmatprep.mubr.f32.mxu1 %v5926_v20  ;;  %v5111_v20 = vpack.c.bf16 %v2231_v35, %v2230_v61  ;;  %v2236_v26 = vld [vmem:[#allocation8 + $0x2e0] sm:$0xff]  ;;  %v3115_v35 = vld [vmem:[#allocation11 + $0x8] sm:$0xff] }
 0x264   :  { %5100 = vmatprep.subr.bf16.mxu1 %v5099_v13  ;;  %v5123_v10 = vpack.c.bf16 %v2237_v9, %v2236_v26  ;;  %v3114_v61 = vld [vmem:[#allocation11] sm:$0xff]  ;;  %v3119_v9 = vld [vmem:[#allocation11 + $0x28] sm:$0xff] }
 0x265   :  { %v5227_v40 = vpack.c.bf16 %v3115_v35, %v3114_v61  ;;  %v3118_v26 = vld [vmem:[#allocation11 + $0x20] sm:$0xff]  ;;  %v3123_v35 = vld [vmem:[#allocation11 + $0x48] sm:$0xff] }
 0x266   :  { %4548 = vmatmul.mubr.f32.vlgmr.msra.gmra.mrb[0].mxu1 %v5928_v38  ;;  %v3122_v61 = vld [vmem:[#allocation11 + $0x40] sm:$0xff] }
 0x267   :  { %5102 = vmatpush3.bf16.msra.mxu1 %v5099_v13  ;;  %4550 = vmatprep.mubr.f32.mxu1 %v5930_v21  ;;  %v2238_v13 = vld [vmem:[#allocation8 + $0x2f0] sm:$0xff] }
 0x268   :  { %5104 = vmatprep.subr.bf16.mxu1 %v5103_v54  ;;  %5228 = vmatprep.subr.bf16.mxu0 %v5227_v40 }
 0x269   :  { %5230 = vmatpush3.bf16.msra.mxu0 %v5227_v40 }
 0x26a   :  { %4551 = vmatmul.mubr.f32.gmra.mrb[2].mxu1 %v5932_v22 }
 0x26b   :  { %5106 = vmatpush3.bf16.msra.mxu1 %v5103_v54  ;;  %4553 = vmatprep.mubr.f32.mxu1 %v5934_v23  ;;  %v2420_v54 = vld [vmem:[#allocation8 + $0x308] sm:$0xff] }
 0x26c   :  { %5108 = vmatprep.subr.bf16.mxu1 %v5107_v47  ;;  %v5131_v33 = vpack.c.bf16 %v2420_v54, %v2419_v19  ;;  %v3121_v19 = vld [vmem:[#allocation11 + $0x38] sm:$0xff] }
 0x26e   :  { %4554 = vmatmul.mubr.f32.gmra.mrb[4].mxu1 %v5936_v24 }
 0x26f   :  { %5110 = vmatpush3.bf16.msra.mxu1 %v5107_v47  ;;  %4556 = vmatprep.mubr.f32.mxu1 %v5956_v0  ;;  %v2422_v47 = vld [vmem:[#allocation8 + $0x318] sm:$0xff] }
 0x270   :  { %5112 = vmatprep.subr.bf16.mxu1 %v5111_v20 }
 0x272   :  { %4557 = vmatmul.mubr.f32.gmra.mrb[6].mxu1 %v6001_v58 }
 0x273   :  { %5114 = vmatpush3.bf16.msra.mxu1 %v5111_v20  ;;  %4559 = vmatprep.mubr.f32.mxu1 %v5958_v34  ;;  %v5127_v34 = vpack.c.bf16 %v2239_v28, %v2238_v13  ;;  %v3116_v20 = vld [vmem:[#allocation11 + $0x10] sm:$0xff]  ;;  %v2426_v28 = vld [vmem:[#allocation8 + $0x338] sm:$0xff] }
 0x274   :  { %5116 = vmatprep.subr.bf16.mxu1 %v5115_v50  ;;  %v5231_v14 = vpack.c.bf16 %v3117_v6, %v3116_v20  ;;  %v2425_v13 = vld [vmem:[#allocation8 + $0x330] sm:$0xff] }
 0x275   :  { %v5143_v54 = vpack.c.bf16 %v2426_v28, %v2425_v13  ;;  %v6145_v20 = vld [vmem:[#allocation2 + $0xc9] sm:$0xff] }
 0x276   :  { %4560 = vmatmul.mubr.f32.gmra.mrb[8].mxu1 %v5975_v42  ;;  %5232 = vmatprep.subr.bf16.mxu0 %v5231_v14  ;;  %v2429_v6 = vld [vmem:[#allocation8 + $0x350] sm:$0xff]  ;;  %v2432_v13 = vld [vmem:[#allocation8 + $0x368] sm:$0xff] }
 0x277   :  { %5118 = vmatpush3.bf16.msra.mxu1 %v5115_v50  ;;  %4562 = vmatprep.mubr.f32.mxu1 %v5977_v43  ;;  %v5135_v50 = vpack.c.bf16 %v2422_v47, %v2421_v27  ;;  %v2427_v27 = vld [vmem:[#allocation8 + $0x340] sm:$0xff]  ;;  %v2428_v47 = vld [vmem:[#allocation8 + $0x348] sm:$0xff] }
 0x278   :  { %5120 = vmatprep.subr.bf16.mxu1 %v5119_v3  ;;  %5234 = vmatpush3.bf16.msra.mxu0 %v5231_v14  ;;  %v5147_v40 = vpack.c.bf16 %v2428_v47, %v2427_v27  ;;  %v3124_v14 = vld [vmem:[#allocation11 + $0x50] sm:$0xff]  ;;  %v3127_v28 = vld [vmem:[#allocation11 + $0x68] sm:$0xff] }
 0x279   :  { %v3128_v27 = vld [vmem:[#allocation11 + $0x70] sm:$0xff] }
 0x27a   :  { %4563 = vmatmul.mubr.f32.gmra.mrb[10].mxu1 %v5979_v44 }
 0x27b   :  { %5122 = vmatpush3.bf16.msra.mxu1 %v5119_v3  ;;  %4565 = vmatprep.mubr.f32.mxu1 %v5981_v45  ;;  %v2424_v3 = vld [vmem:[#allocation8 + $0x328] sm:$0xff] }
 0x27c   :  { %5124 = vmatprep.subr.bf16.mxu1 %v5123_v10 }
 0x27e   :  { %4566 = vmatmul.mubr.f32.gmra.mrb[12].mxu1 %v5984_v48 }
 0x27f   :  { %5126 = vmatpush3.bf16.msra.mxu1 %v5123_v10  ;;  %4568 = vmatprep.mubr.f32.mxu1 %v5986_v49  ;;  %v5139_v10 = vpack.c.bf16 %v2424_v3, %v2423_v52  ;;  %v2430_v52 = vld [vmem:[#allocation8 + $0x358] sm:$0xff] }
 0x280   :  { %5128 = vmatprep.subr.bf16.mxu1 %v5127_v34  ;;  %v3125_v3 = vld [vmem:[#allocation11 + $0x58] sm:$0xff] }
 0x282   :  { %4569 = vmatmul.mubr.f32.gmra.mrb[14].mxu1 %v6010_v62 }
 0x283   :  { %5130 = vmatpush3.bf16.msra.mxu1 %v5127_v34  ;;  %4603 = vmatprep.mubr.f32.mxu1 %v6060_v16  ;;  %v5235_v16 = vpack.c.bf16 %v3119_v9, %v3118_v26  ;;  %v3120_v34 = vld [vmem:[#allocation11 + $0x30] sm:$0xff]  ;;  %v5151_v26 = vpack.c.bf16 %v2430_v52, %v2429_v6  ;;  %v2431_v9 = vld [vmem:[#allocation8 + $0x360] sm:$0xff] }
 0x284   :  { %5132 = vmatprep.subr.bf16.mxu1 %v5131_v33  ;;  %v2615_v52 = vld [vmem:[#allocation8 + $0x390] sm:$0xff] }
 0x285   :  { %5236 = vmatprep.subr.bf16.mxu0 %v5235_v16 }
 0x286   :  { %4604 = vmatmul.mubr.f32.vlgmr.msra.gmra.mrb[0].mxu1 %v6063_v46  ;;  %5238 = vmatpush3.bf16.msra.mxu0 %v5235_v16  ;;  %v3126_v16 = vld [vmem:[#allocation11 + $0x60] sm:$0xff] }
 0x287   :  { %5134 = vmatpush3.bf16.msra.mxu1 %v5131_v33  ;;  %4606 = vmatprep.mubr.f32.mxu1 %v6066_v57  ;;  %v5239_v33 = vpack.c.bf16 %v3121_v19, %v3120_v34  ;;  %v5155_v34 = vpack.c.bf16 %v2432_v13, %v2431_v9  ;;  %v2433_v19 = vld [vmem:[#allocation8 + $0x370] sm:$0xff]  ;;  %v2618_v9 = vld [vmem:[#allocation8 + $0x3a8] sm:$0xff] }
 0x288   :  { %5136 = vmatprep.subr.bf16.mxu1 %v5135_v50  ;;  %v5439_v13 = vld [vmem:[#allocation3 + $0x10] sm:$0xff] }
 0x289   :  { %5240 = vmatprep.subr.bf16.mxu0 %v5239_v33 }
 0x28a   :  { %4607 = vmatmul.mubr.f32.gmra.mrb[2].mxu1 %v6069_v2  ;;  %5242 = vmatpush3.bf16.msra.mxu0 %v5239_v33  ;;  %v3129_v33 = vld [vmem:[#allocation11 + $0x78] sm:$0xff] }
 0x28b   :  { %5138 = vmatpush3.bf16.msra.mxu1 %v5135_v50  ;;  %4609 = vmatprep.mubr.f32.mxu1 %v6072_v29  ;;  %v5243_v50 = vpack.c.bf16 %v3123_v35, %v3122_v61  ;;  %v5255_v61 = vpack.c.bf16 %v3129_v33, %v3128_v27  ;;  %v2613_v35 = vld [vmem:[#allocation8 + $0x380] sm:$0xff]  ;;  %v5442_v27 = vld [vmem:[#allocation3 + $0x28] sm:$0xff] }
 0x28c   :  { %5140 = vmatprep.subr.bf16.mxu1 %v5139_v10  ;;  %v2409_v33 = vld [vmem:[#allocation2 + $0xdf] sm:$0xff] }
 0x28d   :  { %5244 = vmatprep.subr.bf16.mxu0 %v5243_v50 }
 0x28e   :  { %4610 = vmatmul.mubr.f32.gmra.mrb[4].mxu1 %v6075_v12  ;;  %5246 = vmatpush3.bf16.msra.mxu0 %v5243_v50  ;;  %v6155_v50 = vld [vmem:[#allocation2 + $0x1b9] sm:$0xff] }
 0x28f   :  { %5142 = vmatpush3.bf16.msra.mxu1 %v5139_v10  ;;  %4612 = vmatprep.mubr.f32.mxu1 %v6078_v18  ;;  %v5247_v10 = vpack.c.bf16 %v3125_v3, %v3124_v14  ;;  %v2616_v14 = vld [vmem:[#allocation8 + $0x398] sm:$0xff] }
 0x290   :  { %5144 = vmatprep.subr.bf16.mxu1 %v5143_v54  ;;  %v5167_v3 = vpack.c.bf16 %v2616_v14, %v2615_v52  ;;  %v5446_v52 = vld [vmem:[#allocation3 + $0x48] sm:$0xff] }
 0x291   :  { %5248 = vmatprep.subr.bf16.mxu0 %v5247_v10 }
 0x292   :  { %4613 = vmatmul.mubr.f32.gmra.mrb[6].mxu1 %v6145_v20  ;;  %5250 = vmatpush3.bf16.msra.mxu0 %v5247_v10  ;;  %v5438_v10 = vld [vmem:[#allocation3 + $0x8] sm:$0xff] }
 0x293   :  { %5146 = vmatpush3.bf16.msra.mxu1 %v5143_v54  ;;  %4615 = vmatprep.mubr.f32.mxu1 %v6081_v39  ;;  %v5251_v54 = vpack.c.bf16 %v3127_v28, %v3126_v16  ;;  %v2434_v39 = vld [vmem:[#allocation8 + $0x378] sm:$0xff]  ;;  %v2619_v28 = vld [vmem:[#allocation8 + $0x3b0] sm:$0xff] }
 0x294   :  { %5148 = vmatprep.subr.bf16.mxu1 %v5147_v40  ;;  %v5159_v47 = vpack.c.bf16 %v2434_v39, %v2433_v19  ;;  %v5440_v19 = vld [vmem:[#allocation3 + $0x18] sm:$0xff]  ;;  %v2622_v39 = vld [vmem:[#allocation8 + $0x3c8] sm:$0xff] }
 0x295   :  { %5252 = vmatprep.subr.bf16.mxu0 %v5251_v54 }
 0x296   :  { %4616 = vmatmul.mubr.f32.gmra.mrb[8].mxu1 %v6084_v30  ;;  %5254 = vmatpush3.bf16.msra.mxu0 %v5251_v54  ;;  %v2621_v54 = vld [vmem:[#allocation8 + $0x3c0] sm:$0xff] }
 0x297   :  { %5150 = vmatpush3.bf16.msra.mxu1 %v5147_v40  ;;  %4618 = vmatprep.mubr.f32.mxu1 %v6087_v63  ;;  %v2614_v40 = vld [vmem:[#allocation8 + $0x388] sm:$0xff] }
 0x298   :  { %5152 = vmatprep.subr.bf16.mxu1 %v5151_v26  ;;  %v5163_v6 = vpack.c.bf16 %v2614_v40, %v2613_v35  ;;  %5256 = vmatprep.subr.bf16.mxu0 %v5255_v61  ;;  %v5444_v35 = vld [vmem:[#allocation3 + $0x38] sm:$0xff]  ;;  %v2625_v40 = vld [vmem:[#allocation8 + $0x3e0] sm:$0xff] }
 0x29a   :  { %4619 = vmatmul.mubr.f32.gmra.mrb[10].mxu1 %v6090_v36  ;;  %5258 = vmatpush3.bf16.msra.mxu0 %v5255_v61  ;;  %v2624_v61 = vld [vmem:[#allocation8 + $0x3d8] sm:$0xff] }
 0x29b   :  { %5154 = vmatpush3.bf16.msra.mxu1 %v5151_v26  ;;  %4621 = vmatprep.mubr.f32.mxu1 %v6093_v41  ;;  %v2617_v26 = vld [vmem:[#allocation8 + $0x3a0] sm:$0xff] }
 0x29c   :  { %5156 = vmatprep.subr.bf16.mxu1 %v5155_v34  ;;  %v5171_v16 = vpack.c.bf16 %v2618_v9, %v2617_v26  ;;  %v2628_v26 = vld [vmem:[#allocation8 + $0x3f8] sm:$0xff] }
 0x29d   :  { %4828 = vmatmul.mubr.f32.vlgmr.msra.gmra.mrb[80].mxu0 %v5438_v10  ;;  %v5448_v9 = vld [vmem:[#allocation3 + $0x58] sm:$0xff]  ;;  %v2807_v10 = vld [vmem:[#allocation8 + $0x400] sm:$0xff] }
 0x29e   :  { %4622 = vmatmul.mubr.f32.gmra.mrb[12].mxu1 %v6096_v51  ;;  %4830 = vmatprep.mubr.f32.mxu0 %v5439_v13  ;;  %v2808_v13 = vld [vmem:[#allocation8 + $0x408] sm:$0xff] }
 0x29f   :  { %5158 = vmatpush3.bf16.msra.mxu1 %v5155_v34  ;;  %4624 = vmatprep.mubr.f32.mxu1 %v6099_v59  ;;  %v2620_v34 = vld [vmem:[#allocation8 + $0x3b8] sm:$0xff] }
 0x2a0   :  { %5160 = vmatprep.subr.bf16.mxu1 %v5159_v47 }
 0x2a1   :  { %4831 = vmatmul.mubr.f32.gmra.mrb[82].mxu0 %v5440_v19  ;;  %v2810_v19 = vld [vmem:[#allocation8 + $0x418] sm:$0xff] }
 0x2a2   :  { %4625 = vmatmul.mubr.f32.gmra.mrb[14].mxu1 %v6155_v50 }
 0x2a3   :  { %5162 = vmatpush3.bf16.msra.mxu1 %v5159_v47  ;;  %4659 = vmatprep.mubr.f32.mxu1 %v5997_v56  ;;  %v5441_v56 = vld [vmem:[#allocation3 + $0x20] sm:$0xff]  ;;  %v2623_v47 = vld [vmem:[#allocation8 + $0x3d0] sm:$0xff] }
 0x2a4   :  { %5164 = vmatprep.subr.bf16.mxu1 %v5163_v6  ;;  %4833 = vmatprep.mubr.f32.mxu0 %v5441_v56  ;;  %v5452_v56 = vld [vmem:[#allocation3 + $0x78] sm:$0xff] }
 0x2a5   :  { %4834 = vmatmul.mubr.f32.gmra.mrb[84].mxu0 %v5442_v27  ;;  %v2815_v27 = vld [vmem:[#allocation8 + $0x440] sm:$0xff] }
 0x2a6   :  { %4660 = vmatmul.mubr.f32.vlgmr.msra.gmra.mrb[0].mxu1 %v6012_v1  ;;  %v5175_v1 = vpack.c.bf16 %v2620_v34, %v2619_v28  ;;  %v2417_v28 = vld [vmem:[#allocation2 + $0x1cf] sm:$0xff] }
 0x2a7   :  { %5166 = vmatpush3.bf16.msra.mxu1 %v5163_v6  ;;  %4662 = vmatprep.mubr.f32.mxu1 %v6015_v4  ;;  %v5443_v4 = vld [vmem:[#allocation3 + $0x30] sm:$0xff]  ;;  %v2626_v6 = vld [vmem:[#allocation8 + $0x3e8] sm:$0xff] }
 0x2a8   :  { %5168 = vmatprep.subr.bf16.mxu1 %v5167_v3  ;;  %4836 = vmatprep.mubr.f32.mxu0 %v5443_v4  ;;  %v5187_v14 = vpack.c.bf16 %v2626_v6, %v2625_v40  ;;  %v2809_v34 = vld [vmem:[#allocation8 + $0x410] sm:$0xff]  ;;  %v2816_v4 = vld [vmem:[#allocation8 + $0x448] sm:$0xff]  ;;  %v2822_v40 = vld [vmem:[#allocation8 + $0x478] sm:$0xff] }
 0x2a9   :  { %4837 = vmatmul.mubr.f32.gmra.mrb[86].mxu0 %v5444_v35 }
 0x2aa   :  { %4663 = vmatmul.mubr.f32.gmra.mrb[2].mxu1 %v6023_v7  ;;  %v5179_v7 = vpack.c.bf16 %v2622_v39, %v2621_v54  ;;  %v2813_v54 = vld [vmem:[#allocation8 + $0x430] sm:$0xff]  ;;  %v2814_v39 = vld [vmem:[#allocation8 + $0x438] sm:$0xff] }
 0x2ab   :  { %5170 = vmatpush3.bf16.msra.mxu1 %v5167_v3  ;;  %4665 = vmatprep.mubr.f32.mxu1 %v6026_v11  ;;  %v5445_v11 = vld [vmem:[#allocation3 + $0x40] sm:$0xff]  ;;  %v2627_v3 = vld [vmem:[#allocation8 + $0x3f0] sm:$0xff] }
 0x2ac   :  { %5172 = vmatprep.subr.bf16.mxu1 %v5171_v16  ;;  %4839 = vmatprep.mubr.f32.mxu0 %v5445_v11 }
 0x2ad   :  { %4840 = vmatmul.mubr.f32.gmra.mrb[88].mxu0 %v5446_v52 }
 0x2ae   :  { %4666 = vmatmul.mubr.f32.gmra.mrb[4].mxu1 %v6031_v15  ;;  %v5183_v15 = vpack.c.bf16 %v2624_v61, %v2623_v47  ;;  %v2820_v61 = vld [vmem:[#allocation8 + $0x468] sm:$0xff] }
 0x2af   :  { %5174 = vmatpush3.bf16.msra.mxu1 %v5171_v16  ;;  %4668 = vmatprep.mubr.f32.mxu1 %v6109_v31  ;;  %v5447_v31 = vld [vmem:[#allocation3 + $0x50] sm:$0xff]  ;;  %v5450_v16 = vld [vmem:[#allocation3 + $0x68] sm:$0xff] }
 0x2b0   :  { %5176 = vmatprep.subr.bf16.mxu1 %v5175_v1  ;;  %4842 = vmatprep.mubr.f32.mxu0 %v5447_v31 }
 0x2b1   :  { %4843 = vmatmul.mubr.f32.gmra.mrb[90].mxu0 %v5448_v9  ;;  %v3399_v9 = vld [vmem:[#allocation9 + $0x50] sm:$0xff] }
 0x2b2   :  { %4669 = vmatmul.mubr.f32.gmra.mrb[6].mxu1 %v2409_v33  ;;  %v2817_v33 = vld [vmem:[#allocation8 + $0x450] sm:$0xff] }
 0x2b3   :  { %5178 = vmatpush3.bf16.msra.mxu1 %v5175_v1  ;;  %4671 = vmatprep.mubr.f32.mxu1 %v6039_v32  ;;  %v5449_v32 = vld [vmem:[#allocation3 + $0x60] sm:$0xff] }
 0x2b4   :  { %5180 = vmatprep.subr.bf16.mxu1 %v5179_v7  ;;  %4845 = vmatprep.mubr.f32.mxu0 %v5449_v32  ;;  %v2811_v1 = vld [vmem:[#allocation8 + $0x420] sm:$0xff] }
 0x2b5   :  { %4846 = vmatmul.mubr.f32.gmra.mrb[92].mxu0 %v5450_v16  ;;  %v3402_v16 = vld [vmem:[#allocation9 + $0x68] sm:$0xff] }
 0x2b6   :  { %4672 = vmatmul.mubr.f32.gmra.mrb[8].mxu1 %v6044_v25  ;;  %v5191_v25 = vpack.c.bf16 %v2628_v26, %v2627_v3  ;;  %v3397_v3 = vld [vmem:[#allocation9 + $0x40] sm:$0xff]  ;;  %v3398_v26 = vld [vmem:[#allocation9 + $0x48] sm:$0xff] }
 0x2b7   :  { %5182 = vmatpush3.bf16.msra.mxu1 %v5179_v7  ;;  %4674 = vmatprep.mubr.f32.mxu1 %v6047_v55  ;;  %v5451_v55 = vld [vmem:[#allocation3 + $0x70] sm:$0xff]  ;;  %v2818_v7 = vld [vmem:[#allocation8 + $0x458] sm:$0xff]  ;;  %v5275_v32 = vpack.c.bf16 %v3398_v26, %v3397_v3 }
 0x2b8   :  { %5184 = vmatprep.subr.bf16.mxu1 %v5183_v15  ;;  %4848 = vmatprep.mubr.f32.mxu0 %v5451_v55 }
 0x2b9   :  { %4849 = vmatmul.mubr.f32.gmra.mrb[94].mxu0 %v5452_v56 }
 0x2ba   :  { %4675 = vmatmul.mubr.f32.gmra.mrb[10].mxu1 %v6051_v53  ;;  %v5195_v53 = vpack.c.bf16 %v2808_v13, %v2807_v10  ;;  %v3401_v13 = vld [vmem:[#allocation9 + $0x60] sm:$0xff] }
 0x2bb   :  { %5186 = vmatpush3.bf16.msra.mxu1 %v5183_v15  ;;  %4677 = vmatprep.mubr.f32.mxu1 %v6054_v8  ;;  %v5199_v8 = vpack.c.bf16 %v2810_v19, %v2809_v34  ;;  %v2821_v15 = vld [vmem:[#allocation8 + $0x470] sm:$0xff]  ;;  %v5283_v55 = vpack.c.bf16 %v3402_v16, %v3401_v13 }
 0x2bc   :  { %5188 = vmatprep.subr.bf16.mxu1 %v5187_v14 }
 0x2be   :  { %4678 = vmatmul.mubr.f32.gmra.mrb[12].mxu1 %v6057_v37  ;;  %v2812_v37 = vld [vmem:[#allocation8 + $0x428] sm:$0xff] }
 0x2bf   :  { %5190 = vmatpush3.bf16.msra.mxu1 %v5187_v14  ;;  %4680 = vmatprep.mubr.f32.mxu1 %v6119_v17  ;;  %v5203_v17 = vpack.c.bf16 %v2812_v37, %v2811_v1 }
 0x2c0   :  { %5192 = vmatprep.subr.bf16.mxu1 %v5191_v25 }
 0x2c2   :  { %4681 = vmatmul.mubr.f32.gmra.mrb[14].mxu1 %v2417_v28  ;;  %v3403_v28 = vld [vmem:[#allocation9 + $0x70] sm:$0xff] }
 0x2c3   :  { %5194 = vmatpush3.bf16.msra.mxu1 %v5191_v25  ;;  %4715 = vmatprep.mubr.f32.mxu1 %v5928_v38  ;;  %v5207_v38 = vpack.c.bf16 %v2814_v39, %v2813_v54  ;;  %v3400_v25 = vld [vmem:[#allocation9 + $0x58] sm:$0xff] }
 0x2c4   :  { %5196 = vmatprep.subr.bf16.mxu1 %v5195_v53  ;;  %v5279_v10 = vpack.c.bf16 %v3400_v25, %v3399_v9 }
 0x2c6   :  { %4716 = vmatmul.mubr.f32.vlgmr.msra.gmra.mrb[0].mxu1 %v5930_v21  ;;  %v5211_v21 = vpack.c.bf16 %v2816_v4, %v2815_v27 }
 0x2c7   :  { %5198 = vmatpush3.bf16.msra.mxu1 %v5195_v53  ;;  %4718 = vmatprep.mubr.f32.mxu1 %v5932_v22  ;;  %v3404_v53 = vld [vmem:[#allocation9 + $0x78] sm:$0xff] }
 0x2c8   :  { %5200 = vmatprep.subr.bf16.mxu1 %v5199_v8  ;;  %v5287_v34 = vpack.c.bf16 %v3404_v53, %v3403_v28 }
 0x2ca   :  { %4719 = vmatmul.mubr.f32.gmra.mrb[2].mxu1 %v5934_v23 }
 0x2cb   :  { %5202 = vmatpush3.bf16.msra.mxu1 %v5199_v8  ;;  %4721 = vmatprep.mubr.f32.mxu1 %v5936_v24  ;;  %v5215_v24 = vpack.c.bf16 %v2818_v7, %v2817_v33 }
 0x2cc   :  { %5204 = vmatprep.subr.bf16.mxu1 %v5203_v17 }
 0x2ce   :  { %4722 = vmatmul.mubr.f32.gmra.mrb[4].mxu1 %v5956_v0  ;;  %v2819_v0 = vld [vmem:[#allocation8 + $0x460] sm:$0xff] }
 0x2cf   :  { %5206 = vmatpush3.bf16.msra.mxu1 %v5203_v17  ;;  %4724 = vmatprep.mubr.f32.mxu1 %v6001_v58  ;;  %v5219_v35 = vpack.c.bf16 %v2820_v61, %v2819_v0 }
 0x2d0   :  { %5208 = vmatprep.subr.bf16.mxu1 %v5207_v38 }
 0x2d1   :  { %v6179_v22 = vpop.f32.mrb[64].mxu0 }
 0x2d2   :  { %4725 = vmatmul.mubr.f32.gmra.mrb[6].mxu1 %v6020_v5  ;;  %v6182_v23 = vpop.f32.mrb[65].mxu0 }
 0x2d3   :  { %5210 = vmatpush3.bf16.msra.mxu1 %v5207_v38  ;;  %4727 = vmatprep.mubr.f32.mxu1 %v5975_v42 }
 0x2d4   :  { %5212 = vmatprep.subr.bf16.mxu1 %v5211_v21 }
 0x2d5   :  { %v6185_v47 = vpop.f32.mrb[66].mxu0 }
 0x2d6   :  { %4728 = vmatmul.mubr.f32.gmra.mrb[8].mxu1 %v5977_v43  ;;  %v6188_v58 = vpop.f32.mrb[67].mxu0  ;;  %v5223_v43 = vpack.c.bf16 %v2822_v40, %v2821_v15 }
 0x2d7   :  { %5214 = vmatpush3.bf16.msra.mxu1 %v5211_v21  ;;  %4730 = vmatprep.mubr.f32.mxu1 %v5979_v44 }
 0x2d8   :  { %5216 = vmatprep.subr.bf16.mxu1 %v5215_v24 }
 0x2d9   :  { %v6191_v11 = vpop.f32.mrb[68].mxu0 }
 0x2da   :  { %4731 = vmatmul.mubr.f32.gmra.mrb[10].mxu1 %v5981_v45  ;;  %v6194_v42 = vpop.f32.mrb[69].mxu0 }
 0x2db   :  { %5218 = vmatpush3.bf16.msra.mxu1 %v5215_v24  ;;  %4733 = vmatprep.mubr.f32.mxu1 %v5984_v48 }
 0x2dc   :  { %5220 = vmatprep.subr.bf16.mxu1 %v5219_v35 }
 0x2dd   :  { %v6197_v6 = vpop.f32.mrb[70].mxu0 }
 0x2de   :  { %4734 = vmatmul.mubr.f32.gmra.mrb[12].mxu1 %v5986_v49  ;;  %v6200_v44 = vpop.f32.mrb[71].mxu0 }
 0x2df   :  { %5222 = vmatpush3.bf16.msra.mxu1 %v5219_v35  ;;  %4736 = vmatprep.mubr.f32.mxu1 %v6010_v62 }
 0x2e0   :  { %5224 = vmatprep.subr.bf16.mxu1 %v5223_v43 }
 0x2e1   :  { %v6203_v52 = vpop.f32.mrb[72].mxu0 }
 0x2e2   :  { %4737 = vmatmul.mubr.f32.gmra.mrb[14].mxu1 %v6020_v5  ;;  %v6206_v45 = vpop.f32.mrb[73].mxu0 }
 0x2e3   :  { %5226 = vmatpush3.bf16.msra.mxu1 %v5223_v43  ;;  %4771 = vmatprep.mubr.f32.mxu1 %v6063_v46 }
 0x2e5   :  { %v6209_v48 = vpop.f32.mrb[74].mxu0 }
 0x2e6   :  { %4772 = vmatmul.mubr.f32.vlgmr.msra.gmra.mrb[0].mxu1 %v6066_v57  ;;  %v6212_v49 = vpop.f32.mrb[75].mxu0  ;;  %v2797_v57 = vld [vmem:[#allocation2 + $0xe1] sm:$0xff] }
 0x2e7   :  { %4774 = vmatprep.mubr.f32.mxu1 %v6069_v2  ;;  %v2805_v2 = vld [vmem:[#allocation2 + $0x1d1] sm:$0xff] }
 0x2e9   :  { %v6215_v31 = vpop.f32.mrb[76].mxu0 }
 0x2ea   :  { %4775 = vmatmul.mubr.f32.gmra.mrb[2].mxu1 %v6072_v29  ;;  %v6218_v62 = vpop.f32.mrb[77].mxu0  ;;  %v3389_v29 = vld [vmem:[#allocation9] sm:$0xff] }
 0x2eb   :  { %4777 = vmatprep.mubr.f32.mxu1 %v6075_v12  ;;  %v3390_v12 = vld [vmem:[#allocation9 + $0x8] sm:$0xff] }
 0x2ed   :  { %v6221_v5 = vpop.f32.mrb[78].mxu0 }
 0x2ee   :  { %4778 = vmatmul.mubr.f32.gmra.mrb[4].mxu1 %v6078_v18  ;;  %v6224_v46 = vpop.f32.mrb[79].mxu0  ;;  %v5259_v18 = vpack.c.bf16 %v3390_v12, %v3389_v29 }
 0x2ef   :  { %4780 = vmatprep.mubr.f32.mxu1 %v6145_v20  ;;  %v3392_v20 = vld [vmem:[#allocation9 + $0x18] sm:$0xff] }
 0x2f0   :  { %5260 = vmatprep.subr.bf16.mxu0 %v5259_v18 }
 0x2f1   :  { %5262 = vmatpush3.bf16.msra.mxu0 %v5259_v18 }
 0x2f2   :  { %4781 = vmatmul.mubr.f32.gmra.mrb[6].mxu1 %v2797_v57 }
 0x2f3   :  { %4783 = vmatprep.mubr.f32.mxu1 %v6084_v30  ;;  %v3391_v30 = vld [vmem:[#allocation9 + $0x10] sm:$0xff] }
 0x2f6   :  { %4784 = vmatmul.mubr.f32.gmra.mrb[8].mxu1 %v6087_v63  ;;  %v5263_v63 = vpack.c.bf16 %v3392_v20, %v3391_v30 }
 0x2f7   :  { %4786 = vmatprep.mubr.f32.mxu1 %v6090_v36  ;;  %v3393_v36 = vld [vmem:[#allocation9 + $0x20] sm:$0xff] }
 0x2f8   :  { %5264 = vmatprep.subr.bf16.mxu0 %v5263_v63 }
 0x2f9   :  { %5266 = vmatpush3.bf16.msra.mxu0 %v5263_v63 }
 0x2fa   :  { %4787 = vmatmul.mubr.f32.gmra.mrb[10].mxu1 %v6093_v41  ;;  %v3394_v41 = vld [vmem:[#allocation9 + $0x28] sm:$0xff] }
 0x2fb   :  { %4789 = vmatprep.mubr.f32.mxu1 %v6096_v51  ;;  %v5267_v14 = vpack.c.bf16 %v3394_v41, %v3393_v36  ;;  %v3395_v51 = vld [vmem:[#allocation9 + $0x30] sm:$0xff] }
 0x2fd   :  { %5268 = vmatprep.subr.bf16.mxu0 %v5267_v14 }
 0x2fe   :  { %4790 = vmatmul.mubr.f32.gmra.mrb[12].mxu1 %v6099_v59  ;;  %5270 = vmatpush3.bf16.msra.mxu0 %v5267_v14  ;;  %v3396_v59 = vld [vmem:[#allocation9 + $0x38] sm:$0xff] }
 0x2ff   :  { %4792 = vmatprep.mubr.f32.mxu1 %v6155_v50  ;;  %v5271_v50 = vpack.c.bf16 %v3396_v59, %v3395_v51 }
 0x301   :  { %5272 = vmatprep.subr.bf16.mxu0 %v5271_v50 }
 0x302   :  { %4793 = vmatmul.mubr.f32.gmra.mrb[14].mxu1 %v2805_v2  ;;  %5274 = vmatpush3.bf16.msra.mxu0 %v5271_v50 }
 0x303   :  { %5276 = vmatprep.subr.bf16.mxu0 %v5275_v32 }
 0x306   :  { %5278 = vmatpush3.bf16.msra.mxu0 %v5275_v32 }
 0x307   :  { %5280 = vmatprep.subr.bf16.mxu0 %v5279_v10 }
 0x30a   :  { %5282 = vmatpush3.bf16.msra.mxu0 %v5279_v10 }
 0x30b   :  { %5284 = vmatprep.subr.bf16.mxu0 %v5283_v55 }
 0x30e   :  { %5286 = vmatpush3.bf16.msra.mxu0 %v5283_v55 }
 0x30f   :  { %5288 = vmatprep.subr.bf16.mxu0 %v5287_v34 }
 0x312   :  { %5290 = vmatpush3.bf16.msra.mxu0 %v5287_v34 }
 0x370   :  { %v6234_v19 = vpop.f32.mrb[80].mxu0 }
 0x371   :  { %v3297_v56 = vmul.f32 %v6234_v19, %v6234_v19  ;;  %v6238_v8 = vpop.f32.mrb[81].mxu0 }
 0x372   :  { %v3275_v1 = vadd.f32 %v6234_v19, %v6238_v8  ;;  %v3296_v37 = vmul.f32 %v6238_v8, %v6238_v8 }
 0x374   :  { %v6244_v17 = vpop.f32.mrb[82].mxu0  ;;  %v3312_v39 = vadd.f32 %v3297_v56, %v3296_v37 }
 0x375   :  { %v6246_v54 = vpop.f32.mrb[83].mxu0  ;;  %v3299_v38 = vmul.f32 %v6244_v17, %v6244_v17 }
 0x376   :  { %v3276_v27 = vadd.f32 %v3275_v1, %v6246_v54  ;;  %v3298_v4 = vmul.f32 %v6246_v54, %v6246_v54 }
 0x378   :  { %v6253_v21 = vpop.f32.mrb[84].mxu0  ;;  %v3313_v7 = vadd.f32 %v3312_v39, %v3298_v4  ;;  %v3277_v24 = vadd.f32 %v6244_v17, %v3276_v27 }
 0x379   :  { %v6255_v33 = vpop.f32.mrb[85].mxu0  ;;  %v3301_v15 = vmul.f32 %v6253_v21, %v6253_v21 }
 0x37a   :  { %v3300_v0 = vmul.f32 %v6255_v33, %v6255_v33  ;;  %v3278_v40 = vadd.f32 %v3277_v24, %v6255_v33  ;;  %v3314_v43 = vadd.f32 %v3313_v7, %v3299_v38 }
 0x37c   :  { %v6260_v61 = vpop.f32.mrb[86].mxu0  ;;  %v3315_v29 = vadd.f32 %v3314_v43, %v3300_v0  ;;  %v3279_v12 = vadd.f32 %v6253_v21, %v3278_v40 }
 0x37d   :  { %v6262_v35 = vpop.f32.mrb[87].mxu0  ;;  %v3303_v63 = vmul.f32 %v6260_v61, %v6260_v61 }
 0x37e   :  { %v3302_v18 = vmul.f32 %v6262_v35, %v6262_v35  ;;  %v3280_v36 = vadd.f32 %v3279_v12, %v6262_v35  ;;  %v3316_v41 = vadd.f32 %v3315_v29, %v3301_v15 }
 0x380   :  { %v6267_v57 = vpop.f32.mrb[88].mxu0  ;;  %v3317_v59 = vadd.f32 %v3316_v41, %v3302_v18  ;;  %v3281_v50 = vadd.f32 %v6260_v61, %v3280_v36 }
 0x381   :  { %v6269_v2 = vpop.f32.mrb[89].mxu0  ;;  %v3305_v32 = vmul.f32 %v6267_v57, %v6267_v57 }
 0x382   :  { %v3304_v3 = vmul.f32 %v6269_v2, %v6269_v2  ;;  %v3282_v25 = vadd.f32 %v3281_v50, %v6269_v2  ;;  %v3318_v10 = vadd.f32 %v3317_v59, %v3303_v63 }
 0x384   :  { %v6274_v30 = vpop.f32.mrb[90].mxu0  ;;  %v3319_v16 = vadd.f32 %v3318_v10, %v3304_v3  ;;  %v3283_v55 = vadd.f32 %v6267_v57, %v3282_v25 }
 0x385   :  { %v6276_v20 = vpop.f32.mrb[91].mxu0  ;;  %v3307_v1 = vmul.f32 %v6274_v30, %v6274_v30 }
 0x386   :  { %v3306_v28 = vmul.f32 %v6276_v20, %v6276_v20  ;;  %v3284_v37 = vadd.f32 %v3283_v55, %v6276_v20  ;;  %v3320_v39 = vadd.f32 %v3319_v16, %v3305_v32 }
 0x388   :  { %v6281_v14 = vpop.f32.mrb[92].mxu0  ;;  %v3321_v7 = vadd.f32 %v3320_v39, %v3306_v28 }
 0x389   :  { %v6283_v51 = vpop.f32.mrb[93].mxu0  ;;  %v3309_v18 = vmul.f32 %v6281_v14, %v6281_v14 }
 0x38a   :  { %v3322_v29 = vadd.f32 %v3321_v7, %v3307_v1 }
 0x38c   :  { %v6288_v26 = vpop.f32.mrb[94].mxu0 }
 0x38d   :  { %v6290_v9 = vpop.f32.mrb[95].mxu0  ;;  %v3311_v55 = vmul.f32 %v6288_v26, %v6288_v26 }
 0x38e   :  { %v3310_v32 = vmul.f32 %v6290_v9, %v6290_v9 }
 0x3b9   :  { %v4773_v13 = vpop.f32.mrb[0].mxu1 }
 0x3ba   :  { %v6299_v53 = vadd.f32 %v4773_v13, %v6179_v22  ;;  %v2889_v34 = vpop.f32.mrb[1].mxu1  ;;  %v3285_v22 = vadd.f32 %v6274_v30, %v3284_v37 }
 0x3bb   :  { %v6302_v56 = vadd.f32 %v2889_v34, %v6182_v23  ;;  %v3308_v23 = vmul.f32 %v6283_v51, %v6283_v51 }
 0x3bc   :  { %v3006_v38 = vmul.f32 %v6299_v53, %v6299_v53  ;;  %v3286_v43 = vadd.f32 %v3285_v22, %v6283_v51 }
 0x3bd   :  { %v3005_v27 = vmul.f32 %v6302_v56, %v6302_v56  ;;  %v4776_v4 = vpop.f32.mrb[2].mxu1  ;;  %v2984_v15 = vadd.f32 %v6302_v56, %v6299_v53  ;;  %v3323_v41 = vadd.f32 %v3322_v29, %v3308_v23 }
 0x3be   :  { %v6315_v24 = vadd.f32 %v4776_v4, %v6185_v47  ;;  %v2899_v0 = vpop.f32.mrb[3].mxu1  ;;  %v3287_v59 = vadd.f32 %v6281_v14, %v3286_v43 }
 0x3bf   :  { %v6320_v40 = vadd.f32 %v2899_v0, %v6188_v58  ;;  %v3021_v12 = vadd.f32 %v3006_v38, %v3005_v27  ;;  %v3324_v28 = vadd.f32 %v3323_v41, %v3309_v18 }
 0x3c0   :  { %v3008_v58 = vmul.f32 %v6315_v24, %v6315_v24  ;;  %v3288_v16 = vadd.f32 %v3287_v59, %v6290_v9 }
 0x3c1   :  { %v2985_v63 = vadd.f32 %v6320_v40, %v2984_v15  ;;  %v3007_v47 = vmul.f32 %v6320_v40, %v6320_v40  ;;  %v4779_v36 = vpop.f32.mrb[4].mxu1  ;;  %v3325_v4 = vadd.f32 %v3324_v28, %v3310_v32 }
 0x3c2   :  { %v6332_v50 = vadd.f32 %v4779_v36, %v6191_v11  ;;  %v2909_v3 = vpop.f32.mrb[5].mxu1  ;;  %v3289_v39 = vadd.f32 %v6288_v26, %v3288_v16 }
 0x3c3   :  { %v3022_v25 = vadd.f32 %v3021_v12, %v3007_v47  ;;  %v6337_v10 = vadd.f32 %v2909_v3, %v6194_v42  ;;  %v2986_v13 = vadd.f32 %v6315_v24, %v2985_v63  ;;  %v3326_v15 = vadd.f32 %v3325_v4, %v3311_v55 }
 0x3c4   :  { %v3010_v42 = vmul.f32 %v6332_v50, %v6332_v50  ;;  %v3290_v0 = vrot.slane %v3289_v39, 4 }
 0x3c5   :  { %v2987_v34 = vadd.f32 %v6337_v10, %v2986_v13  ;;  %v3009_v11 = vmul.f32 %v6337_v10, %v6337_v10  ;;  %v3023_v1 = vadd.f32 %v3022_v25, %v3008_v58  ;;  %v4782_v37 = vpop.f32.mrb[6].mxu1  ;;  %v3327_v36 = vrot.slane %v3326_v15, 4 }
 0x3c6   :  { %v6350_v38 = vadd.f32 %v4782_v37, %v6197_v6  ;;  %v2919_v27 = vpop.f32.mrb[7].mxu1  ;;  %v3291_v63 = vadd.f32 %v3290_v0, %v3289_v39 }
 0x3c7   :  { %v3024_v7 = vadd.f32 %v3023_v1, %v3009_v11  ;;  %v6353_v22 = vadd.f32 %v2919_v27, %v6200_v44  ;;  %v2988_v23 = vadd.f32 %v6332_v50, %v2987_v34  ;;  %v3328_v32 = vadd.f32 %v3327_v36, %v3326_v15 }
 0x3c8   :  { %v3012_v6 = vmul.f32 %v6350_v38, %v6350_v38  ;;  %v3292_v3 = vrot.slane %v3291_v63, 2 }
 0x3c9   :  { %v2989_v43 = vadd.f32 %v6353_v22, %v2988_v23  ;;  %v3011_v29 = vmul.f32 %v6353_v22, %v6353_v22  ;;  %v3025_v12 = vadd.f32 %v3024_v7, %v3010_v42  ;;  %v4785_v18 = vpop.f32.mrb[8].mxu1  ;;  %v3329_v11 = vrot.slane %v3328_v32, 2 }
 0x3ca   :  { %v6362_v47 = vadd.f32 %v4785_v18, %v6203_v52  ;;  %v2929_v44 = vpop.f32.mrb[9].mxu1  ;;  %v3293_v28 = vadd.f32 %v3292_v3, %v3291_v63 }
 0x3cb   :  { %v3026_v41 = vadd.f32 %v3025_v12, %v3011_v29  ;;  %v6365_v59 = vadd.f32 %v2929_v44, %v6206_v45  ;;  %v2990_v58 = vadd.f32 %v6350_v38, %v2989_v43  ;;  %v3330_v27 = vadd.f32 %v3329_v11, %v3328_v32 }
 0x3cc   :  { %v3014_v52 = vmul.f32 %v6362_v47, %v6362_v47  ;;  %v3294_v42 = vrot.slane %v3293_v28, 1 }
 0x3cd   :  { %v2991_v25 = vadd.f32 %v6365_v59, %v2990_v58  ;;  %v3013_v13 = vmul.f32 %v6365_v59, %v6365_v59  ;;  %v3027_v16 = vadd.f32 %v3026_v41, %v3012_v6  ;;  %v4788_v55 = vpop.f32.mrb[10].mxu1  ;;  %v3331_v29 = vrot.slane %v3330_v27, 1 }
 0x3ce   :  { %v6374_v34 = vadd.f32 %v4788_v55, %v6209_v48  ;;  %v2939_v45 = vpop.f32.mrb[11].mxu1  ;;  %v3295_v15 = vadd.f32 %v3294_v42, %v3293_v28 }
 0x3cf   :  { %v3028_v1 = vadd.f32 %v3027_v16, %v3013_v13  ;;  %v6377_v37 = vadd.f32 %v2939_v45, %v6212_v49  ;;  %v2992_v39 = vadd.f32 %v6362_v47, %v2991_v25  ;;  %v3332_v44 = vadd.f32 %v3331_v29, %v3330_v27 }
 0x3d0   :  { %v3016_v48 = vmul.f32 %v6374_v34, %v6374_v34  ;;  %v3333_v6 = vmul.f32 0.0078125, %v3295_v15 }
 0x3d1   :  { %v2993_v4 = vadd.f32 %v6377_v37, %v2992_v39  ;;  %v3015_v7 = vmul.f32 %v6377_v37, %v6377_v37  ;;  %v3029_v23 = vadd.f32 %v3028_v1, %v3014_v52  ;;  %v4791_v0 = vpop.f32.mrb[12].mxu1  ;;  %v3334_v13 = vmul.f32 0.0078125, %v3332_v44  ;;  %v3338_v44 = vld [vmem:[%s6636_s11] sm:$0x1] }
 0x3d2   :  { %v6386_v43 = vadd.f32 %v4791_v0, %v6215_v31  ;;  %v2949_v49 = vpop.f32.mrb[13].mxu1  ;;  %v3335_v32 = vmul.f32 %v3333_v6, %v3333_v6 }
 0x3d3   :  { %v3030_v12 = vadd.f32 %v3029_v23, %v3015_v7  ;;  %v6389_v18 = vadd.f32 %v2949_v49, %v6218_v62  ;;  %v2994_v63 = vadd.f32 %v6374_v34, %v2993_v4 }
 0x3d4   :  { %v3018_v62 = vmul.f32 %v6386_v43, %v6386_v43  ;;  %v3336_v52 = vsub.f32 %v3334_v13, %v3335_v32  ;;  %v3342_v13 = vld [vmem:[%s6637_s12] sm:$0x1] }
 0x3d5   :  { %v2995_v36 = vadd.f32 %v6389_v18, %v2994_v63  ;;  %v3017_v41 = vmul.f32 %v6389_v18, %v6389_v18  ;;  %v3031_v58 = vadd.f32 %v3030_v12, %v3016_v48  ;;  %v4794_v3 = vpop.f32.mrb[14].mxu1 }
 0x3d6   :  { %v6396_v31 = vadd.f32 %v4794_v3, %v6221_v5  ;;  %v2959_v25 = vpop.f32.mrb[15].mxu1  ;;  %v3337_v39 = vmax.f32 %v3336_v52, 0.0 }
 0x3d7   :  { %v3032_v16 = vadd.f32 %v3031_v58, %v3017_v41  ;;  %v5306_v55 = vadd.f32 %v2959_v25, %v6224_v46  ;;  %v2996_v28 = vadd.f32 %v6386_v43, %v2995_v36 }
 0x3d8   :  { %v3020_v42 = vmul.f32 %v6396_v31, %v6396_v31  ;;  %v3339_v4 = vadd.f32 1e-05, %v3337_v39 }
 0x3d9   :  { %v2997_v45 = vadd.f32 %v5306_v55, %v2996_v28  ;;  %v3019_v11 = vmul.f32 %v5306_v55, %v5306_v55  ;;  %v3033_v1 = vadd.f32 %v3032_v16, %v3018_v62 }
 0x3da   :  { %5430 = vrsqrt.f32 %v3339_v4 }
 0x3db   :  { %v2998_v5 = vadd.f32 %v6396_v31, %v2997_v45  ;;  %v3034_v27 = vadd.f32 %v3033_v1, %v3019_v11 }
 0x3dd   :  { %v2999_v7 = vrot.slane %v2998_v5, 4  ;;  %v3035_v23 = vadd.f32 %v3034_v27, %v3020_v42 }
 0x3df   :  { %v3000_v0 = vadd.f32 %v2999_v7, %v2998_v5  ;;  %v3036_v15 = vrot.slane %v3035_v23, 4 }
 0x3e1   :  { %v3001_v46 = vrot.slane %v3000_v0, 2  ;;  %v3037_v48 = vadd.f32 %v3036_v15, %v3035_v23  ;;  %v3051_v23 = vld [vmem:[%s6631_s6] sm:$0x1] }
 0x3e3   :  { %v3002_v49 = vadd.f32 %v3001_v46, %v3000_v0  ;;  %v3038_v29 = vrot.slane %v3037_v48, 2 }
 0x3e4   :  { %v5431_v58 = vpop.eup %5430 }
 0x3e5   :  { %v3003_v12 = vrot.slane %v3002_v49, 1  ;;  %v3039_v63 = vadd.f32 %v3038_v29, %v3037_v48  ;;  %v3341_v25 = vmul.f32 %v5431_v58, %v3338_v44 }
 0x3e7   :  { %v3004_v36 = vadd.f32 %v3003_v12, %v3002_v49  ;;  %v3040_v41 = vrot.slane %v3039_v63, 1  ;;  %v3343_v28 = vmul.f32 %v3341_v25, %v3333_v6  ;;  %v6412_v52 = vrot.slane %v3341_v25, %v5893_v60  ;;  %v3047_v6 = vld [vmem:[%s6630_s5] sm:$0x1] }
 0x3e9   :  { %v3041_v3 = vadd.f32 %v3040_v41, %v3039_v63  ;;  %v3042_v32 = vmul.f32 0.0078125, %v3004_v36  ;;  %v3344_v11 = vsub.f32 %v3342_v13, %v3343_v28  ;;  %v3365_v1 = vmul.f32 %v6412_v52, %v6290_v9 }
 0x3eb   :  { %v3043_v62 = vmul.f32 0.0078125, %v3041_v3  ;;  %v3044_v16 = vmul.f32 %v3042_v32, %v3042_v32  ;;  %v6417_v42 = vrot.slane %v3344_v11, %v5893_v60 }
 0x3ed   :  { %v3045_v45 = vsub.f32 %v3043_v62, %v3044_v16  ;;  %v6420_v27 = vadd.f32 %v6417_v42, %v3365_v1 }
 0x3ef   :  { %v3046_v39 = vmax.f32 %v3045_v45, 0.0 }
 0x3f1   :  { %v3048_v5 = vadd.f32 1e-05, %v3046_v39 }
 0x3f3   :  { %5432 = vrsqrt.f32 %v3048_v5 }
 0x3fd   :  { %v5433_v4 = vpop.eup %5432 }
 0x3fe   :  { %v3050_v7 = vmul.f32 %v5433_v4, %v3047_v6 }
 0x400   :  { %v3052_v9 = vmul.f32 %v3050_v7, %v3042_v32  ;;  %v3058_v0 = vrot.slane %v3050_v7, %v5893_v60 }
 0x402   :  { %v3053_v15 = vsub.f32 %v3051_v23, %v3052_v9  ;;  %v3074_v46 = vmul.f32 %v5306_v55, %v3058_v0  ;;  %v3060_v48 = vmul.f32 %v6302_v56, %v3058_v0  ;;  %v3061_v49 = vmul.f32 %v6299_v53, %v3058_v0 }
 0x403   :  { %v3062_v29 = vmul.f32 %v6320_v40, %v3058_v0  ;;  %v3063_v12 = vmul.f32 %v6315_v24, %v3058_v0  ;;  %v3064_v63 = vmul.f32 %v6337_v10, %v3058_v0  ;;  %v3065_v44 = vmul.f32 %v6332_v50, %v3058_v0 }
 0x404   :  { %v3080_v36 = vrot.slane %v3053_v15, %v5893_v60  ;;  %v3066_v41 = vmul.f32 %v6353_v22, %v3058_v0  ;;  %v3067_v58 = vmul.f32 %v6350_v38, %v3058_v0  ;;  %v3068_v55 = vmul.f32 %v6365_v59, %v3058_v0 }
 0x405   :  { %v3069_v56 = vmul.f32 %v6362_v47, %v3058_v0  ;;  %v3070_v53 = vmul.f32 %v6377_v37, %v3058_v0  ;;  %v3071_v40 = vmul.f32 %v6374_v34, %v3058_v0  ;;  %v3072_v24 = vmul.f32 %v6389_v18, %v3058_v0 }
 0x406   :  { %v3082_v3 = vadd.f32 %v3080_v36, %v3060_v48  ;;  %v3083_v10 = vadd.f32 %v3080_v36, %v3061_v49  ;;  %v3084_v32 = vadd.f32 %v3080_v36, %v3062_v29  ;;  %v3085_v50 = vadd.f32 %v3080_v36, %v3063_v12 }
 0x407   :  { %v3086_v25 = vadd.f32 %v3080_v36, %v3064_v63  ;;  %v3087_v13 = vadd.f32 %v3080_v36, %v3065_v44  ;;  %v3088_v62 = vadd.f32 %v3080_v36, %v3066_v41  ;;  %v3089_v22 = vadd.f32 %v3080_v36, %v3067_v58 }
 0x408   :  { %v3098_v16 = vmax.f32 %v3082_v3, 0.0  ;;  %v3099_v38 = vmax.f32 %v3083_v10, 0.0  ;;  %v3100_v28 = vmax.f32 %v3084_v32, 0.0  ;;  %v3090_v59 = vadd.f32 %v3080_v36, %v3068_v55 }
 0x409   :  { %v3091_v47 = vadd.f32 %v3080_v36, %v3069_v56  ;;  %v3092_v45 = vadd.f32 %v3080_v36, %v3070_v53  ;;  %v3093_v37 = vadd.f32 %v3080_v36, %v3071_v40  ;;  %v3094_v34 = vadd.f32 %v3080_v36, %v3072_v24 }
 0x40a   :  { %4883 = vmatprep.mubr.f32.mxu0 %v3098_v16  ;;  %v3073_v18 = vmul.f32 %v6386_v43, %v3058_v0  ;;  %v3096_v11 = vadd.f32 %v3080_v36, %v3074_v46  ;;  %v3075_v1 = vmul.f32 %v6396_v31, %v3058_v0  ;;  %v3101_v39 = vmax.f32 %v3085_v50, 0.0 }
 0x40b   :  { %4884 = vmatmul.mubr.f32.vlgmr.msra.gmra.mrb[96].mxu0 %v3099_v38  ;;  %v3102_v4 = vmax.f32 %v3086_v25, 0.0  ;;  %v3103_v7 = vmax.f32 %v3087_v13, 0.0  ;;  %v3104_v23 = vmax.f32 %v3088_v62, 0.0  ;;  %v3105_v9 = vmax.f32 %v3089_v22, 0.0 }
 0x40c   :  { %4886 = vmatprep.mubr.f32.mxu0 %v3100_v28  ;;  %v3095_v5 = vadd.f32 %v3080_v36, %v3073_v18  ;;  %v3097_v6 = vadd.f32 %v3080_v36, %v3075_v1  ;;  %v3106_v15 = vmax.f32 %v3090_v59, 0.0  ;;  %v3107_v48 = vmax.f32 %v3091_v47, 0.0 }
 0x40d   :  { %v3108_v43 = vmax.f32 %v3092_v45, 0.0  ;;  %v3109_v31 = vmax.f32 %v3093_v37, 0.0  ;;  %v3110_v0 = vmax.f32 %v3094_v34, 0.0  ;;  %v3112_v49 = vmax.f32 %v3096_v11, 0.0 }
 0x40e   :  { %v3111_v46 = vmax.f32 %v3095_v5, 0.0  ;;  %v3113_v29 = vmax.f32 %v3097_v6, 0.0  ;;  %v3351_v12 = vmul.f32 %v6412_v52, %v6238_v8  ;;  %v3352_v63 = vmul.f32 %v6234_v19, %v6412_v52 }
 0x40f   :  { %4887 = vmatmul.mubr.f32.gmra.mrb[98].mxu0 %v3101_v39  ;;  %v3353_v41 = vmul.f32 %v6412_v52, %v6246_v54  ;;  %v3354_v58 = vmul.f32 %v6244_v17, %v6412_v52  ;;  %v3355_v19 = vmul.f32 %v6412_v52, %v6255_v33  ;;  %v3356_v56 = vmul.f32 %v6253_v21, %v6412_v52 }
 0x410   :  { %4889 = vmatprep.mubr.f32.mxu0 %v3102_v4  ;;  %v6450_v44 = vadd.f32 %v6417_v42, %v3351_v12  ;;  %v6453_v36 = vadd.f32 %v6417_v42, %v3352_v63  ;;  %v3357_v17 = vmul.f32 %v6412_v52, %v6262_v35  ;;  %v3358_v40 = vmul.f32 %v6260_v61, %v6412_v52 }
 0x411   :  { %v6460_v55 = vadd.f32 %v6417_v42, %v3353_v41  ;;  %v6463_v8 = vadd.f32 %v6417_v42, %v3354_v58  ;;  %v6470_v53 = vadd.f32 %v6417_v42, %v3355_v19  ;;  %v6473_v54 = vadd.f32 %v6417_v42, %v3356_v56 }
 0x412   :  { %v6480_v24 = vadd.f32 %v6417_v42, %v3357_v17  ;;  %v6483_v33 = vadd.f32 %v6417_v42, %v3358_v40  ;;  %v3359_v21 = vmul.f32 %v6412_v52, %v6269_v2  ;;  %v3360_v3 = vmul.f32 %v6267_v57, %v6412_v52 }
 0x413   :  { %4890 = vmatmul.mubr.f32.gmra.mrb[100].mxu0 %v3103_v7  ;;  %v3361_v61 = vmul.f32 %v6412_v52, %v6276_v20  ;;  %v3362_v32 = vmul.f32 %v6274_v30, %v6412_v52  ;;  %v3363_v57 = vmul.f32 %v6412_v52, %v6283_v51  ;;  %v3364_v25 = vmul.f32 %v6281_v14, %v6412_v52 }
 0x414   :  { %4892 = vmatprep.mubr.f32.mxu0 %v3104_v23  ;;  %v6490_v10 = vadd.f32 %v6417_v42, %v3359_v21  ;;  %v6493_v35 = vadd.f32 %v6417_v42, %v3360_v3  ;;  %v3366_v30 = vmul.f32 %v6288_v26, %v6412_v52 }
 0x415   :  { %v6500_v50 = vadd.f32 %v6417_v42, %v3361_v61  ;;  %v6503_v2 = vadd.f32 %v6417_v42, %v3362_v32  ;;  %v6510_v13 = vadd.f32 %v6417_v42, %v3363_v57  ;;  %v6513_v20 = vadd.f32 %v6417_v42, %v3364_v25 }
 0x416   :  { %v6518_v62 = vadd.f32 %v6417_v42, %v3366_v30 }
 0x417   :  { %4893 = vmatmul.mubr.f32.gmra.mrb[102].mxu0 %v3105_v9 }
 0x418   :  { %4895 = vmatprep.mubr.f32.mxu0 %v3106_v15 }
 0x41b   :  { %4896 = vmatmul.mubr.f32.gmra.mrb[104].mxu0 %v3107_v48 }
 0x41c   :  { %4898 = vmatprep.mubr.f32.mxu0 %v3108_v43 }
 0x41f   :  { %4899 = vmatmul.mubr.f32.gmra.mrb[106].mxu0 %v3109_v31 }
 0x420   :  { %4901 = vmatprep.mubr.f32.mxu0 %v3110_v0 }
 0x423   :  { %4902 = vmatmul.mubr.f32.gmra.mrb[108].mxu0 %v3111_v46 }
 0x424   :  { %4904 = vmatprep.mubr.f32.mxu0 %v3112_v49 }
 0x427   :  { %4905 = vmatmul.mubr.f32.gmra.mrb[110].mxu0 %v3113_v29 }
 0x4de   :  { %v6520_v22 = vpop.f32.mrb[96].mxu0 }
 0x4df   :  { %v3572_v51 = vmul.f32 %v6520_v22, %v6520_v22  ;;  %v6524_v16 = vpop.f32.mrb[97].mxu0 }
 0x4e0   :  { %v3550_v14 = vadd.f32 %v6520_v22, %v6524_v16  ;;  %v3571_v38 = vmul.f32 %v6524_v16, %v6524_v16 }
 0x4e2   :  { %v3587_v28 = vadd.f32 %v3572_v51, %v3571_v38  ;;  %v6530_v59 = vpop.f32.mrb[98].mxu0 }
 0x4e3   :  { %v6532_v26 = vpop.f32.mrb[99].mxu0  ;;  %v3574_v47 = vmul.f32 %v6530_v59, %v6530_v59 }
 0x4e4   :  { %v3551_v52 = vadd.f32 %v3550_v14, %v6532_v26  ;;  %v3573_v42 = vmul.f32 %v6532_v26, %v6532_v26 }
 0x4e6   :  { %v3588_v45 = vadd.f32 %v3587_v28, %v3573_v42  ;;  %v6539_v37 = vpop.f32.mrb[100].mxu0  ;;  %v3552_v34 = vadd.f32 %v6530_v59, %v3551_v52 }
 0x4e7   :  { %v6542_v18 = vpop.f32.mrb[101].mxu0  ;;  %v3576_v5 = vmul.f32 %v6539_v37, %v6539_v37 }
 0x4e8   :  { %v3553_v11 = vadd.f32 %v3552_v34, %v6542_v18  ;;  %v3575_v1 = vmul.f32 %v6542_v18, %v6542_v18  ;;  %v3589_v39 = vadd.f32 %v3588_v45, %v3574_v47 }
 0x4ea   :  { %v3590_v6 = vadd.f32 %v3589_v39, %v3575_v1  ;;  %v6549_v4 = vpop.f32.mrb[102].mxu0  ;;  %v3554_v7 = vadd.f32 %v6539_v37, %v3553_v11 }
 0x4eb   :  { %v6552_v23 = vpop.f32.mrb[103].mxu0  ;;  %v3578_v43 = vmul.f32 %v6549_v4, %v6549_v4 }
 0x4ec   :  { %v3555_v9 = vadd.f32 %v3554_v7, %v6552_v23  ;;  %v3577_v15 = vmul.f32 %v6552_v23, %v6552_v23  ;;  %v3591_v48 = vadd.f32 %v3590_v6, %v3576_v5 }
 0x4ee   :  { %v3592_v31 = vadd.f32 %v3591_v48, %v3577_v15  ;;  %v6559_v0 = vpop.f32.mrb[104].mxu0  ;;  %v3556_v46 = vadd.f32 %v6549_v4, %v3555_v9 }
 0x4ef   :  { %v6562_v49 = vpop.f32.mrb[105].mxu0  ;;  %v3580_v41 = vmul.f32 %v6559_v0, %v6559_v0 }
 0x4f0   :  { %v3557_v29 = vadd.f32 %v3556_v46, %v6562_v49  ;;  %v3579_v12 = vmul.f32 %v6562_v49, %v6562_v49  ;;  %v3593_v63 = vadd.f32 %v3592_v31, %v3578_v43 }
 0x4f2   :  { %v3594_v58 = vadd.f32 %v3593_v63, %v3579_v12  ;;  %v6569_v19 = vpop.f32.mrb[106].mxu0  ;;  %v3558_v56 = vadd.f32 %v6559_v0, %v3557_v29 }
 0x4f3   :  { %v3521_v17 = vpop.f32.mrb[107].mxu0  ;;  %v3582_v61 = vmul.f32 %v6569_v19, %v6569_v19 }
 0x4f4   :  { %v3559_v40 = vadd.f32 %v3558_v56, %v3521_v17  ;;  %v3581_v21 = vmul.f32 %v3521_v17, %v3521_v17  ;;  %v3595_v3 = vadd.f32 %v3594_v58, %v3580_v41 }
 0x4f6   :  { %v3596_v32 = vadd.f32 %v3595_v3, %v3581_v21  ;;  %v4903_v57 = vpop.f32.mrb[108].mxu0  ;;  %v3560_v25 = vadd.f32 %v6569_v19, %v3559_v40 }
 0x4f7   :  { %v3531_v30 = vpop.f32.mrb[109].mxu0  ;;  %v3584_v28 = vmul.f32 %v4903_v57, %v4903_v57 }
 0x4f8   :  { %v3561_v51 = vadd.f32 %v3560_v25, %v3531_v30  ;;  %v3583_v14 = vmul.f32 %v3531_v30, %v3531_v30  ;;  %v3597_v38 = vadd.f32 %v3596_v32, %v3582_v61 }
 0x4fa   :  { %v3598_v52 = vadd.f32 %v3597_v38, %v3583_v14  ;;  %v4906_v42 = vpop.f32.mrb[110].mxu0  ;;  %v3562_v47 = vadd.f32 %v4903_v57, %v3561_v51  ;;  %v3613_v51 = vld [vmem:[%s6633_s8] sm:$0x1]  ;;  %s5601_s8 = smov [#allocation12]  }
 0x4fb   :  { %v3541_v45 = vpop.f32.mrb[111].mxu0  ;;  %v3586_v39 = vmul.f32 %v4906_v42, %v4906_v42 }
 0x4fc   :  { %v3563_v34 = vadd.f32 %v3562_v47, %v3541_v45  ;;  %v3585_v11 = vmul.f32 %v3541_v45, %v3541_v45  ;;  %v3599_v1 = vadd.f32 %v3598_v52, %v3584_v28  ;;  %v3617_v28 = vld [vmem:[%s6634_s9] sm:$0x1]  ;;  %s3717_s9 = sshll.u32 %s5601_s8, 4  ;;  %s3718_s9 = int_to_ptr.vmem [resolvable:$true] %s3717_s9 }
 0x4fd   :  { %s5563_s30 = scalar_lea.vmem %s3718_s9, 2048  ;;  %p5568_p13 = scmp.lt.s32.totalorder %s3718_s9, %s3718_s9 }
 0x4fe   :  { %v3564_v5 = vadd.f32 %v4906_v42, %v3563_v34  ;;  %v3600_v6 = vadd.f32 %v3599_v1, %v3585_v11  ;;  %p5564_p12 = scmp.ne.s32.totalorder %s3718_s9, %s5563_s30  ;;  %p5569_p0 = scmp.lt.s32.totalorder %s5563_s30, %s5563_s30 }
 0x500   :  { %v3565_v7 = vrot.slane %v3564_v5, 4  ;;  %v3601_v9 = vadd.f32 %v3600_v6, %v3586_v39  ;;  %p5570_p1 = por %p5569_p0, %p5568_p13 }
 0x502   :  { %v3566_v15 = vadd.f32 %v3565_v7, %v3564_v5  ;;  %v3602_v48 = vrot.slane %v3601_v9, 4  ;;  %p5571_p2 = pnand %p5570_p1, %p5564_p12 }
 0x504   :  { %v3567_v43 = vrot.slane %v3566_v15, 2  ;;  %v3603_v31 = vadd.f32 %v3602_v48, %v3601_v9 }
 0x506   :  { %v3568_v46 = vadd.f32 %v3567_v43, %v3566_v15  ;;  %v3604_v29 = vrot.slane %v3603_v31, 2 }
 0x508   :  { %v3569_v12 = vrot.slane %v3568_v46, 1  ;;  %v3605_v63 = vadd.f32 %v3604_v29, %v3603_v31 }
 0x50a   :  { %v3570_v41 = vadd.f32 %v3569_v12, %v3568_v46  ;;  %v3606_v58 = vrot.slane %v3605_v63, 1 }
 0x50c   :  { %v3607_v56 = vadd.f32 %v3606_v58, %v3605_v63  ;;  %v3608_v40 = vmul.f32 0.0078125, %v3570_v41 }
 0x50e   :  { %v3609_v21 = vmul.f32 0.0078125, %v3607_v56  ;;  %v3610_v3 = vmul.f32 %v3608_v40, %v3608_v40 }
 0x510   :  { %v3611_v61 = vsub.f32 %v3609_v21, %v3610_v3 }
 0x512   :  { %v3612_v32 = vmax.f32 %v3611_v61, 0.0 }
 0x514   :  { %v3614_v25 = vadd.f32 1e-05, %v3612_v32 }
 0x516   :  { %5434 = vrsqrt.f32 %v3614_v25 }
 0x520   :  { %v5435_v14 = vpop.eup %5434 }
 0x521   :  { %v3616_v38 = vmul.f32 %v5435_v14, %v3613_v51 }
 0x523   :  { %v3618_v52 = vmul.f32 %v3616_v38, %v3608_v40  ;;  %v3624_v47 = vrot.slane %v3616_v38, %v5893_v60 }
 0x525   :  { %v3619_v34 = vsub.f32 %v3617_v28, %v3618_v52  ;;  %v3640_v11 = vmul.f32 %v3624_v47, %v3541_v45  ;;  %v3626_v1 = vmul.f32 %v3624_v47, %v6524_v16  ;;  %v3627_v39 = vmul.f32 %v6520_v22, %v3624_v47 }
 0x526   :  { %v3628_v5 = vmul.f32 %v3624_v47, %v6532_v26  ;;  %v3629_v6 = vmul.f32 %v6530_v59, %v3624_v47  ;;  %v3630_v7 = vmul.f32 %v3624_v47, %v6542_v18  ;;  %v3631_v9 = vmul.f32 %v6539_v37, %v3624_v47 }
 0x527   :  { %v3646_v15 = vrot.slane %v3619_v34, %v5893_v60  ;;  %v3632_v48 = vmul.f32 %v3624_v47, %v6552_v23  ;;  %v3633_v43 = vmul.f32 %v6549_v4, %v3624_v47  ;;  %v3634_v45 = vmul.f32 %v3624_v47, %v6562_v49 }
 0x528   :  { %v3635_v16 = vmul.f32 %v6559_v0, %v3624_v47  ;;  %v3636_v31 = vmul.f32 %v3624_v47, %v3521_v17  ;;  %v3637_v22 = vmul.f32 %v6569_v19, %v3624_v47  ;;  %v3638_v26 = vmul.f32 %v3624_v47, %v3531_v30 }
 0x529   :  { %v3662_v46 = vadd.f32 %v3646_v15, %v3640_v11  ;;  %v3639_v59 = vmul.f32 %v4903_v57, %v3624_v47  ;;  %v3641_v29 = vmul.f32 %v4906_v42, %v3624_v47  ;;  %v3648_v18 = vadd.f32 %v3646_v15, %v3626_v1 }
 0x52a   :  { %v3649_v12 = vadd.f32 %v3646_v15, %v3627_v39  ;;  %v3650_v37 = vadd.f32 %v3646_v15, %v3628_v5  ;;  %v3651_v63 = vadd.f32 %v3646_v15, %v3629_v6  ;;  %v3652_v60 = vadd.f32 %v3646_v15, %v3630_v7 }
 0x52b   :  { %v3678_v23 = vadd.f32 %v3662_v46, %v6420_v27  ;;  %v3653_v41 = vadd.f32 %v3646_v15, %v3631_v9  ;;  %v3654_v4 = vadd.f32 %v3646_v15, %v3632_v48  ;;  %v3655_v58 = vadd.f32 %v3646_v15, %v3633_v43 }
 0x52c   :  { %v3656_v49 = vadd.f32 %v3646_v15, %v3634_v45  ;;  %v3657_v56 = vadd.f32 %v3646_v15, %v3635_v16  ;;  %v3658_v0 = vadd.f32 %v3646_v15, %v3636_v31  ;;  %v3659_v17 = vadd.f32 %v3646_v15, %v3637_v22 }
 0x52d   :  { %v3694_v40 = vmax.f32 %v3678_v23, 0.0  ;;  %v3660_v19 = vadd.f32 %v3646_v15, %v3638_v26  ;;  %v3661_v30 = vadd.f32 %v3646_v15, %v3639_v59  ;;  %v3663_v21 = vadd.f32 %v3646_v15, %v3641_v29 }
 0x52e   :  { %v3664_v57 = vadd.f32 %v3648_v18, %v6450_v44  ;;  %v3665_v42 = vadd.f32 %v3649_v12, %v6453_v36  ;;  %v3666_v3 = vadd.f32 %v3650_v37, %v6460_v55  ;;  %v3667_v61 = vadd.f32 %v3651_v63, %v6463_v8 }
 0x52f   :  { %3710 = vst [vmem:[#allocation12 + $0x70] sm:$0xff] %v3694_v40  ;;  %v3668_v27 = vadd.f32 %v3652_v60, %v6470_v53  ;;  %v3669_v32 = vadd.f32 %v3653_v41, %v6473_v54  ;;  %v3670_v25 = vadd.f32 %v3654_v4, %v6480_v24  ;;  %v3671_v51 = vadd.f32 %v3655_v58, %v6483_v33 }
 0x530   :  { %v3672_v14 = vadd.f32 %v3656_v49, %v6490_v10  ;;  %v3673_v38 = vadd.f32 %v3657_v56, %v6493_v35  ;;  %v3674_v44 = vadd.f32 %v3658_v0, %v6500_v50  ;;  %v3675_v36 = vadd.f32 %v3659_v17, %v6503_v2 }
 0x531   :  { %v3676_v55 = vadd.f32 %v3660_v19, %v6510_v13  ;;  %v3677_v8 = vadd.f32 %v3661_v30, %v6513_v20  ;;  %v3679_v53 = vadd.f32 %v3663_v21, %v6518_v62  ;;  %v3680_v28 = vmax.f32 %v3664_v57, 0.0 }
 0x532   :  { %v3681_v54 = vmax.f32 %v3665_v42, 0.0  ;;  %v3682_v52 = vmax.f32 %v3666_v3, 0.0  ;;  %v3683_v24 = vmax.f32 %v3667_v61, 0.0  ;;  %v3684_v47 = vmax.f32 %v3668_v27, 0.0 }
 0x533   :  { %v3685_v33 = vmax.f32 %v3669_v32, 0.0  ;;  %v3686_v10 = vmax.f32 %v3670_v25, 0.0  ;;  %v3687_v35 = vmax.f32 %v3671_v51, 0.0  ;;  %v3688_v34 = vmax.f32 %v3672_v14, 0.0  ;;  %3696 = vst [vmem:[#allocation12] sm:$0xff] %v3680_v28 }
 0x534   :  { %v3689_v50 = vmax.f32 %v3673_v38, 0.0  ;;  %v3690_v2 = vmax.f32 %v3674_v44, 0.0  ;;  %v3691_v11 = vmax.f32 %v3675_v36, 0.0  ;;  %v3692_v13 = vmax.f32 %v3676_v55, 0.0  ;;  %3697 = vst [vmem:[#allocation12 + $0x8] sm:$0xff] %v3681_v54  ;;  %3698 = vst [vmem:[#allocation12 + $0x10] sm:$0xff] %v3682_v52 }
 0x535   :  { %3699 = vst [vmem:[#allocation12 + $0x18] sm:$0xff] %v3683_v24  ;;  %3700 = vst [vmem:[#allocation12 + $0x20] sm:$0xff] %v3684_v47  ;;  %v3693_v20 = vmax.f32 %v3677_v8, 0.0  ;;  %v3695_v62 = vmax.f32 %v3679_v53, 0.0 }
 0x536   :  { %3701 = vst [vmem:[#allocation12 + $0x28] sm:$0xff] %v3685_v33  ;;  %3702 = vst [vmem:[#allocation12 + $0x30] sm:$0xff] %v3686_v10 }
 0x537   :  { %3703 = vst [vmem:[#allocation12 + $0x38] sm:$0xff] %v3687_v35  ;;  %3704 = vst [vmem:[#allocation12 + $0x40] sm:$0xff] %v3688_v34 }
 0x538   :  { %3705 = vst [vmem:[#allocation12 + $0x48] sm:$0xff] %v3689_v50  ;;  %3706 = vst [vmem:[#allocation12 + $0x50] sm:$0xff] %v3690_v2 }
 0x539   :  { %3707 = vst [vmem:[#allocation12 + $0x58] sm:$0xff] %v3691_v11  ;;  %3708 = vst [vmem:[#allocation12 + $0x60] sm:$0xff] %v3692_v13 }
 0x53a   :  { %3709 = vst [vmem:[#allocation12 + $0x68] sm:$0xff] %v3693_v20  ;;  %3711 = vst [vmem:[#allocation12 + $0x78] sm:$0xff] %v3695_v62 }
 0x53b   :  { %5574 = shalt.err (!%p5571_p2)
}
 0x53c   :  { %s5575_s28 = scalar_lea.hbm %s6638_s13, 2048 }
 0x53d   :  { %p5576_p3 = scmp.ne.s32.totalorder %s6638_s13, %s5575_s28  ;;  %p5579_p4 = scmp.lt.u32.totalorder %s5575_s28, %s6638_s13 }
 0x53f   :  { %p5581_p5 = pnand %p5579_p4, %p5576_p3 }
 0x541   :  { %5584 = shalt.err (!%p5581_p5)
}
 0x542   :  { %3723 = dma.vmem_to_hbm [thread:$0]  %s3718_s9, 2048, %s6638_s13, [#allocation5], %s5595_s20, %s5595_s20, %s5596_s21  }
 0x543   :  { %5591 = dma.done.wait [#allocation5], 2048  }
 0x544   :  { %5592 = vsyncadd [#allocation5], 4294965248 }
 0x545   :  { %3727 = vsyncpa [#allocation4], 1 }
 0x546   :  { %3728 = vsyncpa [#allocation7], 1 }
 0x547   :  { %3729 = vsyncpa [#allocation10], 1 }
 0x548   :  { %3730 = vsyncpa [#allocation5], 1 }

</bundles_post_ra>
